<compile_context>
chip_gen: v7x
topology: tpu7x:2x2x1
jax: 0.10.0
libtpu: 0.0.40
codegen_flags: <defaults>
</compile_context>

<pallas_src>
import functools
import numpy as np
import jax
import jax.numpy as jnp
from jax.experimental import pallas as pl
from jax.experimental.pallas import tpu as pltpu

# ---------------- small config (structure identical to the PyTorch module) ------
CNN_CFG = [8, 'M', 16, 'M']          # small stand-in for cfg_vgg16
HIDDEN = 32                          # hidden_size (LMU units)
ORDER = 16                           # LMU order
THETA = 16.0
NUM_CLASSES = 10
BN_EPS = 1e-5
VMEM_LIMIT = 32 * 1024 * 1024        # explicit scoped-VMEM budget (safe on v5e/v6e/v7x)


# =================================================================================
# Pallas kernel 1: fused 3x3 conv (im2col built in VMEM) + bias + BN batch stats
# =================================================================================
def _conv3x3_bias_stats_kernel(x_ref, w_ref, b_ref, y_ref, ssum_ref, ssq_ref):
    # x_ref : (1, H+2, W+2, Cin)  bf16, spatially padded frame
    # w_ref : (9*Cin, Cout)       bf16, rows ordered (kh, kw, ci)
    # b_ref : (1, Cout)           f32
    # y_ref : (1, H*W, Cout)      f32 raw conv output (pre-BN)
    # ssum_ref / ssq_ref : (1, 1, Cout) f32 per-frame channel sums for BN stats
    H = x_ref.shape[1] - 2
    W = x_ref.shape[2] - 2
    cin = x_ref.shape[3]
    xp = x_ref[0]                                          # (H+2, W+2, Cin) in VMEM
    # Build the patch matrix entirely in VMEM (no HBM im2col).
    cols = [xp[kh:kh + H, kw:kw + W, :].reshape(H * W, cin)
            for kh in range(3) for kw in range(3)]
    patches = jnp.concatenate(cols, axis=1)                # (H*W, 9*Cin) bf16
    acc = jnp.dot(patches, w_ref[...],
                  preferred_element_type=jnp.float32)      # bf16 x bf16 -> f32
    acc = acc + b_ref[...]                                 # conv output incl. bias
    y_ref[0] = acc
    ssum_ref[0] = jnp.sum(acc, axis=0, keepdims=True)
    ssq_ref[0] = jnp.sum(acc * acc, axis=0, keepdims=True)


# =================================================================================
# Pallas kernel 2: BN apply (precomputed scale/shift) + ReLU, lane-dense, M-tiled
# =================================================================================
def _scale_shift_relu_kernel(x_ref, s_ref, b_ref, o_ref):
    y = x_ref[...] * s_ref[...] + b_ref[...]
    o_ref[...] = jnp.maximum(y, 0.0).astype(o_ref.dtype)


def conv_bn_relu(x_nhwc, p):
    """One conv layer: conv3x3(pad=1) + BatchNorm(batch stats) + ReLU."""
    N, H, W, Cin = x_nhwc.shape
    Cout = p['b'].shape[1]
    xp = jnp.pad(x_nhwc, ((0, 0), (1, 1), (1, 1), (0, 0)))   # halo pad (1.1x, not 9x)

    y_raw, ssum, ssq = pl.pallas_call(
        _conv3x3_bias_stats_kernel,
        out_shape=(jax.ShapeDtypeStruct((N, H * W, Cout), jnp.float32),
                   jax.ShapeDtypeStruct((N, 1, Cout), jnp.float32),
                   jax.ShapeDtypeStruct((N, 1, Cout), jnp.float32)),
        grid=(N,),
        in_specs=[pl.BlockSpec((1, H + 2, W + 2, Cin), lambda n: (n, 0, 0, 0)),
                  pl.BlockSpec((9 * Cin, Cout), lambda n: (0, 0)),
                  pl.BlockSpec((1, Cout), lambda n: (0, 0))],
        out_specs=(pl.BlockSpec((1, H * W, Cout), lambda n: (n, 0, 0)),
                   pl.BlockSpec((1, 1, Cout), lambda n: (n, 0, 0)),
                   pl.BlockSpec((1, 1, Cout), lambda n: (n, 0, 0))),
        compiler_params=pltpu.CompilerParams(
            dimension_semantics=("parallel",),
            vmem_limit_bytes=VMEM_LIMIT),
    )(xp, p['w'], p['b'])

    # BatchNorm batch statistics (train mode, biased variance) from fused sums.
    cnt = jnp.float32(N * H * W)
    mean = jnp.sum(ssum, axis=(0, 1)) / cnt
    var = jnp.sum(ssq, axis=(0, 1)) / cnt - mean * mean
    scale = p['gamma'] * jax.lax.rsqrt(var + BN_EPS)
    shift = p['beta'] - mean * scale
    scale_row = jnp.tile(scale, W).reshape(1, W * Cout)      # per-channel, folded to W*C
    shift_row = jnp.tile(shift, W).reshape(1, W * Cout)

    # Fold to lane-dense (N*H, W*C) layout — pure row-major bitcast, no HBM pass.
    y2d = y_raw.reshape(N * H, W * Cout)
    M = N * H
    TM = M if M <= 512 else 512
    Mp = ((M + TM - 1) // TM) * TM
    if Mp != M:
        y2d = jnp.pad(y2d, ((0, Mp - M), (0, 0)))
    out2d = pl.pallas_call(
        _scale_shift_relu_kernel,
        out_shape=jax.ShapeDtypeStruct((Mp, W * Cout), jnp.bfloat16),
        grid=(Mp // TM,),
        in_specs=[pl.BlockSpec((TM, W * Cout), lambda i: (i, 0)),
                  pl.BlockSpec((1, W * Cout), lambda i: (0, 0)),
                  pl.BlockSpec((1, W * Cout), lambda i: (0, 0))],
        out_specs=pl.BlockSpec((TM, W * Cout), lambda i: (i, 0)),
        compiler_params=pltpu.CompilerParams(
            dimension_semantics=("parallel",),
            vmem_limit_bytes=VMEM_LIMIT),
    )(y2d, scale_row, shift_row)
    if Mp != M:
        out2d = out2d[:M]
    return out2d.reshape(N, H, W, Cout)                      # bf16, feeds next layer


# =================================================================================
# Pallas kernel 3: whole LMU recurrence in one kernel (in-kernel time loop)
# =================================================================================
def _lmu_kernel(x_ref, h0_ref, m0_ref, g_ref, at_ref, bt_ref, wm_ref, osum_ref):
    # x_ref: (T, B, D); G = [[wx|ex],[wh|eh],[0|em]] : (D+U+O, U+1)
    U = h0_ref.shape[1]
    g = g_ref[...]
    at = at_ref[...]
    bt = bt_ref[...]
    wm = wm_ref[...]

    def step(t, carry):
        h, m, acc = carry
        z = jnp.concatenate([x_ref[t], h, m], axis=1)               # (B, D+U+O)
        p = jnp.dot(z, g, preferred_element_type=jnp.float32)       # (B, U+1)
        u = p[:, U:U + 1]                                           # (B, 1)
        m_new = m + jnp.dot(m, at, preferred_element_type=jnp.float32) + u * bt
        h_new = jnp.tanh(p[:, :U]
                         + jnp.dot(m_new, wm, preferred_element_type=jnp.float32))
        return h_new, m_new, acc + h_new

    init = (h0_ref[...], m0_ref[...], jnp.zeros(osum_ref.shape, jnp.float32))
    _, _, acc = jax.lax.fori_loop(0, x_ref.shape[0], step, init)
    osum_ref[...] = acc                                             # sum_t h_t


def lmu_forward(x_btd, h0, m0, p):
    B, T, D = x_btd.shape
    U = h0.shape[1]
    O = m0.shape[1]
    x_tbd = jnp.transpose(x_btd, (1, 0, 2))       # time-major

    def full(shape):
        n = len(shape)
        return pl.BlockSpec(shape, lambda i, n=n: (0,) * n)

    return pl.pallas_call(
        _lmu_kernel,
        out_shape=jax.ShapeDtypeStruct((B, U), jnp.float32),
        grid=(1,),
        in_specs=[full((T, B, D)), full((B, U)), full((B, O)),
                  full((D + U + O, U + 1)), full((O, O)), full((1, O)),
                  full((O, U))],
        out_specs=full((B, U)),
        compiler_params=pltpu.CompilerParams(
            dimension_semantics=("arbitrary",),
            vmem_limit_bytes=VMEM_LIMIT),
    )(x_tbd, h0, m0, p['G'], p['AT'], p['BT'], p['wm'])


# =================================================================================
# Pallas kernel 4: small Linear (+ optional ReLU) for the MLP head
# =================================================================================
def _linear_kernel(a_ref, w_ref, b_ref, o_ref, *, act):
    a = a_ref[...].astype(w_ref.dtype)                # bf16 activations on the MXU
    acc = jnp.dot(a, w_ref[...], preferred_element_type=jnp.float32) + b_ref[...]
    if act == 'relu':
        acc = jnp.maximum(acc, 0.0)
    o_ref[...] = acc.astype(o_ref.dtype)


def linear(a, w, b, act=None):
    # Head matmuls are tiny (M = batch); one full block, no pad / slice needed.
    M, K = a.shape
    N = w.shape[1]
    return pl.pallas_call(
        functools.partial(_linear_kernel, act=act),
        out_shape=jax.ShapeDtypeStruct((M, N), jnp.float32),
        grid=(1,),
        in_specs=[pl.BlockSpec((M, K), lambda i: (0, 0)),
                  pl.BlockSpec((K, N), lambda i: (0, 0)),
                  pl.BlockSpec((1, N), lambda i: (0, 0))],
        out_specs=pl.BlockSpec((M, N), lambda i: (0, 0)),
        compiler_params=pltpu.CompilerParams(
            dimension_semantics=("arbitrary",),
            vmem_limit_bytes=VMEM_LIMIT),
    )(a, w, b.reshape(1, N))


# ---------------- glue: pooling, CNN driver, parameter init ---------------------
def maxpool2x2(x):   # (N, H, W, C) -> (N, H/2, W/2, C)
    N, H, W, C = x.shape
    return x.reshape(N, H // 2, 2, W // 2, 2, C).max(axis=(2, 4))


def cnn_forward(x_nchw, convs):
    x = jnp.transpose(x_nchw, (0, 2, 3, 1)).astype(jnp.bfloat16)   # NHWC, bf16
    ci = 0
    for layer in CNN_CFG:
        if layer == 'M':
            x = maxpool2x2(x)
        else:
            x = conv_bn_relu(x, convs[ci])
            ci += 1
    # AdaptiveAvgPool2d((2, 1)) then flatten in NCHW order (C, 2)
    N, H, W, C = x.shape
    xf = x.astype(jnp.float32)
    pooled = xf.reshape(N, 2, H // 2, W, C).mean(axis=(2, 3))       # (N, 2, C)
    return jnp.transpose(pooled, (0, 2, 1)).reshape(N, 2 * C)


def lmu_state_space(order, theta):
    # LegendreDelay continuous system, ZOH-discretized with dt=1; returns (A_d - I)^T, B_d^T.
    q = np.arange(order, dtype=np.float64)
    R = (2.0 * q + 1.0)[:, None] / theta
    i, j = np.meshgrid(q, q, indexing='ij')
    A = np.where(i < j, -1.0, (-1.0) ** (i - j + 1)) * R
    B = ((-1.0) ** q)[:, None] * R
    M = np.zeros((order + 1, order + 1))
    M[:order, :order] = A
    M[:order, order:] = B
    expM = np.asarray(jax.scipy.linalg.expm(jnp.asarray(M)))
    Ad = expM[:order, :order]
    Bd = expM[:order, order:]
    return (jnp.asarray((Ad - np.eye(order)).T, jnp.float32),
            jnp.asarray(Bd.T, jnp.float32))


def init_params(key):
    params = {}
    keys = iter(jax.random.split(key, 32))
    convs = []
    in_c = 1
    for layer in CNN_CFG:
        if layer == 'M':
            continue
        k = next(keys)
        std = np.sqrt(2.0 / (layer * 9))                     # kaiming_normal fan_out / relu
        w = jax.random.normal(k, (3, 3, in_c, layer), jnp.float32) * std
        convs.append({'w': w.reshape(9 * in_c, layer).astype(jnp.bfloat16),
                      'b': jnp.zeros((1, layer), jnp.float32),
                      'gamma': jnp.ones((layer,), jnp.float32),
                      'beta': jnp.zeros((layer,), jnp.float32)})
        in_c = layer
    params['convs'] = convs
    feat = 2 * in_c                                          # cnn output features

    stdv = 1.0 / np.sqrt(HIDDEN)
    uni = lambda k, shape: jax.random.uniform(k, shape, jnp.float32, -stdv, stdv)
    AT, BT = lmu_state_space(ORDER, THETA)
    ex = uni(next(keys), (feat, 1))
    eh = uni(next(keys), (HIDDEN, 1))
    em = jnp.zeros((ORDER, 1), jnp.float32)                  # LMUCell hardcodes Constant(0)
    wx = uni(next(keys), (feat, HIDDEN))
    wh = uni(next(keys), (HIDDEN, HIDDEN))
    wm = uni(next(keys), (ORDER, HIDDEN))
    # Fused per-step weight: z=[x,h,m] @ G -> [x@wx + h@wh | u]
    G = jnp.concatenate([
        jnp.concatenate([wx, ex], axis=1),
        jnp.concatenate([wh, eh], axis=1),
        jnp.concatenate([jnp.zeros((ORDER, HIDDEN), jnp.float32), em], axis=1),
    ], axis=0)
    params['lmu'] = {'G': G, 'wm': wm, 'AT': AT, 'BT': BT}

    def linear_init(k, fan_in, fan_out):
        kw, kb = jax.random.split(k)
        bound = 1.0 / np.sqrt(fan_in)
        w = jax.random.uniform(kw, (fan_in, fan_out), jnp.float32, -bound, bound)
        b = jax.random.uniform(kb, (fan_out,), jnp.float32, -bound, bound)
        return w.astype(jnp.bfloat16), b
    params['lin1'] = linear_init(next(keys), HIDDEN, 512)    # 512 hardcoded in the module
    params['lin2'] = linear_init(next(keys), 512, NUM_CLASSES)
    return params


def cnn_rnn_forward(x, hidden_state, params):
    B, T, C, H, W = x.shape
    c_in = x.reshape(B * T, C, H, W)
    c_out = cnn_forward(c_in, params['convs'])
    feats = c_out.reshape(B, T, -1)
    h0, m0 = hidden_state
    out_sum = lmu_forward(feats, h0, m0, params['lmu'])      # == sum_t h_t
    w1, b1 = params['lin1']
    z = linear(out_sum, w1, b1, act='relu')
    # TODO(synk): Dropout(0.5) (training-mode RNG mask) applied as identity.
    w2, b2 = params['lin2']
    return linear(z, w2, b2, act=None)


if __name__ == "__main__":
    key = jax.random.PRNGKey(0)
    kp, kx = jax.random.split(key)
    params = init_params(kp)
    B, T, H, W = 2, 3, 16, 16
    x = jax.random.normal(kx, (B, T, 1, H, W), jnp.float32)
    h0 = jnp.zeros((B, HIDDEN), jnp.float32)
    m0 = jnp.zeros((B, ORDER), jnp.float32)
    out = jax.jit(cnn_rnn_forward)(x, (h0, m0), params)
    jax.block_until_ready(out)
    assert out.shape == (B, NUM_CLASSES)
    print("KERNEL_OK")
</pallas_src>

<mosaic_0001>
module attributes {stable_mosaic.version = 11 : i64} {
  func.func @_conv3x3_bias_stats_kernel(%arg0: i32, %arg1: memref<1x18x18x1xbf16, #tpu.memory_space<vmem>>, %arg2: memref<9x8xbf16, #tpu.memory_space<vmem>>, %arg3: memref<1x8xf32, #tpu.memory_space<vmem>>, %arg4: memref<1x256x8xf32, #tpu.memory_space<vmem>>, %arg5: memref<1x1x8xf32, #tpu.memory_space<vmem>>, %arg6: memref<1x1x8xf32, #tpu.memory_space<vmem>>) attributes {dimension_semantics = [#tpu.dimension_semantics<parallel>], iteration_bounds = array<i64: 6>, scalar_prefetch = 0 : i64, scratch_operands = 0 : i64, tpu.core_type = #tpu.core_type<tc>, window_params = [{transform_indices = @transform_0, window_bounds = array<i64: 1, 18, 18, 1>}, {pipeline_mode = #tpu.pipeline_mode<synchronous>, transform_indices = @transform_1, window_bounds = array<i64: 9, 8>}, {pipeline_mode = #tpu.pipeline_mode<synchronous>, transform_indices = @transform_2, window_bounds = array<i64: 1, 8>}, {transform_indices = @transform_3, window_bounds = array<i64: 1, 256, 8>}, {transform_indices = @transform_4, window_bounds = array<i64: 1, 1, 8>}, {transform_indices = @transform_5, window_bounds = array<i64: 1, 1, 8>}]} {
    %c0 = arith.constant 0 : index
    %c0_0 = arith.constant 0 : index
    %c0_1 = arith.constant 0 : index
    %c0_2 = arith.constant 0 : index
    %0 = vector.load %arg1[%c0, %c0_0, %c0_1, %c0_2] : memref<1x18x18x1xbf16, #tpu.memory_space<vmem>>, vector<1x18x18x1xbf16>
    %1 = vector.shape_cast %0 : vector<1x18x18x1xbf16> to vector<18x18x1xbf16>
    %2 = vector.extract_strided_slice %1 {offsets = [0, 0, 0], sizes = [16, 16, 1], strides = [1, 1, 1]} : vector<18x18x1xbf16> to vector<16x16x1xbf16>
    %3 = vector.shape_cast %2 : vector<16x16x1xbf16> to vector<256x1xbf16>
    %4 = vector.extract_strided_slice %1 {offsets = [0, 1, 0], sizes = [16, 16, 1], strides = [1, 1, 1]} : vector<18x18x1xbf16> to vector<16x16x1xbf16>
    %5 = vector.shape_cast %4 : vector<16x16x1xbf16> to vector<256x1xbf16>
    %6 = vector.extract_strided_slice %1 {offsets = [0, 2, 0], sizes = [16, 16, 1], strides = [1, 1, 1]} : vector<18x18x1xbf16> to vector<16x16x1xbf16>
    %7 = vector.shape_cast %6 : vector<16x16x1xbf16> to vector<256x1xbf16>
    %8 = vector.extract_strided_slice %1 {offsets = [1, 0, 0], sizes = [16, 16, 1], strides = [1, 1, 1]} : vector<18x18x1xbf16> to vector<16x16x1xbf16>
    %9 = vector.shape_cast %8 : vector<16x16x1xbf16> to vector<256x1xbf16>
    %10 = vector.extract_strided_slice %1 {offsets = [1, 1, 0], sizes = [16, 16, 1], strides = [1, 1, 1]} : vector<18x18x1xbf16> to vector<16x16x1xbf16>
    %11 = vector.shape_cast %10 : vector<16x16x1xbf16> to vector<256x1xbf16>
    %12 = vector.extract_strided_slice %1 {offsets = [1, 2, 0], sizes = [16, 16, 1], strides = [1, 1, 1]} : vector<18x18x1xbf16> to vector<16x16x1xbf16>
    %13 = vector.shape_cast %12 : vector<16x16x1xbf16> to vector<256x1xbf16>
    %14 = vector.extract_strided_slice %1 {offsets = [2, 0, 0], sizes = [16, 16, 1], strides = [1, 1, 1]} : vector<18x18x1xbf16> to vector<16x16x1xbf16>
    %15 = vector.shape_cast %14 : vector<16x16x1xbf16> to vector<256x1xbf16>
    %16 = vector.extract_strided_slice %1 {offsets = [2, 1, 0], sizes = [16, 16, 1], strides = [1, 1, 1]} : vector<18x18x1xbf16> to vector<16x16x1xbf16>
    %17 = vector.shape_cast %16 : vector<16x16x1xbf16> to vector<256x1xbf16>
    %18 = vector.extract_strided_slice %1 {offsets = [2, 2, 0], sizes = [16, 16, 1], strides = [1, 1, 1]} : vector<18x18x1xbf16> to vector<16x16x1xbf16>
    %19 = vector.shape_cast %18 : vector<16x16x1xbf16> to vector<256x1xbf16>
    %20 = tpu.concatenate %3, %5, %7, %9, %11, %13, %15, %17, %19 in 1 : vector<256x1xbf16>, vector<256x1xbf16>, vector<256x1xbf16>, vector<256x1xbf16>, vector<256x1xbf16>, vector<256x1xbf16>, vector<256x1xbf16>, vector<256x1xbf16>, vector<256x1xbf16> -> vector<256x9xbf16>
    %c0_3 = arith.constant 0 : index
    %c0_4 = arith.constant 0 : index
    %21 = vector.load %arg2[%c0_3, %c0_4] : memref<9x8xbf16, #tpu.memory_space<vmem>>, vector<9x8xbf16>
    %cst = arith.constant dense<0.000000e+00> : vector<256x8xf32>
    %22 = tpu.matmul %20, %21, %cst {dimension_numbers = #tpu.dot_dimension_numbers<[1], [0], [0], [1], [0, 0, 1, 1], [], []>} : vector<256x9xbf16>, vector<9x8xbf16>, vector<256x8xf32> -> vector<256x8xf32>
    %c0_5 = arith.constant 0 : index
    %c0_6 = arith.constant 0 : index
    %23 = vector.load %arg3[%c0_5, %c0_6] : memref<1x8xf32, #tpu.memory_space<vmem>>, vector<1x8xf32>
    %24 = vector.broadcast %23 : vector<1x8xf32> to vector<256x8xf32>
    %25 = arith.addf %22, %24 : vector<256x8xf32>
    %c0_7 = arith.constant 0 : index
    %c0_8 = arith.constant 0 : index
    %c0_9 = arith.constant 0 : index
    %26 = vector.load %arg4[%c0_7, %c0_8, %c0_9] : memref<1x256x8xf32, #tpu.memory_space<vmem>>, vector<1x256x8xf32>
    %27 = vector.shape_cast %26 : vector<1x256x8xf32> to vector<256x8xf32>
    %28 = vector.shape_cast %25 : vector<256x8xf32> to vector<1x256x8xf32>
    tpu.vector_store %arg4[%c0_7, %c0_8, %c0_9], %28 {strides = array<i32>} : memref<1x256x8xf32, #tpu.memory_space<vmem>>, vector<1x256x8xf32>,
    %cst_10 = arith.constant dense<0.000000e+00> : vector<8xf32>
    %29 = vector.multi_reduction <add>, %25, %cst_10 [0] : vector<256x8xf32> to vector<8xf32>
    %30 = vector.shape_cast %29 : vector<8xf32> to vector<1x8xf32>
    %c0_11 = arith.constant 0 : index
    %c0_12 = arith.constant 0 : index
    %c0_13 = arith.constant 0 : index
    %31 = vector.load %arg5[%c0_11, %c0_12, %c0_13] : memref<1x1x8xf32, #tpu.memory_space<vmem>>, vector<1x1x8xf32>
    %32 = vector.shape_cast %31 : vector<1x1x8xf32> to vector<1x8xf32>
    %33 = vector.shape_cast %30 : vector<1x8xf32> to vector<1x1x8xf32>
    tpu.vector_store %arg5[%c0_11, %c0_12, %c0_13], %33 {strides = array<i32>} : memref<1x1x8xf32, #tpu.memory_space<vmem>>, vector<1x1x8xf32>,
    %34 = arith.mulf %25, %25 : vector<256x8xf32>
    %cst_14 = arith.constant dense<0.000000e+00> : vector<8xf32>
    %35 = vector.multi_reduction <add>, %34, %cst_14 [0] : vector<256x8xf32> to vector<8xf32>
    %36 = vector.shape_cast %35 : vector<8xf32> to vector<1x8xf32>
    %c0_15 = arith.constant 0 : index
    %c0_16 = arith.constant 0 : index
    %c0_17 = arith.constant 0 : index
    %37 = vector.load %arg6[%c0_15, %c0_16, %c0_17] : memref<1x1x8xf32, #tpu.memory_space<vmem>>, vector<1x1x8xf32>
    %38 = vector.shape_cast %37 : vector<1x1x8xf32> to vector<1x8xf32>
    %39 = vector.shape_cast %36 : vector<1x8xf32> to vector<1x1x8xf32>
    tpu.vector_store %arg6[%c0_15, %c0_16, %c0_17], %39 {strides = array<i32>} : memref<1x1x8xf32, #tpu.memory_space<vmem>>, vector<1x1x8xf32>,
    return
  }
  func.func @transform_0(%arg0: i32) -> (i32, i32, i32, i32) {
    %c0_i32 = arith.constant 0 : i32
    %c0_i32_0 = arith.constant 0 : i32
    %c0_i32_1 = arith.constant 0 : i32
    %c0_i32_2 = arith.constant 0 : i32
    return %arg0, %c0_i32, %c0_i32_0, %c0_i32_1 : i32, i32, i32, i32
  }
  func.func @transform_1(%arg0: i32) -> (i32, i32) {
    %c0_i32 = arith.constant 0 : i32
    %c0_i32_0 = arith.constant 0 : i32
    %c0_i32_1 = arith.constant 0 : i32
    return %c0_i32, %c0_i32_0 : i32, i32
  }
  func.func @transform_2(%arg0: i32) -> (i32, i32) {
    %c0_i32 = arith.constant 0 : i32
    %c0_i32_0 = arith.constant 0 : i32
    %c0_i32_1 = arith.constant 0 : i32
    return %c0_i32, %c0_i32_0 : i32, i32
  }
  func.func @transform_3(%arg0: i32) -> (i32, i32, i32) {
    %c0_i32 = arith.constant 0 : i32
    %c0_i32_0 = arith.constant 0 : i32
    %c0_i32_1 = arith.constant 0 : i32
    return %arg0, %c0_i32, %c0_i32_0 : i32, i32, i32
  }
  func.func @transform_4(%arg0: i32) -> (i32, i32, i32) {
    %c0_i32 = arith.constant 0 : i32
    %c0_i32_0 = arith.constant 0 : i32
    %c0_i32_1 = arith.constant 0 : i32
    return %arg0, %c0_i32, %c0_i32_0 : i32, i32, i32
  }
  func.func @transform_5(%arg0: i32) -> (i32, i32, i32) {
    %c0_i32 = arith.constant 0 : i32
    %c0_i32_0 = arith.constant 0 : i32
    %c0_i32_1 = arith.constant 0 : i32
    return %arg0, %c0_i32, %c0_i32_0 : i32, i32, i32
  }
}

module attributes {stable_mosaic.version = 11 : i64} {
  func.func @_scale_shift_relu_kernel(%arg0: i32, %arg1: memref<96x128xf32, #tpu.memory_space<vmem>>, %arg2: memref<1x128xf32, #tpu.memory_space<vmem>>, %arg3: memref<1x128xf32, #tpu.memory_space<vmem>>, %arg4: memref<96x128xbf16, #tpu.memory_space<vmem>>) attributes {dimension_semantics = [#tpu.dimension_semantics<parallel>], iteration_bounds = array<i64: 1>, scalar_prefetch = 0 : i64, scratch_operands = 0 : i64, tpu.core_type = #tpu.core_type<tc>, window_params = [{transform_indices = @transform_0, window_bounds = array<i64: 96, 128>}, {pipeline_mode = #tpu.pipeline_mode<synchronous>, transform_indices = @transform_1, window_bounds = array<i64: 1, 128>}, {pipeline_mode = #tpu.pipeline_mode<synchronous>, transform_indices = @transform_2, window_bounds = array<i64: 1, 128>}, {transform_indices = @transform_3, window_bounds = array<i64: 96, 128>}]} {
    %c0 = arith.constant 0 : index
    %c0_0 = arith.constant 0 : index
    %0 = vector.load %arg1[%c0, %c0_0] : memref<96x128xf32, #tpu.memory_space<vmem>>, vector<96x128xf32>
    %c0_1 = arith.constant 0 : index
    %c0_2 = arith.constant 0 : index
    %1 = vector.load %arg2[%c0_1, %c0_2] : memref<1x128xf32, #tpu.memory_space<vmem>>, vector<1x128xf32>
    %2 = vector.broadcast %1 : vector<1x128xf32> to vector<96x128xf32>
    %3 = arith.mulf %0, %2 : vector<96x128xf32>
    %c0_3 = arith.constant 0 : index
    %c0_4 = arith.constant 0 : index
    %4 = vector.load %arg3[%c0_3, %c0_4] : memref<1x128xf32, #tpu.memory_space<vmem>>, vector<1x128xf32>
    %5 = vector.broadcast %4 : vector<1x128xf32> to vector<96x128xf32>
    %6 = arith.addf %3, %5 : vector<96x128xf32>
    %cst = arith.constant 0.000000e+00 : f32
    %7 = vector.broadcast %cst : f32 to vector<96x128xf32>
    %8 = arith.maximumf %6, %7 : vector<96x128xf32>
    %9 = arith.truncf %8 : vector<96x128xf32> to vector<96x128xbf16>
    %c0_5 = arith.constant 0 : index
    %c0_6 = arith.constant 0 : index
    %10 = vector.load %arg4[%c0_5, %c0_6] : memref<96x128xbf16, #tpu.memory_space<vmem>>, vector<96x128xbf16>
    tpu.vector_store %arg4[%c0_5, %c0_6], %9 {strides = array<i32>} : memref<96x128xbf16, #tpu.memory_space<vmem>>, vector<96x128xbf16>,
    return
  }
  func.func @transform_0(%arg0: i32) -> (i32, i32) {
    %c0_i32 = arith.constant 0 : i32
    %c0_i32_0 = arith.constant 0 : i32
    return %arg0, %c0_i32 : i32, i32
  }
  func.func @transform_1(%arg0: i32) -> (i32, i32) {
    %c0_i32 = arith.constant 0 : i32
    %c0_i32_0 = arith.constant 0 : i32
    %c0_i32_1 = arith.constant 0 : i32
    return %c0_i32, %c0_i32_0 : i32, i32
  }
  func.func @transform_2(%arg0: i32) -> (i32, i32) {
    %c0_i32 = arith.constant 0 : i32
    %c0_i32_0 = arith.constant 0 : i32
    %c0_i32_1 = arith.constant 0 : i32
    return %c0_i32, %c0_i32_0 : i32, i32
  }
  func.func @transform_3(%arg0: i32) -> (i32, i32) {
    %c0_i32 = arith.constant 0 : i32
    %c0_i32_0 = arith.constant 0 : i32
    return %arg0, %c0_i32 : i32, i32
  }
}

module attributes {stable_mosaic.version = 11 : i64} {
  func.func @_conv3x3_bias_stats_kernel(%arg0: i32, %arg1: memref<1x10x10x8xbf16, #tpu.memory_space<vmem>>, %arg2: memref<72x16xbf16, #tpu.memory_space<vmem>>, %arg3: memref<1x16xf32, #tpu.memory_space<vmem>>, %arg4: memref<1x64x16xf32, #tpu.memory_space<vmem>>, %arg5: memref<1x1x16xf32, #tpu.memory_space<vmem>>, %arg6: memref<1x1x16xf32, #tpu.memory_space<vmem>>) attributes {dimension_semantics = [#tpu.dimension_semantics<parallel>], iteration_bounds = array<i64: 6>, scalar_prefetch = 0 : i64, scratch_operands = 0 : i64, tpu.core_type = #tpu.core_type<tc>, window_params = [{transform_indices = @transform_0, window_bounds = array<i64: 1, 10, 10, 8>}, {pipeline_mode = #tpu.pipeline_mode<synchronous>, transform_indices = @transform_1, window_bounds = array<i64: 72, 16>}, {pipeline_mode = #tpu.pipeline_mode<synchronous>, transform_indices = @transform_2, window_bounds = array<i64: 1, 16>}, {transform_indices = @transform_3, window_bounds = array<i64: 1, 64, 16>}, {transform_indices = @transform_4, window_bounds = array<i64: 1, 1, 16>}, {transform_indices = @transform_5, window_bounds = array<i64: 1, 1, 16>}]} {
    %c0 = arith.constant 0 : index
    %c0_0 = arith.constant 0 : index
    %c0_1 = arith.constant 0 : index
    %c0_2 = arith.constant 0 : index
    %0 = vector.load %arg1[%c0, %c0_0, %c0_1, %c0_2] : memref<1x10x10x8xbf16, #tpu.memory_space<vmem>>, vector<1x10x10x8xbf16>
    %1 = vector.shape_cast %0 : vector<1x10x10x8xbf16> to vector<10x10x8xbf16>
    %2 = vector.extract_strided_slice %1 {offsets = [0, 0, 0], sizes = [8, 8, 8], strides = [1, 1, 1]} : vector<10x10x8xbf16> to vector<8x8x8xbf16>
    %3 = vector.shape_cast %2 : vector<8x8x8xbf16> to vector<64x8xbf16>
    %4 = vector.extract_strided_slice %1 {offsets = [0, 1, 0], sizes = [8, 8, 8], strides = [1, 1, 1]} : vector<10x10x8xbf16> to vector<8x8x8xbf16>
    %5 = vector.shape_cast %4 : vector<8x8x8xbf16> to vector<64x8xbf16>
    %6 = vector.extract_strided_slice %1 {offsets = [0, 2, 0], sizes = [8, 8, 8], strides = [1, 1, 1]} : vector<10x10x8xbf16> to vector<8x8x8xbf16>
    %7 = vector.shape_cast %6 : vector<8x8x8xbf16> to vector<64x8xbf16>
    %8 = vector.extract_strided_slice %1 {offsets = [1, 0, 0], sizes = [8, 8, 8], strides = [1, 1, 1]} : vector<10x10x8xbf16> to vector<8x8x8xbf16>
    %9 = vector.shape_cast %8 : vector<8x8x8xbf16> to vector<64x8xbf16>
    %10 = vector.extract_strided_slice %1 {offsets = [1, 1, 0], sizes = [8, 8, 8], strides = [1, 1, 1]} : vector<10x10x8xbf16> to vector<8x8x8xbf16>
    %11 = vector.shape_cast %10 : vector<8x8x8xbf16> to vector<64x8xbf16>
    %12 = vector.extract_strided_slice %1 {offsets = [1, 2, 0], sizes = [8, 8, 8], strides = [1, 1, 1]} : vector<10x10x8xbf16> to vector<8x8x8xbf16>
    %13 = vector.shape_cast %12 : vector<8x8x8xbf16> to vector<64x8xbf16>
    %14 = vector.extract_strided_slice %1 {offsets = [2, 0, 0], sizes = [8, 8, 8], strides = [1, 1, 1]} : vector<10x10x8xbf16> to vector<8x8x8xbf16>
    %15 = vector.shape_cast %14 : vector<8x8x8xbf16> to vector<64x8xbf16>
    %16 = vector.extract_strided_slice %1 {offsets = [2, 1, 0], sizes = [8, 8, 8], strides = [1, 1, 1]} : vector<10x10x8xbf16> to vector<8x8x8xbf16>
    %17 = vector.shape_cast %16 : vector<8x8x8xbf16> to vector<64x8xbf16>
    %18 = vector.extract_strided_slice %1 {offsets = [2, 2, 0], sizes = [8, 8, 8], strides = [1, 1, 1]} : vector<10x10x8xbf16> to vector<8x8x8xbf16>
    %19 = vector.shape_cast %18 : vector<8x8x8xbf16> to vector<64x8xbf16>
    %20 = tpu.concatenate %3, %5, %7, %9, %11, %13, %15, %17, %19 in 1 : vector<64x8xbf16>, vector<64x8xbf16>, vector<64x8xbf16>, vector<64x8xbf16>, vector<64x8xbf16>, vector<64x8xbf16>, vector<64x8xbf16>, vector<64x8xbf16>, vector<64x8xbf16> -> vector<64x72xbf16>
    %c0_3 = arith.constant 0 : index
    %c0_4 = arith.constant 0 : index
    %21 = vector.load %arg2[%c0_3, %c0_4] : memref<72x16xbf16, #tpu.memory_space<vmem>>, vector<72x16xbf16>
    %cst = arith.constant dense<0.000000e+00> : vector<64x16xf32>
    %22 = tpu.matmul %20, %21, %cst {dimension_numbers = #tpu.dot_dimension_numbers<[1], [0], [0], [1], [0, 0, 1, 1], [], []>} : vector<64x72xbf16>, vector<72x16xbf16>, vector<64x16xf32> -> vector<64x16xf32>
    %c0_5 = arith.constant 0 : index
    %c0_6 = arith.constant 0 : index
    %23 = vector.load %arg3[%c0_5, %c0_6] : memref<1x16xf32, #tpu.memory_space<vmem>>, vector<1x16xf32>
    %24 = vector.broadcast %23 : vector<1x16xf32> to vector<64x16xf32>
    %25 = arith.addf %22, %24 : vector<64x16xf32>
    %c0_7 = arith.constant 0 : index
    %c0_8 = arith.constant 0 : index
    %c0_9 = arith.constant 0 : index
    %26 = vector.load %arg4[%c0_7, %c0_8, %c0_9] : memref<1x64x16xf32, #tpu.memory_space<vmem>>, vector<1x64x16xf32>
    %27 = vector.shape_cast %26 : vector<1x64x16xf32> to vector<64x16xf32>
    %28 = vector.shape_cast %25 : vector<64x16xf32> to vector<1x64x16xf32>
    tpu.vector_store %arg4[%c0_7, %c0_8, %c0_9], %28 {strides = array<i32>} : memref<1x64x16xf32, #tpu.memory_space<vmem>>, vector<1x64x16xf32>,
    %cst_10 = arith.constant dense<0.000000e+00> : vector<16xf32>
    %29 = vector.multi_reduction <add>, %25, %cst_10 [0] : vector<64x16xf32> to vector<16xf32>
    %30 = vector.shape_cast %29 : vector<16xf32> to vector<1x16xf32>
    %c0_11 = arith.constant 0 : index
    %c0_12 = arith.constant 0 : index
    %c0_13 = arith.constant 0 : index
    %31 = vector.load %arg5[%c0_11, %c0_12, %c0_13] : memref<1x1x16xf32, #tpu.memory_space<vmem>>, vector<1x1x16xf32>
    %32 = vector.shape_cast %31 : vector<1x1x16xf32> to vector<1x16xf32>
    %33 = vector.shape_cast %30 : vector<1x16xf32> to vector<1x1x16xf32>
    tpu.vector_store %arg5[%c0_11, %c0_12, %c0_13], %33 {strides = array<i32>} : memref<1x1x16xf32, #tpu.memory_space<vmem>>, vector<1x1x16xf32>,
    %34 = arith.mulf %25, %25 : vector<64x16xf32>
    %cst_14 = arith.constant dense<0.000000e+00> : vector<16xf32>
    %35 = vector.multi_reduction <add>, %34, %cst_14 [0] : vector<64x16xf32> to vector<16xf32>
    %36 = vector.shape_cast %35 : vector<16xf32> to vector<1x16xf32>
    %c0_15 = arith.constant 0 : index
    %c0_16 = arith.constant 0 : index
    %c0_17 = arith.constant 0 : index
    %37 = vector.load %arg6[%c0_15, %c0_16, %c0_17] : memref<1x1x16xf32, #tpu.memory_space<vmem>>, vector<1x1x16xf32>
    %38 = vector.shape_cast %37 : vector<1x1x16xf32> to vector<1x16xf32>
    %39 = vector.shape_cast %36 : vector<1x16xf32> to vector<1x1x16xf32>
    tpu.vector_store %arg6[%c0_15, %c0_16, %c0_17], %39 {strides = array<i32>} : memref<1x1x16xf32, #tpu.memory_space<vmem>>, vector<1x1x16xf32>,
    return
  }
  func.func @transform_0(%arg0: i32) -> (i32, i32, i32, i32) {
    %c0_i32 = arith.constant 0 : i32
    %c0_i32_0 = arith.constant 0 : i32
    %c0_i32_1 = arith.constant 0 : i32
    %c0_i32_2 = arith.constant 0 : i32
    return %arg0, %c0_i32, %c0_i32_0, %c0_i32_1 : i32, i32, i32, i32
  }
  func.func @transform_1(%arg0: i32) -> (i32, i32) {
    %c0_i32 = arith.constant 0 : i32
    %c0_i32_0 = arith.constant 0 : i32
    %c0_i32_1 = arith.constant 0 : i32
    return %c0_i32, %c0_i32_0 : i32, i32
  }
  func.func @transform_2(%arg0: i32) -> (i32, i32) {
    %c0_i32 = arith.constant 0 : i32
    %c0_i32_0 = arith.constant 0 : i32
    %c0_i32_1 = arith.constant 0 : i32
    return %c0_i32, %c0_i32_0 : i32, i32
  }
  func.func @transform_3(%arg0: i32) -> (i32, i32, i32) {
    %c0_i32 = arith.constant 0 : i32
    %c0_i32_0 = arith.constant 0 : i32
    %c0_i32_1 = arith.constant 0 : i32
    return %arg0, %c0_i32, %c0_i32_0 : i32, i32, i32
  }
  func.func @transform_4(%arg0: i32) -> (i32, i32, i32) {
    %c0_i32 = arith.constant 0 : i32
    %c0_i32_0 = arith.constant 0 : i32
    %c0_i32_1 = arith.constant 0 : i32
    return %arg0, %c0_i32, %c0_i32_0 : i32, i32, i32
  }
  func.func @transform_5(%arg0: i32) -> (i32, i32, i32) {
    %c0_i32 = arith.constant 0 : i32
    %c0_i32_0 = arith.constant 0 : i32
    %c0_i32_1 = arith.constant 0 : i32
    return %arg0, %c0_i32, %c0_i32_0 : i32, i32, i32
  }
}

module attributes {stable_mosaic.version = 11 : i64} {
  func.func @_scale_shift_relu_kernel(%arg0: i32, %arg1: memref<48x128xf32, #tpu.memory_space<vmem>>, %arg2: memref<1x128xf32, #tpu.memory_space<vmem>>, %arg3: memref<1x128xf32, #tpu.memory_space<vmem>>, %arg4: memref<48x128xbf16, #tpu.memory_space<vmem>>) attributes {dimension_semantics = [#tpu.dimension_semantics<parallel>], iteration_bounds = array<i64: 1>, scalar_prefetch = 0 : i64, scratch_operands = 0 : i64, tpu.core_type = #tpu.core_type<tc>, window_params = [{transform_indices = @transform_0, window_bounds = array<i64: 48, 128>}, {pipeline_mode = #tpu.pipeline_mode<synchronous>, transform_indices = @transform_1, window_bounds = array<i64: 1, 128>}, {pipeline_mode = #tpu.pipeline_mode<synchronous>, transform_indices = @transform_2, window_bounds = array<i64: 1, 128>}, {transform_indices = @transform_3, window_bounds = array<i64: 48, 128>}]} {
    %c0 = arith.constant 0 : index
    %c0_0 = arith.constant 0 : index
    %0 = vector.load %arg1[%c0, %c0_0] : memref<48x128xf32, #tpu.memory_space<vmem>>, vector<48x128xf32>
    %c0_1 = arith.constant 0 : index
    %c0_2 = arith.constant 0 : index
    %1 = vector.load %arg2[%c0_1, %c0_2] : memref<1x128xf32, #tpu.memory_space<vmem>>, vector<1x128xf32>
    %2 = vector.broadcast %1 : vector<1x128xf32> to vector<48x128xf32>
    %3 = arith.mulf %0, %2 : vector<48x128xf32>
    %c0_3 = arith.constant 0 : index
    %c0_4 = arith.constant 0 : index
    %4 = vector.load %arg3[%c0_3, %c0_4] : memref<1x128xf32, #tpu.memory_space<vmem>>, vector<1x128xf32>
    %5 = vector.broadcast %4 : vector<1x128xf32> to vector<48x128xf32>
    %6 = arith.addf %3, %5 : vector<48x128xf32>
    %cst = arith.constant 0.000000e+00 : f32
    %7 = vector.broadcast %cst : f32 to vector<48x128xf32>
    %8 = arith.maximumf %6, %7 : vector<48x128xf32>
    %9 = arith.truncf %8 : vector<48x128xf32> to vector<48x128xbf16>
    %c0_5 = arith.constant 0 : index
    %c0_6 = arith.constant 0 : index
    %10 = vector.load %arg4[%c0_5, %c0_6] : memref<48x128xbf16, #tpu.memory_space<vmem>>, vector<48x128xbf16>
    tpu.vector_store %arg4[%c0_5, %c0_6], %9 {strides = array<i32>} : memref<48x128xbf16, #tpu.memory_space<vmem>>, vector<48x128xbf16>,
    return
  }
  func.func @transform_0(%arg0: i32) -> (i32, i32) {
    %c0_i32 = arith.constant 0 : i32
    %c0_i32_0 = arith.constant 0 : i32
    return %arg0, %c0_i32 : i32, i32
  }
  func.func @transform_1(%arg0: i32) -> (i32, i32) {
    %c0_i32 = arith.constant 0 : i32
    %c0_i32_0 = arith.constant 0 : i32
    %c0_i32_1 = arith.constant 0 : i32
    return %c0_i32, %c0_i32_0 : i32, i32
  }
  func.func @transform_2(%arg0: i32) -> (i32, i32) {
    %c0_i32 = arith.constant 0 : i32
    %c0_i32_0 = arith.constant 0 : i32
    %c0_i32_1 = arith.constant 0 : i32
    return %c0_i32, %c0_i32_0 : i32, i32
  }
  func.func @transform_3(%arg0: i32) -> (i32, i32) {
    %c0_i32 = arith.constant 0 : i32
    %c0_i32_0 = arith.constant 0 : i32
    return %arg0, %c0_i32 : i32, i32
  }
}

module attributes {stable_mosaic.version = 11 : i64} {
  func.func @_linear_kernel(%arg0: i32, %arg1: memref<2x32xf32, #tpu.memory_space<vmem>>, %arg2: memref<32x512xbf16, #tpu.memory_space<vmem>>, %arg3: memref<1x512xf32, #tpu.memory_space<vmem>>, %arg4: memref<2x512xf32, #tpu.memory_space<vmem>>) attributes {dimension_semantics = [#tpu.dimension_semantics<arbitrary>], iteration_bounds = array<i64: 1>, scalar_prefetch = 0 : i64, scratch_operands = 0 : i64, tpu.core_type = #tpu.core_type<tc>, window_params = [{pipeline_mode = #tpu.pipeline_mode<synchronous>, transform_indices = @transform_0, window_bounds = array<i64: 2, 32>}, {pipeline_mode = #tpu.pipeline_mode<synchronous>, transform_indices = @transform_1, window_bounds = array<i64: 32, 512>}, {pipeline_mode = #tpu.pipeline_mode<synchronous>, transform_indices = @transform_2, window_bounds = array<i64: 1, 512>}, {pipeline_mode = #tpu.pipeline_mode<synchronous>, transform_indices = @transform_3, window_bounds = array<i64: 2, 512>}]} {
    %c0 = arith.constant 0 : index
    %c0_0 = arith.constant 0 : index
    %0 = vector.load %arg1[%c0, %c0_0] : memref<2x32xf32, #tpu.memory_space<vmem>>, vector<2x32xf32>
    %1 = arith.truncf %0 : vector<2x32xf32> to vector<2x32xbf16>
    %c0_1 = arith.constant 0 : index
    %c0_2 = arith.constant 0 : index
    %2 = vector.load %arg2[%c0_1, %c0_2] : memref<32x512xbf16, #tpu.memory_space<vmem>>, vector<32x512xbf16>
    %cst = arith.constant dense<0.000000e+00> : vector<2x512xf32>
    %3 = tpu.matmul %1, %2, %cst {dimension_numbers = #tpu.dot_dimension_numbers<[1], [0], [0], [1], [0, 0, 1, 1], [], []>} : vector<2x32xbf16>, vector<32x512xbf16>, vector<2x512xf32> -> vector<2x512xf32>
    %c0_3 = arith.constant 0 : index
    %c0_4 = arith.constant 0 : index
    %4 = vector.load %arg3[%c0_3, %c0_4] : memref<1x512xf32, #tpu.memory_space<vmem>>, vector<1x512xf32>
    %5 = vector.broadcast %4 : vector<1x512xf32> to vector<2x512xf32>
    %6 = arith.addf %3, %5 : vector<2x512xf32>
    %cst_5 = arith.constant 0.000000e+00 : f32
    %7 = vector.broadcast %cst_5 : f32 to vector<2x512xf32>
    %8 = arith.maximumf %6, %7 : vector<2x512xf32>
    %c0_6 = arith.constant 0 : index
    %c0_7 = arith.constant 0 : index
    %9 = vector.load %arg4[%c0_6, %c0_7] : memref<2x512xf32, #tpu.memory_space<vmem>>, vector<2x512xf32>
    tpu.vector_store %arg4[%c0_6, %c0_7], %8 {strides = array<i32>} : memref<2x512xf32, #tpu.memory_space<vmem>>, vector<2x512xf32>,
    return
  }
  func.func @transform_0(%arg0: i32) -> (i32, i32) {
    %c0_i32 = arith.constant 0 : i32
    %c0_i32_0 = arith.constant 0 : i32
    %c0_i32_1 = arith.constant 0 : i32
    return %c0_i32, %c0_i32_0 : i32, i32
  }
  func.func @transform_1(%arg0: i32) -> (i32, i32) {
    %c0_i32 = arith.constant 0 : i32
    %c0_i32_0 = arith.constant 0 : i32
    %c0_i32_1 = arith.constant 0 : i32
    return %c0_i32, %c0_i32_0 : i32, i32
  }
  func.func @transform_2(%arg0: i32) -> (i32, i32) {
    %c0_i32 = arith.constant 0 : i32
    %c0_i32_0 = arith.constant 0 : i32
    %c0_i32_1 = arith.constant 0 : i32
    return %c0_i32, %c0_i32_0 : i32, i32
  }
  func.func @transform_3(%arg0: i32) -> (i32, i32) {
    %c0_i32 = arith.constant 0 : i32
    %c0_i32_0 = arith.constant 0 : i32
    %c0_i32_1 = arith.constant 0 : i32
    return %c0_i32, %c0_i32_0 : i32, i32
  }
}

module attributes {stable_mosaic.version = 11 : i64} {
  func.func @_lmu_kernel(%arg0: i32, %arg1: memref<3x2x32xf32, #tpu.memory_space<vmem>>, %arg2: memref<2x32xf32, #tpu.memory_space<vmem>>, %arg3: memref<2x16xf32, #tpu.memory_space<vmem>>, %arg4: memref<80x33xf32, #tpu.memory_space<vmem>>, %arg5: memref<16x16xf32, #tpu.memory_space<vmem>>, %arg6: memref<1x16xf32, #tpu.memory_space<vmem>>, %arg7: memref<16x32xf32, #tpu.memory_space<vmem>>, %arg8: memref<2x32xf32, #tpu.memory_space<vmem>>) attributes {dimension_semantics = [#tpu.dimension_semantics<arbitrary>], iteration_bounds = array<i64: 1>, scalar_prefetch = 0 : i64, scratch_operands = 0 : i64, tpu.core_type = #tpu.core_type<tc>, window_params = [{pipeline_mode = #tpu.pipeline_mode<synchronous>, transform_indices = @transform_0, window_bounds = array<i64: 3, 2, 32>}, {pipeline_mode = #tpu.pipeline_mode<synchronous>, transform_indices = @transform_1, window_bounds = array<i64: 2, 32>}, {pipeline_mode = #tpu.pipeline_mode<synchronous>, transform_indices = @transform_2, window_bounds = array<i64: 2, 16>}, {pipeline_mode = #tpu.pipeline_mode<synchronous>, transform_indices = @transform_3, window_bounds = array<i64: 80, 33>}, {pipeline_mode = #tpu.pipeline_mode<synchronous>, transform_indices = @transform_4, window_bounds = array<i64: 16, 16>}, {pipeline_mode = #tpu.pipeline_mode<synchronous>, transform_indices = @transform_5, window_bounds = array<i64: 1, 16>}, {pipeline_mode = #tpu.pipeline_mode<synchronous>, transform_indices = @transform_6, window_bounds = array<i64: 16, 32>}, {pipeline_mode = #tpu.pipeline_mode<synchronous>, transform_indices = @transform_7, window_bounds = array<i64: 2, 32>}]} {
    %c0 = arith.constant 0 : index
    %c0_0 = arith.constant 0 : index
    %0 = vector.load %arg4[%c0, %c0_0] : memref<80x33xf32, #tpu.memory_space<vmem>>, vector<80x33xf32>
    %c0_1 = arith.constant 0 : index
    %c0_2 = arith.constant 0 : index
    %1 = vector.load %arg5[%c0_1, %c0_2] : memref<16x16xf32, #tpu.memory_space<vmem>>, vector<16x16xf32>
    %c0_3 = arith.constant 0 : index
    %c0_4 = arith.constant 0 : index
    %2 = vector.load %arg6[%c0_3, %c0_4] : memref<1x16xf32, #tpu.memory_space<vmem>>, vector<1x16xf32>
    %c0_5 = arith.constant 0 : index
    %c0_6 = arith.constant 0 : index
    %3 = vector.load %arg7[%c0_5, %c0_6] : memref<16x32xf32, #tpu.memory_space<vmem>>, vector<16x32xf32>
    %c0_7 = arith.constant 0 : index
    %c0_8 = arith.constant 0 : index
    %4 = vector.load %arg2[%c0_7, %c0_8] : memref<2x32xf32, #tpu.memory_space<vmem>>, vector<2x32xf32>
    %c0_9 = arith.constant 0 : index
    %c0_10 = arith.constant 0 : index
    %5 = vector.load %arg3[%c0_9, %c0_10] : memref<2x16xf32, #tpu.memory_space<vmem>>, vector<2x16xf32>
    %cst = arith.constant 0.000000e+00 : f32
    %6 = vector.broadcast %cst : f32 to vector<2x32xf32>
    %c0_i32 = arith.constant 0 : i32
    %c3_i32 = arith.constant 3 : i32
    %7 = arith.addi %c0_i32, %c3_i32 : i32
    %c1_i32 = arith.constant 1 : i32
    %8:3 = scf.for %arg9 = %c0_i32 to %7 step %c1_i32 iter_args(%arg10 = %4, %arg11 = %5, %arg12 = %6) -> (vector<2x32xf32>, vector<2x16xf32>, vector<2x32xf32>)  : i32 {
      %10 = arith.index_cast %arg9 : i32 to index
      %c0_14 = arith.constant 0 : index
      %c0_15 = arith.constant 0 : index
      %11 = vector.load %arg1[%10, %c0_14, %c0_15] : memref<3x2x32xf32, #tpu.memory_space<vmem>>, vector<1x2x32xf32>
      %12 = vector.shape_cast %11 : vector<1x2x32xf32> to vector<2x32xf32>
      %13 = tpu.concatenate %12, %arg10, %arg11 in 1 : vector<2x32xf32>, vector<2x32xf32>, vector<2x16xf32> -> vector<2x80xf32>
      %cst_16 = arith.constant dense<0.000000e+00> : vector<2x33xf32>
      %14 = tpu.matmul %13, %0, %cst_16 {dimension_numbers = #tpu.dot_dimension_numbers<[1], [0], [0], [1], [0, 0, 1, 1], [], []>} : vector<2x80xf32>, vector<80x33xf32>, vector<2x33xf32> -> vector<2x33xf32>
      %15 = vector.extract_strided_slice %14 {offsets = [0, 32], sizes = [2, 1], strides = [1, 1]} : vector<2x33xf32> to vector<2x1xf32>
      %cst_17 = arith.constant dense<0.000000e+00> : vector<2x16xf32>
      %16 = tpu.matmul %arg11, %1, %cst_17 {dimension_numbers = #tpu.dot_dimension_numbers<[1], [0], [0], [1], [0, 0, 1, 1], [], []>} : vector<2x16xf32>, vector<16x16xf32>, vector<2x16xf32> -> vector<2x16xf32>
      %17 = arith.addf %arg11, %16 : vector<2x16xf32>
      %18 = vector.broadcast %15 : vector<2x1xf32> to vector<2x16xf32>
      %19 = vector.broadcast %2 : vector<1x16xf32> to vector<2x16xf32>
      %20 = arith.mulf %18, %19 : vector<2x16xf32>
      %21 = arith.addf %17, %20 : vector<2x16xf32>
      %22 = vector.extract_strided_slice %14 {offsets = [0, 0], sizes = [2, 32], strides = [1, 1]} : vector<2x33xf32> to vector<2x32xf32>
      %cst_18 = arith.constant dense<0.000000e+00> : vector<2x32xf32>
      %23 = tpu.matmul %21, %3, %cst_18 {dimension_numbers = #tpu.dot_dimension_numbers<[1], [0], [0], [1], [0, 0, 1, 1], [], []>} : vector<2x16xf32>, vector<16x32xf32>, vector<2x32xf32> -> vector<2x32xf32>
      %24 = arith.addf %22, %23 : vector<2x32xf32>
      %25 = math.tanh %24 : vector<2x32xf32>
      %26 = arith.addf %arg12, %25 : vector<2x32xf32>
      scf.yield %25, %21, %26 : vector<2x32xf32>, vector<2x16xf32>, vector<2x32xf32>
    }
    %c3_i32_11 = arith.constant 3 : i32
    %c0_12 = arith.constant 0 : index
    %c0_13 = arith.constant 0 : index
    %9 = vector.load %arg8[%c0_12, %c0_13] : memref<2x32xf32, #tpu.memory_space<vmem>>, vector<2x32xf32>
    tpu.vector_store %arg8[%c0_12, %c0_13], %8#2 {strides = array<i32>} : memref<2x32xf32, #tpu.memory_space<vmem>>, vector<2x32xf32>,
    return
  }
  func.func @transform_0(%arg0: i32) -> (i32, i32, i32) {
    %c0_i32 = arith.constant 0 : i32
    %c0_i32_0 = arith.constant 0 : i32
    %c0_i32_1 = arith.constant 0 : i32
    %c0_i32_2 = arith.constant 0 : i32
    return %c0_i32, %c0_i32_0, %c0_i32_1 : i32, i32, i32
  }
  func.func @transform_1(%arg0: i32) -> (i32, i32) {
    %c0_i32 = arith.constant 0 : i32
    %c0_i32_0 = arith.constant 0 : i32
    %c0_i32_1 = arith.constant 0 : i32
    return %c0_i32, %c0_i32_0 : i32, i32
  }
  func.func @transform_2(%arg0: i32) -> (i32, i32) {
    %c0_i32 = arith.constant 0 : i32
    %c0_i32_0 = arith.constant 0 : i32
    %c0_i32_1 = arith.constant 0 : i32
    return %c0_i32, %c0_i32_0 : i32, i32
  }
  func.func @transform_3(%arg0: i32) -> (i32, i32) {
    %c0_i32 = arith.constant 0 : i32
    %c0_i32_0 = arith.constant 0 : i32
    %c0_i32_1 = arith.constant 0 : i32
    return %c0_i32, %c0_i32_0 : i32, i32
  }
  func.func @transform_4(%arg0: i32) -> (i32, i32) {
    %c0_i32 = arith.constant 0 : i32
    %c0_i32_0 = arith.constant 0 : i32
    %c0_i32_1 = arith.constant 0 : i32
    return %c0_i32, %c0_i32_0 : i32, i32
  }
  func.func @transform_5(%arg0: i32) -> (i32, i32) {
    %c0_i32 = arith.constant 0 : i32
    %c0_i32_0 = arith.constant 0 : i32
    %c0_i32_1 = arith.constant 0 : i32
    return %c0_i32, %c0_i32_0 : i32, i32
  }
  func.func @transform_6(%arg0: i32) -> (i32, i32) {
    %c0_i32 = arith.constant 0 : i32
    %c0_i32_0 = arith.constant 0 : i32
    %c0_i32_1 = arith.constant 0 : i32
    return %c0_i32, %c0_i32_0 : i32, i32
  }
  func.func @transform_7(%arg0: i32) -> (i32, i32) {
    %c0_i32 = arith.constant 0 : i32
    %c0_i32_0 = arith.constant 0 : i32
    %c0_i32_1 = arith.constant 0 : i32
    return %c0_i32, %c0_i32_0 : i32, i32
  }
}

module attributes {stable_mosaic.version = 11 : i64} {
  func.func @_linear_kernel(%arg0: i32, %arg1: memref<2x512xf32, #tpu.memory_space<vmem>>, %arg2: memref<512x10xbf16, #tpu.memory_space<vmem>>, %arg3: memref<1x10xf32, #tpu.memory_space<vmem>>, %arg4: memref<2x10xf32, #tpu.memory_space<vmem>>) attributes {dimension_semantics = [#tpu.dimension_semantics<arbitrary>], iteration_bounds = array<i64: 1>, scalar_prefetch = 0 : i64, scratch_operands = 0 : i64, tpu.core_type = #tpu.core_type<tc>, window_params = [{pipeline_mode = #tpu.pipeline_mode<synchronous>, transform_indices = @transform_0, window_bounds = array<i64: 2, 512>}, {pipeline_mode = #tpu.pipeline_mode<synchronous>, transform_indices = @transform_1, window_bounds = array<i64: 512, 10>}, {pipeline_mode = #tpu.pipeline_mode<synchronous>, transform_indices = @transform_2, window_bounds = array<i64: 1, 10>}, {pipeline_mode = #tpu.pipeline_mode<synchronous>, transform_indices = @transform_3, window_bounds = array<i64: 2, 10>}]} {
    %c0 = arith.constant 0 : index
    %c0_0 = arith.constant 0 : index
    %0 = vector.load %arg1[%c0, %c0_0] : memref<2x512xf32, #tpu.memory_space<vmem>>, vector<2x512xf32>
    %1 = arith.truncf %0 : vector<2x512xf32> to vector<2x512xbf16>
    %c0_1 = arith.constant 0 : index
    %c0_2 = arith.constant 0 : index
    %2 = vector.load %arg2[%c0_1, %c0_2] : memref<512x10xbf16, #tpu.memory_space<vmem>>, vector<512x10xbf16>
    %cst = arith.constant dense<0.000000e+00> : vector<2x10xf32>
    %3 = tpu.matmul %1, %2, %cst {dimension_numbers = #tpu.dot_dimension_numbers<[1], [0], [0], [1], [0, 0, 1, 1], [], []>} : vector<2x512xbf16>, vector<512x10xbf16>, vector<2x10xf32> -> vector<2x10xf32>
    %c0_3 = arith.constant 0 : index
    %c0_4 = arith.constant 0 : index
    %4 = vector.load %arg3[%c0_3, %c0_4] : memref<1x10xf32, #tpu.memory_space<vmem>>, vector<1x10xf32>
    %5 = vector.broadcast %4 : vector<1x10xf32> to vector<2x10xf32>
    %6 = arith.addf %3, %5 : vector<2x10xf32>
    %c0_5 = arith.constant 0 : index
    %c0_6 = arith.constant 0 : index
    %7 = vector.load %arg4[%c0_5, %c0_6] : memref<2x10xf32, #tpu.memory_space<vmem>>, vector<2x10xf32>
    tpu.vector_store %arg4[%c0_5, %c0_6], %6 {strides = array<i32>} : memref<2x10xf32, #tpu.memory_space<vmem>>, vector<2x10xf32>,
    return
  }
  func.func @transform_0(%arg0: i32) -> (i32, i32) {
    %c0_i32 = arith.constant 0 : i32
    %c0_i32_0 = arith.constant 0 : i32
    %c0_i32_1 = arith.constant 0 : i32
    return %c0_i32, %c0_i32_0 : i32, i32
  }
  func.func @transform_1(%arg0: i32) -> (i32, i32) {
    %c0_i32 = arith.constant 0 : i32
    %c0_i32_0 = arith.constant 0 : i32
    %c0_i32_1 = arith.constant 0 : i32
    return %c0_i32, %c0_i32_0 : i32, i32
  }
  func.func @transform_2(%arg0: i32) -> (i32, i32) {
    %c0_i32 = arith.constant 0 : i32
    %c0_i32_0 = arith.constant 0 : i32
    %c0_i32_1 = arith.constant 0 : i32
    return %c0_i32, %c0_i32_0 : i32, i32
  }
  func.func @transform_3(%arg0: i32) -> (i32, i32) {
    %c0_i32 = arith.constant 0 : i32
    %c0_i32_0 = arith.constant 0 : i32
    %c0_i32_1 = arith.constant 0 : i32
    return %c0_i32, %c0_i32_0 : i32, i32
  }
}

</mosaic_0001>

<bundles_post_ra>
// kernel: tile.23
= control target key start
LH: loop header
LB: loop body
LE: loop exit
PB: predicated region body
PF: predicated region fallthrough
CT: control target
= control target key end

     0   :  { %s28_s0 = inlined_call_operand.vmem [shape: f32[8], index: 0, kind: input, shape index: {}]   ;;  %s29_s1 = inlined_call_operand.vmem [shape: f32[16,8], index: 1, kind: output, shape index: {}]  }
   0x1   :  { %v4_v0 = vld [vmem:[%s28_s0] ss:$0 sm:$0xff] }
   0x2   :  { %5 = vst [vmem:[%s29_s1] sm:$0xff] %v4_v0  ;;  %8 = vst [vmem:[%s29_s1 + $0x8] sm:$0xff] %v4_v0 }

// kernel: tile.24
= control target key start
LH: loop header
LB: loop body
LE: loop exit
PB: predicated region body
PF: predicated region fallthrough
CT: control target
= control target key end

     0   :  { %s131_s10 = smov 120   ;;  %s132_s11 = smov 104   ;;  %vm3_vm0 = vcmask 64512   ;;  %vm9_vm1 = vcmask 1048512   ;;  %vm15_vm2 = vcmask 982912   ;;  %vm21_vm3 = vcmask 917312   ;;  %s207_s0 = inlined_call_operand.vmem [shape: f32[16,8], index: 0, kind: input, shape index: {}]   ;;  %s208_s1 = inlined_call_operand.vmem [shape: f32[1,128], index: 1, kind: output, shape index: {}]  }
   0x1   :  { %v101_v0 = vld [vmem:[%s207_s0 + $0xf] sm:$0x1]   ;;  %v103_v1 = vld [vmem:[%s207_s0 + $0xd] sm:$0x1]   ;;  %v102_v2 = vld [vmem:[%s207_s0 + $0xe] sm:$0x1]  }
   0x2   :  { %7 = vrot.lane.b32.xlu0 %v101_v0, %s131_s10  ;;  %19 = vrot.lane.b32.xlu1 %v103_v1, %s132_s11  ;;  %v104_v3 = vld [vmem:[%s207_s0 + $0xc] sm:$0x1]   ;;  %s133_s16 = smov 112   ;;  %s134_s17 = smov 96   ;;  %v105_v4 = vld [vmem:[%s207_s0 + $0xb] sm:$0x1]  }
   0x3   :  { %v106_v5 = vld [vmem:[%s207_s0 + $0xa] sm:$0x1]   ;;  %v2_v6 = vld [vmem:[%s207_s0] sm:$0x1]   ;;  %s135_s24 = smov 88   ;;  %s136_s25 = smov 80  }
   0x4   :  { %4 = vst.msk [vmem:[#allocation0] sm:$0x1] %vm3_vm0, %v2_v6   ;;  %v107_v7 = vld [vmem:[%s207_s0 + $0x9] sm:$0x1]   ;;  %v108_v8 = vld [vmem:[%s207_s0 + $0x8] sm:$0x1]  }
   0x5   :  { %s137_s30 = smov 72   ;;  %s138_s2 = smov 64   ;;  %v109_v9 = vld [vmem:[%s207_s0 + $0x7] sm:$0x1]   ;;  %v110_v10 = vld [vmem:[%s207_s0 + $0x6] sm:$0x1]  }
   0x6   :  { %13 = vrot.lane.b32.xlu0 %v102_v2, %s133_s16  ;;  %25 = vrot.lane.b32.xlu1 %v104_v3, %s134_s17  ;;  %s139_s7 = smov 56   ;;  %s140_s8 = smov 48   ;;  %v111_v11 = vld [vmem:[%s207_s0 + $0x5] sm:$0x1]   ;;  %v112_v12 = vld [vmem:[%s207_s0 + $0x4] sm:$0x1]  }
   0x7   :  { %s141_s13 = smov 40   ;;  %s142_s14 = smov 32   ;;  %v113_v13 = vld [vmem:[%s207_s0 + $0x3] sm:$0x1]   ;;  %v114_v14 = vld [vmem:[%s207_s0 + $0x2] sm:$0x1]  }
   0x8   :  { %s143_s19 = smov 24   ;;  %s144_s20 = smov 16   ;;  %v115_v15 = vld [vmem:[%s207_s0 + $0x1] sm:$0x1]   ;;  %vm27_vm4 = vcmask 851712   ;;  %vm33_vm5 = vcmask 786112  }
   0x9   :  { %s145_s0 = smov 8   ;;  %vm39_vm6 = vcmask 720512   ;;  %vm45_vm7 = vcmask 654912   ;;  %vm51_vm8 = vcmask 589312   ;;  %vm57_vm9 = vcmask 523712  }
   0xa   :  { %31 = vrot.lane.b32.xlu0 %v105_v4, %s135_s24  ;;  %37 = vrot.lane.b32.xlu1 %v106_v5, %s136_s25  ;;  %vm63_vm10 = vcmask 458112   ;;  %vm69_vm11 = vcmask 392512   ;;  %vm75_vm12 = vcmask 326912   ;;  %vm81_vm13 = vcmask 261312  }
   0xb   :  { %vm87_vm14 = vcmask 195712   ;;  %vm93_vm15 = vcmask 130112  }
   0xe   :  { %43 = vrot.lane.b32.xlu0 %v107_v7, %s137_s30  ;;  %49 = vrot.lane.b32.xlu1 %v108_v8, %s138_s2 }
  0x12   :  { %55 = vrot.lane.b32.xlu0 %v109_v9, %s139_s7  ;;  %61 = vrot.lane.b32.xlu1 %v110_v10, %s140_s8 }
  0x16   :  { %67 = vrot.lane.b32.xlu0 %v111_v11, %s141_s13  ;;  %73 = vrot.lane.b32.xlu1 %v112_v12, %s142_s14 }
  0x1a   :  { %79 = vrot.lane.b32.xlu0 %v113_v13, %s143_s19  ;;  %85 = vrot.lane.b32.xlu1 %v114_v14, %s144_s20 }
  0x1e   :  { %91 = vrot.lane.b32.xlu0 %v115_v15, %s145_s0 }
  0x74   :  { %v8_v16 = vpop.permute.xlu0 %7   ;;  %v20_v17 = vpop.permute.xlu1 %19  }
  0x75   :  { %10 = vst.msk [vmem:[#allocation0] sm:$0x1] %vm9_vm1, %v8_v16  }
  0x78   :  { %v14_v18 = vpop.permute.xlu0 %13   ;;  %v26_v19 = vpop.permute.xlu1 %25  }
  0x79   :  { %16 = vst.msk [vmem:[#allocation0] sm:$0x1] %vm15_vm2, %v14_v18  }
  0x7a   :  { %22 = vst.msk [vmem:[#allocation0] sm:$0x1] %vm21_vm3, %v20_v17  }
  0x7b   :  { %28 = vst.msk [vmem:[#allocation0] sm:$0x1] %vm27_vm4, %v26_v19  }
  0x7c   :  { %v32_v20 = vpop.permute.xlu0 %31   ;;  %v38_v21 = vpop.permute.xlu1 %37  }
  0x7d   :  { %34 = vst.msk [vmem:[#allocation0] sm:$0x1] %vm33_vm5, %v32_v20  }
  0x7e   :  { %40 = vst.msk [vmem:[#allocation0] sm:$0x1] %vm39_vm6, %v38_v21  }
  0x80   :  { %v44_v22 = vpop.permute.xlu0 %43   ;;  %v50_v23 = vpop.permute.xlu1 %49  }
  0x81   :  { %46 = vst.msk [vmem:[#allocation0] sm:$0x1] %vm45_vm7, %v44_v22  }
  0x82   :  { %52 = vst.msk [vmem:[#allocation0] sm:$0x1] %vm51_vm8, %v50_v23  }
  0x84   :  { %v56_v24 = vpop.permute.xlu0 %55   ;;  %v62_v25 = vpop.permute.xlu1 %61  }
  0x85   :  { %58 = vst.msk [vmem:[#allocation0] sm:$0x1] %vm57_vm9, %v56_v24  }
  0x86   :  { %64 = vst.msk [vmem:[#allocation0] sm:$0x1] %vm63_vm10, %v62_v25  }
  0x88   :  { %v68_v26 = vpop.permute.xlu0 %67   ;;  %v74_v27 = vpop.permute.xlu1 %73  }
  0x89   :  { %70 = vst.msk [vmem:[#allocation0] sm:$0x1] %vm69_vm11, %v68_v26  }
  0x8a   :  { %76 = vst.msk [vmem:[#allocation0] sm:$0x1] %vm75_vm12, %v74_v27  }
  0x8c   :  { %v80_v28 = vpop.permute.xlu0 %79   ;;  %v86_v29 = vpop.permute.xlu1 %85  }
  0x8d   :  { %82 = vst.msk [vmem:[#allocation0] sm:$0x1] %vm81_vm13, %v80_v28  }
  0x8e   :  { %88 = vst.msk [vmem:[#allocation0] sm:$0x1] %vm87_vm14, %v86_v29  }
  0x90   :  { %v92_v30 = vpop.permute.xlu0 %91  }
  0x91   :  { %94 = vst.msk [vmem:[#allocation0] sm:$0x1] %vm93_vm15, %v92_v30  }
  0x98   :  { %v98_v31 = vld [vmem:[#allocation0] sm:$0x1] }
  0x99   :  { %100 = vst [vmem:[%s208_s1] sm:$0x1] %v98_v31 }

// kernel: cnn_rnn_forward.8
= control target key start
LH: loop header
LB: loop body
LE: loop exit
PB: predicated region body
PF: predicated region fallthrough
CT: control target
= control target key end

     0   :  { %s281_s0 = inlined_call_operand.vmem [shape: f32[96,128], index: 0, kind: input, shape index: {}]   ;;  %s282_s1 = inlined_call_operand.vmem [shape: f32[1,128], index: 1, kind: input, shape index: {}]   ;;  %s283_s2 = inlined_call_operand.vmem [shape: f32[1,128], index: 2, kind: input, shape index: {}]   ;;  %s284_s3 = inlined_call_operand.vmem [shape: bf16[96,128], index: 3, kind: output, shape index: {}]  }
   0x1   :  { %v14_v0 = vld [vmem:[%s281_s0] sm:$0xff]  ;;  %v15_v1 = vld [vmem:[%s281_s0 + $0x8] sm:$0xff]  ;;  %v16_v6 = vld [vmem:[%s281_s0 + $0x10] sm:$0xff] }
   0x2   :  { %v140_v2 = vld [vmem:[%s282_s1] ss:$0 sm:$0xff]  ;;  %v17_v7 = vld [vmem:[%s281_s0 + $0x18] sm:$0xff]  ;;  %v19_v11 = vld [vmem:[%s281_s0 + $0x28] sm:$0xff] }
   0x3   :  { %v33_v3 = vmul.f32 %v140_v2, %v14_v0  ;;  %v34_v4 = vmul.f32 %v140_v2, %v15_v1  ;;  %v141_v5 = vld [vmem:[%s283_s2] ss:$0 sm:$0xff]  ;;  %v35_v8 = vmul.f32 %v140_v2, %v16_v6  ;;  %v36_v9 = vmul.f32 %v140_v2, %v17_v7  ;;  %v20_v12 = vld [vmem:[%s281_s0 + $0x30] sm:$0xff]  ;;  %v21_v17 = vld [vmem:[%s281_s0 + $0x38] sm:$0xff] }
   0x4   :  { %v18_v10 = vld [vmem:[%s281_s0 + $0x20] sm:$0xff]  ;;  %v38_v16 = vmul.f32 %v140_v2, %v19_v11  ;;  %v39_v20 = vmul.f32 %v140_v2, %v20_v12  ;;  %v40_v21 = vmul.f32 %v140_v2, %v21_v17  ;;  %v23_v27 = vld [vmem:[%s281_s0 + $0x48] sm:$0xff]  ;;  %v24_v32 = vld [vmem:[%s281_s0 + $0x50] sm:$0xff] }
   0x5   :  { %v52_v13 = vadd.f32 %v141_v5, %v33_v3  ;;  %v53_v14 = vadd.f32 %v141_v5, %v34_v4  ;;  %v37_v15 = vmul.f32 %v140_v2, %v18_v10  ;;  %v54_v18 = vadd.f32 %v141_v5, %v35_v8  ;;  %v22_v22 = vld [vmem:[%s281_s0 + $0x40] sm:$0xff]  ;;  %v25_v33 = vld [vmem:[%s281_s0 + $0x58] sm:$0xff] }
   0x6   :  { %v55_v19 = vadd.f32 %v141_v5, %v36_v9  ;;  %v57_v26 = vadd.f32 %v141_v5, %v38_v16  ;;  %v58_v30 = vadd.f32 %v141_v5, %v39_v20  ;;  %v59_v31 = vadd.f32 %v141_v5, %v40_v21 }
   0x7   :  { %v64_v23 = vmax.f32 %v52_v13, 0.0  ;;  %v65_v24 = vmax.f32 %v53_v14, 0.0  ;;  %v56_v25 = vadd.f32 %v141_v5, %v37_v15  ;;  %v66_v28 = vmax.f32 %v54_v18, 0.0 }
   0x8   :  { %v67_v29 = vmax.f32 %v55_v19, 0.0  ;;  %v69_v36 = vmax.f32 %v57_v26, 0.0  ;;  %v41_v37 = vmul.f32 %v140_v2, %v22_v22  ;;  %v70_v39 = vmax.f32 %v58_v30, 0.0 }
   0x9   :  { %v169_v34 = vpack.c.bf16 %v65_v24, %v64_v23  ;;  %v68_v35 = vmax.f32 %v56_v25, 0.0  ;;  %v71_v40 = vmax.f32 %v59_v31, 0.0  ;;  %v42_v41 = vmul.f32 %v140_v2, %v23_v27 }
   0xa   :  { %v174_v38 = vpack.c.bf16 %v67_v29, %v66_v28  ;;  %v60_v43 = vadd.f32 %v141_v5, %v41_v37  ;;  %v43_v44 = vmul.f32 %v140_v2, %v24_v32  ;;  %v44_v45 = vmul.f32 %v140_v2, %v25_v33 }
   0xb   :  { %170 = vst [vmem:[%s284_s3] sm:$0xff] %v169_v34   ;;  %v179_v42 = vpack.c.bf16 %v69_v36, %v68_v35  ;;  %v184_v46 = vpack.c.bf16 %v71_v40, %v70_v39  ;;  %v61_v47 = vadd.f32 %v141_v5, %v42_v41 }
   0xc   :  { %196 = vst [vmem:[%s284_s3 + $0x8] sm:$0xff] %v174_v38   ;;  %v72_v48 = vmax.f32 %v60_v43, 0.0  ;;  %v62_v49 = vadd.f32 %v141_v5, %v43_v44  ;;  %v63_v50 = vadd.f32 %v141_v5, %v44_v45 }
   0xd   :  { %197 = vst [vmem:[%s284_s3 + $0x10] sm:$0xff] %v179_v42   ;;  %198 = vst [vmem:[%s284_s3 + $0x18] sm:$0xff] %v184_v46   ;;  %v73_v51 = vmax.f32 %v61_v47, 0.0 }
   0xe   :  { %v74_v52 = vmax.f32 %v62_v49, 0.0  ;;  %v75_v53 = vmax.f32 %v63_v50, 0.0 }
   0xf   :  { %v189_v54 = vpack.c.bf16 %v73_v51, %v72_v48 }
  0x10   :  { %v194_v55 = vpack.c.bf16 %v75_v53, %v74_v52 }
  0x11   :  { %199 = vst [vmem:[%s284_s3 + $0x20] sm:$0xff] %v189_v54  }
  0x12   :  { %200 = vst [vmem:[%s284_s3 + $0x28] sm:$0xff] %v194_v55  }

// kernel: cnn_rnn_forward.7
= control target key start
LH: loop header
LB: loop body
LE: loop exit
PB: predicated region body
PF: predicated region fallthrough
CT: control target
= control target key end

     0   :  { %s2376_s18 = smov 0   ;;  %s3443_s0 = inlined_call_operand.vmem [shape: bf16[6,18,18,1], index: 0, kind: input, shape index: {}]   ;;  %s3444_s1 = inlined_call_operand.vmem [shape: bf16[9,8], index: 1, kind: input, shape index: {}]   ;;  %s3445_s2 = inlined_call_operand.vmem [shape: f32[1,8], index: 2, kind: input, shape index: {}]   ;;  %s3446_s3 = inlined_call_operand.vmem [shape: f32[6,256,8], index: 3, kind: output, shape index: {0}]   ;;  %s3447_s4 = inlined_call_operand.vmem [shape: f32[6,1,8], index: 4, kind: output, shape index: {1}]   ;;  %s3448_s5 = inlined_call_operand.vmem [shape: f32[6,1,8], index: 5, kind: output, shape index: {2}]  }
   0x1 LB: > { %s2138_s19 = sadd.s32 4294967295, %s2335_s18   ;;  %p2142_p0 = scmp.ge.s32.totalorder %s2335_s18, 1  ;;  %s2335_s18 = sphi %s2376_s18, %s16_s18  }
   0x2   : > { %p192_p1 = scmp.lt.s32.totalorder %s2335_s18, 7 }
   0x4   : > { %p193_p2 = pnand %p2142_p0, %p192_p1 }
   0x5   : > { %p226_p3 = scmp.lt.s32.totalorder (!%p193_p2), %s2138_s19, 5  ;;  %vm732_vm0 = vcmask (!%p193_p2), 1042432   ;;  %vm733_vm1 = vcmask (!%p193_p2), 1046532   ;;  %vm297_vm2 = vsmask.f32 (!%p193_p2), 3328  ;;  %s2337_s24 = smov (!%p193_p2), 3  }
   0x6   : > { %196 = sbr.rel (%p193_p2) target bundleno = 635 (0x27b), region = 32  ;;  %vm298_vm3 = vsmask.f32 (!%p193_p2), 7440  ;;  %vm2412_vm4 = vmor (!%p193_p2), %vm732_vm0, %vm733_vm1  ;;  %s2338_s25 = smov (!%p193_p2), 5   ;;  %vm1660_vm6 = vcmask (!%p193_p2), 1043456   ;;  %vm1661_vm7 = vcmask (!%p193_p2), 1044480  }
   0x7   : > { %vm2447_vm5 = vmor (!%p193_p2), %vm297_vm2, %vm298_vm3  ;;  %s2339_s26 = smov (!%p193_p2), 2   ;;  %s2340_s27 = smov (!%p193_p2), 1   ;;  %vm1333_vm8 = vcmask (!%p193_p2), 7168   ;;  %vm1382_vm9 = vcmask (!%p193_p2), 15360   ;;  %vm1415_vm10 = vcmask (!%p193_p2), 23552   ;;  %vm1448_vm11 = vcmask (!%p193_p2), 31744  }
   0x8   : > { %s2341_s28 = smov (!%p193_p2), 4   ;;  %s2342_s29 = smov (!%p193_p2), 6   ;;  %vm1481_vm12 = vcmask (!%p193_p2), 39936   ;;  %vm1514_vm13 = vcmask (!%p193_p2), 48128   ;;  %vm1547_vm14 = vcmask (!%p193_p2), 56320   ;;  %vm1580_vm15 = vcmask (!%p193_p2), 64512  }
   0x9   : > { %s2343_s30 = smov (!%p193_p2), 7   ;;  %s2344_s6 = smov (!%p193_p2), 8   ;;  %vm1627_vm0 = vcmask (!%p193_p2), 72704   ;;  %vm1929_vm1 = vcmask (!%p193_p2), 57344  }
   0xd   : > { %s3454_s19 = smov (!%p226_p3, %s2138_s19), 5 }
   0xe   : > { %s2292_s20 = smul.u32 216, %s3454_s19  ;;  %s2238_s9 = sshll.u32 %s3454_s19, 8 }
   0xf   : > { %s3254_s14 = scalar_lea.vmem %s3446_s3, %s2238_s9  ;;  %s238_s17 = scalar_lea.vmem %s3447_s4, %s3454_s19 }
  0x10   : > { %s2390_s23 = scalar_lea.vmem %s3443_s0, %s2292_s20  ;;  %s241_s22 = scalar_lea.vmem %s3448_s5, %s3454_s19 }
  0x11   : > { %v2393_v0 = vld [vmem:[%s2390_s23 + $0x18] sm:$0xf]  ;;  %v2396_v1 = vld [vmem:[%s2390_s23 + $0x1c] sm:$0xf]  ;;  %v246_v2 = vld [vmem:[%s2390_s23 + $0xc] sm:$0xf] }
  0x12   : > { %v362_v3 = vshrl.u32 %v2396_v1, 16  ;;  %v2402_v4 = vcombine.low %v2393_v0, %v2396_v1  ;;  %v349_v5 = vshrl.u32 %v2393_v0, 16  ;;  %v352_v6 = vshll.u32 %v2393_v0, 16  ;;  %v247_v7 = vld [vmem:[%s2390_s23 + $0x10] sm:$0xf] }
  0x13   : > { %v334_v8 = vshll.u32 %v247_v7, 16  ;;  %v338_v9 = vshrl.u32 %v247_v7, 16  ;;  %v2407_v10 = vcombine.low %v246_v2, %v247_v7  ;;  %v325_v11 = vshrl.u32 %v246_v2, 16  ;;  %v248_v12 = vld [vmem:[%s2390_s23 + $0x14] sm:$0x1] }
  0x14   : > { %1128 = vrot.lane.b32.xlu1 %v2402_v4, %s2337_s24  ;;  %v328_v14 = vshll.u32 %v246_v2, 16  ;;  %v2147_v15 = vrot.slane %v246_v2, 9  ;;  %v744_v16 = vrot.slane %v247_v7, 5  ;;  %v747_v17 = vrot.slane %v248_v12, 5  ;;  %v2419_v18 = vld [vmem:[%s2390_s23] sm:$0xf] }
  0x15   : > { %v340_v19 = vrot.slane %v338_v9, 4  ;;  %1126 = vrot.lane.b32.xlu0 %v2407_v10, %s2337_s24  ;;  %v327_v20 = vrot.slane %v325_v11, 4  ;;  %v2424_v21 = vld [vmem:[%s2390_s23 + $0x4] sm:$0xf]  ;;  %v245_v22 = vld [vmem:[%s2390_s23 + $0x8] sm:$0x1] }
  0x16   : > { %v330_v23 = vrot.slane %v328_v14, 5  ;;  %v745_v24 = vsel %vm2412_vm4, %v2147_v15, %v744_v16  ;;  %v746_v25 = vrot.slane %v744_v16, 4  ;;  %v2146_v26 = vrot.slane %v2419_v18, 9  ;;  %v251_v35 = vld [vmem:[%s2390_s23 + $0x20] sm:$0x1] }
  0x17   : > { %v737_v27 = vrot.slane %v2424_v21, 5  ;;  %v740_v28 = vrot.slane %v245_v22, 5  ;;  %v301_v29 = vshrl.u32 %v2419_v18, 16  ;;  %v304_v30 = vshll.u32 %v2419_v18, 16  ;;  %v2461_v7 = vld [vmem:[%s2390_s23 + $0x24] sm:$0xf] }
  0x18   : > { %v748_v31 = vsel %vm2412_vm4, %v746_v25, %v747_v17  ;;  %v310_v32 = vshll.u32 %v2424_v21, 16  ;;  %v314_v33 = vshrl.u32 %v2424_v21, 16  ;;  %v320_v34 = vshll.u32 %v245_v22, 16 }
  0x19   : > { %v2197_v36 = vcombine.low %v745_v24, %v748_v31  ;;  %v738_v37 = vsel %vm2412_vm4, %v2146_v26, %v737_v27  ;;  %v739_v38 = vrot.slane %v737_v27, 4  ;;  %v303_v39 = vrot.slane %v301_v29, 4  ;;  %v254_v26 = vld [vmem:[%s2390_s23 + $0x2c] sm:$0x1] }
  0x1a   : > { %v306_v40 = vrot.slane %v304_v30, 5  ;;  %v312_v41 = vrot.slane %v310_v32, 5  ;;  %v316_v42 = vrot.slane %v314_v33, 4  ;;  %v322_v43 = vrot.slane %v320_v34, 5 }
  0x1b   : > { %1196 = vrot.lane.b32.xlu0 %v2197_v36, %s2338_s25  ;;  %v741_v44 = vsel %vm2412_vm4, %v739_v38, %v740_v28  ;;  %v2148_v45 = vrot.slane %v2393_v0, 9  ;;  %v751_v46 = vrot.slane %v2396_v1, 5  ;;  %v754_v47 = vrot.slane %v251_v35, 5 }
  0x1c   : > { %v2196_v48 = vcombine.low %v738_v37, %v741_v44  ;;  %v307_v49 = vor.u32 %v306_v40, %v303_v39  ;;  %v317_v50 = vor.u32 %v316_v42, %v312_v41  ;;  %v331_v51 = vor.u32 %v330_v23, %v327_v20 }
  0x1d   : > { %v752_v53 = vsel %vm2412_vm4, %v2148_v45, %v751_v46  ;;  %v753_v54 = vrot.slane %v751_v46, 4  ;;  %v336_v55 = vrot.slane %v334_v8, 5  ;;  %v344_v56 = vshll.u32 %v248_v12, 16  ;;  %v253_v12 = vld [vmem:[%s2390_s23 + $0x28] sm:$0xf] }
  0x1e   : > { %1091 = vrot.lane.b32.xlu1 %v2196_v48, %s2339_s26  ;;  %v308_v57 = vrot.slane %v307_v49, 4  ;;  %v318_v58 = vrot.slane %v317_v50, 4  ;;  %v332_v59 = vrot.slane %v331_v51, 4  ;;  %v351_v60 = vrot.slane %v349_v5, 4  ;;  %v256_v48 = vld [vmem:[%s2390_s23 + $0x34] sm:$0xf] }
  0x1f   : > { %v755_v61 = vsel %vm2412_vm4, %v753_v54, %v754_v47  ;;  %v341_v62 = vor.u32 %v340_v19, %v336_v55  ;;  %v346_v63 = vrot.slane %v344_v56, 5  ;;  %v354_v2 = vrot.slane %v352_v6, 5  ;;  %v255_v47 = vld [vmem:[%s2390_s23 + $0x30] sm:$0xf] }
  0x20   : > { %v313_v8 = vsel %vm2447_vm5, %v308_v57, %v312_v41  ;;  %v323_v9 = vsel %vm2447_vm5, %v318_v58, %v322_v43  ;;  %v2467_v11 = vcombine.low %v752_v53, %v755_v61  ;;  %v337_v5 = vsel %vm2447_vm5, %v332_v59, %v336_v55 }
  0x21   : > { %v2180_v14 = vcombine.low %v313_v8, %v323_v9  ;;  %v342_v15 = vrot.slane %v341_v62, 4  ;;  %v355_v16 = vor.u32 %v354_v2, %v351_v60  ;;  %v358_v0 = vshll.u32 %v2396_v1, 16  ;;  %v257_v60 = vld [vmem:[%s2390_s23 + $0x38] sm:$0x1] }
  0x22   : > { %1093 = vrot.lane.b32.xlu1 %v2197_v36, %s2339_s26  ;;  %v364_v6 = vrot.slane %v362_v3, 4  ;;  %v368_v17 = vshll.u32 %v251_v35, 16  ;;  %v373_v19 = vshrl.u32 %v2461_v7, 16  ;;  %v376_v20 = vshll.u32 %v2461_v7, 16 }
  0x23   : > { %1011 = vrot.lane.b32.xlu0 %v2180_v14, %s2340_s27  ;;  %v347_v22 = vsel %vm2447_vm5, %v342_v15, %v346_v63  ;;  %v356_v23 = vrot.slane %v355_v16, 4  ;;  %v360_v24 = vrot.slane %v358_v0, 5  ;;  %v386_v25 = vshrl.u32 %v253_v12, 16  ;;  %v259_v14 = vld [vmem:[%s2390_s23 + $0x40] sm:$0xf] }
  0x24   : > { %v2181_v27 = vcombine.low %v337_v5, %v347_v22  ;;  %v375_v28 = vrot.slane %v373_v19, 4  ;;  %v370_v1 = vrot.slane %v368_v17, 5  ;;  %v378_v3 = vrot.slane %v376_v20, 5 }
  0x25   : > { %v365_v29 = vor.u32 %v364_v6, %v360_v24  ;;  %v382_v30 = vshll.u32 %v253_v12, 16  ;;  %v388_v31 = vrot.slane %v386_v25, 4  ;;  %v392_v32 = vshll.u32 %v254_v26, 16 }
  0x26   : > { %1198 = vrot.lane.b32.xlu1 %v2467_v11, %s2338_s25  ;;  %v361_v33 = vsel %vm2447_vm5, %v356_v23, %v360_v24  ;;  %v379_v35 = vor.u32 %v378_v3, %v375_v28  ;;  %v2492_v43 = vcombine.low %v2461_v7, %v253_v12  ;;  %v758_v44 = vrot.slane %v253_v12, 5  ;;  %v258_v12 = vld [vmem:[%s2390_s23 + $0x3c] sm:$0xf] }
  0x27   : > { %1013 = vrot.lane.b32.xlu0 %v2181_v27, %s2340_s27  ;;  %v366_v34 = vrot.slane %v365_v29, 4  ;;  %v384_v36 = vrot.slane %v382_v30, 5  ;;  %v394_v40 = vrot.slane %v392_v32, 5  ;;  %v2149_v50 = vrot.slane %v2461_v7, 9 }
  0x28   : > { %v380_v38 = vrot.slane %v379_v35, 4  ;;  %v760_v51 = vrot.slane %v758_v44, 4  ;;  %v761_v53 = vrot.slane %v254_v26, 5  ;;  %v397_v54 = vshrl.u32 %v255_v47, 16 }
  0x29   : > { %v371_v37 = vsel %vm2447_vm5, %v366_v34, %v370_v1  ;;  %v389_v39 = vor.u32 %v388_v31, %v384_v36  ;;  %v400_v55 = vshll.u32 %v255_v47, 16  ;;  %v410_v56 = vshrl.u32 %v256_v48, 16  ;;  %v260_v31 = vld [vmem:[%s2390_s23 + $0x44] sm:$0x1] }
  0x2a   : > { %v2182_v41 = vcombine.low %v361_v33, %v371_v37  ;;  %v385_v45 = vsel %vm2447_vm5, %v380_v38, %v384_v36  ;;  %v406_v57 = vshll.u32 %v256_v48, 16  ;;  %v759_v58 = vsel %vm2412_vm4, %v2149_v50, %v758_v44  ;;  %v2544_v44 = vld [vmem:[%s2390_s23 + $0x48] sm:$0xf] }
  0x2b   : > { %1161 = vrot.lane.b32.xlu0 %v2181_v27, %s2341_s28  ;;  %v390_v42 = vrot.slane %v389_v39, 4  ;;  %v762_v59 = vsel %vm2412_vm4, %v760_v51, %v761_v53  ;;  %v399_v61 = vrot.slane %v397_v54, 4  ;;  %v402_v62 = vrot.slane %v400_v55, 5 }
  0x2c   : > { %1163 = vrot.lane.b32.xlu1 %v2182_v41, %s2341_s28  ;;  %v408_v63 = vrot.slane %v406_v57, 5  ;;  %v412_v2 = vrot.slane %v410_v56, 4  ;;  %v2199_v7 = vcombine.low %v759_v58, %v762_v59  ;;  %v416_v8 = vshll.u32 %v257_v60, 16 }
  0x2d   : > { %v395_v46 = vsel %vm2447_vm5, %v390_v42, %v394_v40  ;;  %v403_v9 = vor.u32 %v402_v62, %v399_v61  ;;  %v765_v16 = vrot.slane %v256_v48, 5  ;;  %v421_v0 = vshrl.u32 %v258_v12, 16 }
  0x2e   : > { %v2183_v49 = vcombine.low %v385_v45, %v395_v46  ;;  %v413_v5 = vor.u32 %v412_v2, %v408_v63  ;;  %v418_v15 = vrot.slane %v416_v8, 5  ;;  %v424_v6 = vshll.u32 %v258_v12, 16  ;;  %v263_v2 = vld [vmem:[%s2390_s23 + $0x50] sm:$0x1] }
  0x2f   : > { %1231 = vrot.lane.b32.xlu0 %v2402_v4, %s2342_s29  ;;  %v404_v17 = vrot.slane %v403_v9, 4  ;;  %v434_v20 = vshrl.u32 %v259_v14, 16  ;;  %v430_v22 = vshll.u32 %v259_v14, 16  ;;  %v2521_v23 = vcombine.low %v255_v47, %v256_v48  ;;  %v2553_v48 = vld [vmem:[%s2390_s23 + $0x4c] sm:$0xf] }
  0x30   : > { %1233 = vrot.lane.b32.xlu1 %v2492_v43, %s2342_s29  ;;  %v414_v19 = vrot.slane %v413_v5, 4  ;;  %v2150_v24 = vrot.slane %v255_v47, 9  ;;  %v767_v25 = vrot.slane %v765_v16, 4  ;;  %v768_v26 = vrot.slane %v257_v60, 5 }
  0x31   : > { %v423_v27 = vrot.slane %v421_v0, 4  ;;  %v426_v28 = vrot.slane %v424_v6, 5  ;;  %v409_v29 = vsel %vm2447_vm5, %v404_v17, %v408_v63  ;;  %v432_v3 = vrot.slane %v430_v22, 5  ;;  %v2321_v63 = vld [vmem:[%s3444_s1] sm:$0x1f]  }
  0x32   : > { %v419_v1 = vsel %vm2447_vm5, %v414_v19, %v418_v15  ;;  %v436_v30 = vrot.slane %v434_v20, 4  ;;  %v766_v32 = vsel %vm2412_vm4, %v2150_v24, %v765_v16  ;;  %v769_v33 = vsel %vm2412_vm4, %v767_v25, %v768_v26  ;;  %v2579_v6 = vld [vmem:[%s2390_s23 + $0x54] sm:$0xf]  ;;  %v2582_v17 = vld [vmem:[%s2390_s23 + $0x58] sm:$0xf] }
  0x33   : > { %1266 = vrot.lane.b32.xlu0 %v2182_v41, %s2343_s30  ;;  %v427_v34 = vor.u32 %v426_v28, %v423_v27  ;;  %v440_v36 = vshll.u32 %v260_v31, 16  ;;  %v2200_v37 = vcombine.low %v766_v32, %v769_v33  ;;  %v772_v42 = vrot.slane %v259_v14, 5 }
  0x34   : > { %1268 = vrot.lane.b32.xlu1 %v2183_v49, %s2343_s30  ;;  %v437_v35 = vor.u32 %v436_v30, %v432_v3  ;;  %v2164_v45 = vcombine.low %v2419_v18, %v2424_v21  ;;  %v775_v50 = vrot.slane %v260_v31, 5  ;;  %v445_v51 = vshrl.u32 %v2544_v44, 16 }
  0x35   : > { %v428_v38 = vrot.slane %v427_v34, 4  ;;  %v442_v40 = vrot.slane %v440_v36, 5  ;;  %v774_v54 = vrot.slane %v772_v42, 4  ;;  %v448_v55 = vshll.u32 %v2544_v44, 16  ;;  %v266_v36 = vld [vmem:[%s2390_s23 + $0x5c] sm:$0x1] }
  0x36   : > { %v438_v39 = vrot.slane %v437_v35, 4  ;;  %v458_v56 = vshrl.u32 %v2553_v48, 16  ;;  %v454_v57 = vshll.u32 %v2553_v48, 16  ;;  %v447_v60 = vrot.slane %v445_v51, 4 }
  0x37   : > { %1301 = vrot.lane.b32.xlu0 %v2467_v11, %s2344_s6  ;;  %v433_v46 = vsel %vm2447_vm5, %v428_v38, %v432_v3  ;;  %v776_v59 = vsel %vm2412_vm4, %v774_v54, %v775_v50  ;;  %v450_v61 = vrot.slane %v448_v55, 5  ;;  %v2345_v8 = vmov 65535   ;;  %v267_v55 = vld [vmem:[%s2390_s23 + $0x60] sm:$0xf] }
  0x38   : > { %1015 = vrot.lane.b32.xlu1 %v2182_v41, %s2340_s27  ;;  %v2541_v41 = vcombine.low %v258_v12, %v259_v14  ;;  %v443_v47 = vsel %vm2447_vm5, %v438_v39, %v442_v40  ;;  %v460_v62 = vrot.slane %v458_v56, 4  ;;  %v1662_v9 = vsel %vm1660_vm6, 4294967295, %v2345_v8  ;;  %v268_v56 = vld [vmem:[%s2390_s23 + $0x64] sm:$0xf] }
  0x39   : > { %v2560_v53 = vcombine.low %v433_v46, %v443_v47  ;;  %v464_v14 = vshll.u32 %v263_v2, 16  ;;  %v451_v16 = vor.u32 %v450_v61, %v447_v60  ;;  %v779_v20 = vrot.slane %v2553_v48, 5 }
  0x3a   : > { %v469_v22 = vshrl.u32 %v2579_v6, 16  ;;  %v472_v24 = vshll.u32 %v2579_v6, 16  ;;  %v482_v27 = vshrl.u32 %v2582_v17, 16  ;;  %v478_v28 = vshll.u32 %v2582_v17, 16 }
  0x3b   : > { %1303 = vrot.lane.b32.xlu0 %v2199_v7, %s2344_s6  ;;  %v466_v19 = vrot.slane %v464_v14, 5  ;;  %v452_v25 = vrot.slane %v451_v16, 4  ;;  %v781_v3 = vrot.slane %v779_v20, 4  ;;  %v782_v30 = vrot.slane %v263_v2, 5 }
  0x3c   : > { %1017 = vrot.lane.b32.xlu1 %v2183_v49, %s2340_s27  ;;  %v471_v31 = vrot.slane %v469_v22, 4  ;;  %v480_v34 = vrot.slane %v478_v28, 5  ;;  %v484_v35 = vrot.slane %v482_v27, 4  ;;  %v2619_v50 = vcombine.low %v2579_v6, %v2582_v17 }
  0x3d   : > { %v783_v39 = vsel %vm2412_vm4, %v781_v3, %v782_v30  ;;  %v786_v51 = vrot.slane %v2582_v17, 5  ;;  %v493_v61 = vshrl.u32 %v267_v55, 16  ;;  %v502_v2 = vshll.u32 %v268_v56, 16 }
  0x3e   : > { %v2655_v30 = vcombine.low %v267_v55, %v268_v56 }
  0x3f   : > { %1095 = vrot.lane.b32.xlu0 %v2467_v11, %s2339_s26  ;;  %v2184_v11 = vcombine.low %v409_v29, %v419_v1  ;;  %v2595_v29 = vcombine.low %v2544_v44, %v2553_v48  ;;  %v2152_v1 = vrot.slane %v2544_v44, 9  ;;  %v488_v44 = vshll.u32 %v266_v36, 16 }
  0x40   : > { %1097 = vrot.lane.b32.xlu1 %v2199_v7, %s2339_s26  ;;  %v788_v60 = vrot.slane %v786_v51, 4  ;;  %v504_v14 = vrot.slane %v502_v2, 5 }
  0x41   : > { %v780_v38 = vsel %vm2412_vm4, %v2152_v1, %v779_v20  ;;  %v2646_v20 = vld [vmem:[%s2390_s23 + $0x70] sm:$0xf] }
  0x42   : > { %v2202_v46 = vcombine.low %v780_v38, %v783_v39  ;;  %v530_v1 = vshrl.u32 %v2646_v20, 16  ;;  %v526_v3 = vshll.u32 %v2646_v20, 16  ;;  %v272_v39 = vld [vmem:[%s2390_s23 + $0x74] sm:$0x1] }
  0x43   : > { %1130 = vrot.lane.b32.xlu0 %v2492_v43, %s2337_s24 }
  0x44   : > { %1132 = vrot.lane.b32.xlu1 %v2521_v23, %s2337_s24  ;;  %v532_v38 = vrot.slane %v530_v1, 4 }
  0x47   : > { %1165 = vrot.lane.b32.xlu0 %v2183_v49, %s2341_s28  ;;  %v2151_v49 = vrot.slane %v258_v12, 9  ;;  %v1663_v12 = vsel %vm1661_vm7, %v1662_v9, 0  ;;  %v495_v9 = vrot.slane %v493_v61, 4  ;;  %v2692_v61 = vld [vmem:[%s2390_s23 + $0x78] sm:$0xf] }
  0x48   : > { %1167 = vrot.lane.b32.xlu1 %v2184_v11, %s2341_s28  ;;  %v1665_v15 = vand.u32 %v2321_v63, %v1663_v12  ;;  %v506_v63 = vshrl.u32 %v268_v56, 16  ;;  %v269_v12 = vld [vmem:[%s2390_s23 + $0x68] sm:$0x1]  ;;  %v2156_v21 = vrot.slane %v2692_v61, 9 }
  0x49   : > { %v773_v58 = vsel %vm2412_vm4, %v2151_v49, %v772_v42  ;;  %v485_v42 = vor.u32 %v484_v35, %v480_v34  ;;  %v490_v49 = vrot.slane %v488_v44, 5 }
  0x4a   : > { %v2201_v5 = vcombine.low %v773_v58, %v776_v59  ;;  %2256 = vmatprep.subr.bf16.mxu0 %v1665_v15  ;;  %2290 = vmatprep.subr.bf16.mxu1 %v1665_v15  ;;  %v789_v58 = vrot.slane %v266_v36, 5 }
  0x4b   : > { %1200 = vrot.lane.b32.xlu0 %v2199_v7, %s2338_s25  ;;  %v456_v7 = vrot.slane %v454_v57, 5  ;;  %2257 = vmatpush3.bf16.msra.mxu0 %v1665_v15  ;;  %v486_v48 = vrot.slane %v485_v42, 4  ;;  %v2153_v57 = vrot.slane %v2579_v6, 9  ;;  %v512_v6 = vshll.u32 %v269_v12, 16 }
  0x4c   : > { %1202 = vrot.lane.b32.xlu1 %v2200_v37, %s2338_s25  ;;  %2291 = vmatpush3.bf16.msra.mxu1 %v1665_v15  ;;  %v790_v8 = vsel %vm2412_vm4, %v788_v60, %v789_v58  ;;  %v508_v15 = vrot.slane %v506_v63, 4  ;;  %v800_v58 = vrot.slane %v2646_v20, 5 }
  0x4d   : > { %v461_v0 = vor.u32 %v460_v62, %v456_v7  ;;  %v457_v32 = vsel %vm2447_vm5, %v452_v25, %v456_v7  ;;  %v496_v62 = vshll.u32 %v267_v55, 16  ;;  %v787_v7 = vsel %vm2412_vm4, %v2153_v57, %v786_v51 }
  0x4e   : > { %v2203_v16 = vcombine.low %v787_v7, %v790_v8  ;;  %v509_v17 = vor.u32 %v508_v15, %v504_v14  ;;  %v793_v25 = vrot.slane %v268_v56, 5  ;;  %v803_v7 = vrot.slane %v272_v39, 5 }
  0x4f   : > { %1235 = vrot.lane.b32.xlu0 %v2521_v23, %s2342_s29  ;;  %v462_v26 = vrot.slane %v461_v0, 4 }
  0x50   : > { %1237 = vrot.lane.b32.xlu1 %v2541_v41, %s2342_s29  ;;  %v510_v27 = vrot.slane %v509_v17, 4 }
  0x51   : > { %v467_v33 = vsel %vm2447_vm5, %v462_v26, %v466_v19  ;;  %v2643_v19 = vld [vmem:[%s2390_s23 + $0x6c] sm:$0xf] }
  0x52   : > { %v517_v26 = vshrl.u32 %v2643_v19, 16  ;;  %v520_v28 = vshll.u32 %v2643_v19, 16  ;;  %v2684_v57 = vcombine.low %v2643_v19, %v2646_v20  ;;  %v2155_v2 = vrot.slane %v2643_v19, 9  ;;  %v275_v19 = vld [vmem:[%s2390_s23 + $0x80] sm:$0x1] }
  0x53   : > { %1270 = vrot.lane.b32.xlu0 %v2184_v11, %s2343_s30 }
  0x54   : > { %1272 = vrot.lane.b32.xlu1 %v2560_v53, %s2343_s30  ;;  %v522_v36 = vrot.slane %v520_v28, 5  ;;  %v560_v28 = vshll.u32 %v275_v19, 16 }
  0x57   : > { %1305 = vrot.lane.b32.xlu0 %v2200_v37, %s2344_s6 }
  0x58   : > { %1019 = vrot.lane.b32.xlu1 %v2184_v11, %s2340_s27  ;;  %v474_v11 = vrot.slane %v472_v24, 5  ;;  %v514_v24 = vrot.slane %v512_v6, 5  ;;  %v801_v6 = vsel %vm2412_vm4, %v2155_v2, %v800_v58 }
  0x5a   : > { %v475_v40 = vor.u32 %v474_v11, %v471_v31  ;;  %v2154_v31 = vrot.slane %v267_v55, 9  ;;  %v515_v35 = vsel %vm2447_vm5, %v510_v27, %v514_v24 }
  0x5b   : > { %1307 = vrot.lane.b32.xlu0 %v2201_v5, %s2344_s6 }
  0x5c   : > { %1021 = vrot.lane.b32.xlu1 %v2560_v53, %s2340_s27  ;;  %v476_v47 = vrot.slane %v475_v40, 4  ;;  %v794_v42 = vsel %vm2412_vm4, %v2154_v31, %v793_v25 }
  0x5e   : > { %v481_v54 = vsel %vm2447_vm5, %v476_v47, %v480_v34  ;;  %v519_v34 = vrot.slane %v517_v26, 4 }
  0x5f   : > { %1099 = vrot.lane.b32.xlu0 %v2200_v37, %s2339_s26  ;;  %v2186_v37 = vcombine.low %v457_v32, %v467_v33  ;;  %v795_v32 = vrot.slane %v793_v25, 4  ;;  %v796_v33 = vrot.slane %v269_v12, 5  ;;  %v541_v12 = vshrl.u32 %v2692_v61, 16 }
  0x60   : > { %1101 = vrot.lane.b32.xlu1 %v2201_v5, %s2339_s26 }
  0x61   : > { %v797_v44 = vsel %vm2412_vm4, %v795_v32, %v796_v33  ;;  %v543_v20 = vrot.slane %v541_v12, 4  ;;  %v2726_v32 = vld [vmem:[%s2390_s23 + $0x84] sm:$0xf]  ;;  %v2729_v33 = vld [vmem:[%s2390_s23 + $0x88] sm:$0xf] }
  0x63   : > { %1134 = vrot.lane.b32.xlu0 %v2541_v41, %s2337_s24 }
  0x64   : > { %1136 = vrot.lane.b32.xlu1 %v2595_v29, %s2337_s24 }
  0x67   : > { %1169 = vrot.lane.b32.xlu0 %v2560_v53, %s2341_s28  ;;  %v491_v53 = vsel %vm2447_vm5, %v486_v48, %v490_v49  ;;  %v536_v48 = vshll.u32 %v272_v39, 16  ;;  %v2673_v49 = vcombine.low %v794_v42, %v797_v44  ;;  %v578_v44 = vshrl.u32 %v2729_v33, 16 }
  0x68   : > { %1171 = vrot.lane.b32.xlu1 %v2186_v37, %s2341_s28  ;;  %v2187_v59 = vcombine.low %v481_v54, %v491_v53 }
  0x69   : > { %v538_v55 = vrot.slane %v536_v48, 5 }
  0x6b   : > { %1204 = vrot.lane.b32.xlu0 %v2201_v5, %s2338_s25  ;;  %v498_v5 = vrot.slane %v496_v62, 5  ;;  %v2695_v62 = vld [vmem:[%s2390_s23 + $0x7c] sm:$0xf] }
  0x6c   : > { %1206 = vrot.lane.b32.xlu1 %v2202_v46, %s2338_s25  ;;  %v554_v15 = vshrl.u32 %v2695_v62, 16  ;;  %v2750_v18 = vcombine.low %v2692_v61, %v2695_v62 }
  0x6d   : > { %v499_v0 = vor.u32 %v498_v5, %v495_v9  ;;  %v802_v5 = vrot.slane %v800_v58, 4 }
  0x6e   : > { %v556_v26 = vrot.slane %v554_v15, 4 }
  0x6f   : > { %1239 = vrot.lane.b32.xlu0 %v2595_v29, %s2342_s29  ;;  %v500_v22 = vrot.slane %v499_v0, 4  ;;  %v804_v17 = vsel %vm2412_vm4, %v802_v5, %v803_v7  ;;  %v2762_v7 = vld [vmem:[%s2390_s23 + $0x8c] sm:$0x1] }
  0x70   : > { %1241 = vrot.lane.b32.xlu1 %v2619_v50, %s2342_s29  ;;  %v2720_v27 = vcombine.low %v801_v6, %v804_v17  ;;  %v584_v17 = vshll.u32 %v2762_v7, 16 }
  0x71   : > { %v505_v11 = vsel %vm2447_vm5, %v500_v22, %v504_v14  ;;  %v544_v14 = vshll.u32 %v2692_v61, 16 }
  0x72   : > { %v2188_v40 = vcombine.low %v505_v11, %v515_v35 }
  0x73   : > { %1274 = vrot.lane.b32.xlu0 %v2186_v37, %s2343_s30  ;;  %v546_v22 = vrot.slane %v544_v14, 5 }
  0x74   : > { %1276 = vrot.lane.b32.xlu1 %v2187_v59, %s2343_s30 }
  0x77   : > { %1309 = vrot.lane.b32.xlu0 %v2202_v46, %s2344_s6 }
  0x78   : > { %1023 = vrot.lane.b32.xlu1 %v2186_v37, %s2340_s27  ;;  %v528_v37 = vrot.slane %v526_v3, 5  ;;  %v547_v3 = vor.u32 %v546_v22, %v543_v20 }
  0x7a   : > { %v533_v47 = vor.u32 %v532_v38, %v528_v37  ;;  %v548_v35 = vrot.slane %v547_v3, 4  ;;  %v568_v38 = vshll.u32 %v2726_v32, 16  ;;  %v586_v3 = vrot.slane %v584_v17, 5 }
  0x7b   : > { %1311 = vrot.lane.b32.xlu0 %v2203_v16, %s2344_s6 }
  0x7c   : > { %1025 = vrot.lane.b32.xlu1 %v2187_v59, %s2340_s27  ;;  %v534_v53 = vrot.slane %v533_v47, 4 }
  0x7e   : > { %v539_v60 = vsel %vm2447_vm5, %v534_v53, %v538_v55 }
  0x7f   : > { %1103 = vrot.lane.b32.xlu0 %v2202_v46, %s2339_s26  ;;  %v523_v46 = vor.u32 %v522_v36, %v519_v34  ;;  %v562_v34 = vrot.slane %v560_v28, 5  ;;  %v807_v36 = vrot.slane %v2695_v62, 5 }
  0x80   : > { %1105 = vrot.lane.b32.xlu1 %v2203_v16, %s2339_s26 }
  0x81   : > { %v524_v54 = vrot.slane %v523_v46, 4  ;;  %v574_v46 = vshll.u32 %v2729_v33, 16  ;;  %v808_v14 = vsel %vm2412_vm4, %v2156_v21, %v807_v36 }
  0x83   : > { %1138 = vrot.lane.b32.xlu0 %v2619_v50, %s2337_s24 }
  0x84   : > { %1140 = vrot.lane.b32.xlu1 %v2655_v30, %s2337_s24 }
  0x86   : > { %v2677_v56 = vpop.permute.xlu1 %1128 }
  0x87   : > { %1173 = vrot.lane.b32.xlu0 %v2187_v59, %s2341_s28  ;;  %v2675_v51 = vpop.permute.xlu0 %1126  ;;  %v529_v59 = vsel %vm2447_vm5, %v524_v54, %v528_v37  ;;  %v565_v37 = vshrl.u32 %v2726_v32, 16 }
  0x88   : > { %1175 = vrot.lane.b32.xlu1 %v2188_v40, %s2341_s28  ;;  %v2704_v9 = vcombine.low %v529_v59, %v539_v60  ;;  %v570_v59 = vrot.slane %v568_v38, 5  ;;  %v576_v60 = vrot.slane %v574_v46, 5  ;;  %v817_v46 = vrot.slane %v2762_v7, 5 }
  0x89   : > { %v567_v55 = vrot.slane %v565_v37, 4 }
  0x8b   : > { %1208 = vrot.lane.b32.xlu0 %v2203_v16, %s2338_s25  ;;  %v550_v16 = vshll.u32 %v2695_v62, 16  ;;  %v580_v62 = vrot.slane %v578_v44, 4  ;;  %v2819_v44 = vld [vmem:[%s2390_s23 + $0x94] sm:$0xf] }
  0x8c   : > { %1210 = vrot.lane.b32.xlu1 %v2673_v49, %s2338_s25 }
  0x8d   : > { %v2699_v63 = vpop.permute.xlu0 %1196  ;;  %v552_v25 = vrot.slane %v550_v16, 5  ;;  %v581_v6 = vor.u32 %v580_v62, %v576_v60  ;;  %v281_v62 = vld [vmem:[%s2390_s23 + $0x98] sm:$0x1] }
  0x8f   : > { %1243 = vrot.lane.b32.xlu0 %v2655_v30, %s2342_s29  ;;  %v557_v11 = vor.u32 %v556_v26, %v552_v25  ;;  %v553_v53 = vsel %vm2447_vm5, %v548_v35, %v552_v25  ;;  %v2804_v35 = vcombine.low %v2726_v32, %v2729_v33 }
  0x90   : > { %1245 = vrot.lane.b32.xlu1 %v2684_v57, %s2342_s29  ;;  %v1092_v8 = vpop.permute.xlu1 %1091 }
  0x91   : > { %v558_v42 = vrot.slane %v557_v11, 4 }
  0x93   : > { %1278 = vrot.lane.b32.xlu0 %v2188_v40, %s2343_s30 }
  0x94   : > { %1280 = vrot.lane.b32.xlu1 %v2704_v9, %s2343_s30  ;;  %v1094_v0 = vpop.permute.xlu1 %1093 }
  0x95   : > { %v1012_v24 = vpop.permute.xlu0 %1011 }
  0x96   : > { %v1336_v39 = vsel %vm1333_vm8, %v2164_v45, %v1012_v24  ;;  %v810_v45 = vrot.slane %v275_v19, 5 }
  0x97   : > { %1313 = vrot.lane.b32.xlu0 %v2673_v49, %s2344_s6  ;;  %v1384_v54 = vsel %vm1382_vm9, %v1336_v39, %v1092_v8  ;;  %v2813_v39 = vld [vmem:[%s2390_s23 + $0x90] sm:$0xf] }
  0x98   : > { %1027 = vrot.lane.b32.xlu1 %v2188_v40, %s2340_s27  ;;  %v2723_v1 = vpop.permute.xlu1 %1198  ;;  %v1417_v8 = vsel %vm1415_vm10, %v1384_v54, %v2675_v51  ;;  %v589_v21 = vshrl.u32 %v2813_v39, 16 }
  0x99   : > { %v1014_v31 = vpop.permute.xlu0 %1013 }
  0x9a   : > { %v1339_v48 = vsel %vm1333_vm8, %v2407_v10, %v1014_v31  ;;  %v809_v10 = vrot.slane %v807_v36, 4  ;;  %v814_v36 = vrot.slane %v2729_v33, 5  ;;  %v2157_v33 = vrot.slane %v2726_v32, 9 }
  0x9b   : > { %1315 = vrot.lane.b32.xlu0 %v2720_v27, %s2344_s6  ;;  %v1386_v61 = vsel %vm1382_vm9, %v1339_v48, %v1094_v0  ;;  %v571_v0 = vor.u32 %v570_v59, %v567_v55 }
  0x9c   : > { %1029 = vrot.lane.b32.xlu1 %v2704_v9, %s2340_s27  ;;  %v811_v15 = vsel %vm2412_vm4, %v809_v10, %v810_v45  ;;  %v1419_v51 = vsel %vm1415_vm10, %v1386_v61, %v2677_v56  ;;  %v816_v48 = vrot.slane %v814_v36, 4  ;;  %v592_v45 = vshll.u32 %v2813_v39, 16 }
  0x9d   : > { %v1162_v40 = vpop.permute.xlu0 %1161  ;;  %v2788_v56 = vcombine.low %v808_v14, %v811_v15  ;;  %v572_v28 = vrot.slane %v571_v0, 4  ;;  %v598_v10 = vshll.u32 %v2819_v44, 16  ;;  %v815_v32 = vsel %vm2412_vm4, %v2157_v33, %v814_v36 }
  0x9e   : > { %v1164_v47 = vpop.permute.xlu1 %1163  ;;  %v1450_v5 = vsel %vm1448_vm11, %v1417_v8, %v1162_v40  ;;  %v594_v59 = vrot.slane %v592_v45, 5  ;;  %v608_v14 = vshll.u32 %v281_v62, 16  ;;  %v824_v36 = vrot.slane %v281_v62, 5 }
  0x9f   : > { %1107 = vrot.lane.b32.xlu0 %v2673_v49, %s2339_s26  ;;  %v563_v49 = vsel %vm2447_vm5, %v558_v42, %v562_v34  ;;  %v1483_v20 = vsel %vm1481_vm12, %v1450_v5, %v2699_v63  ;;  %v1452_v22 = vsel %vm1448_vm11, %v1419_v51, %v1164_v47  ;;  %v582_v63 = vrot.slane %v581_v6, 4  ;;  %v2855_v6 = vld [vmem:[%s2390_s23 + $0xa0] sm:$0xf] }
  0xa0   : > { %1109 = vrot.lane.b32.xlu1 %v2720_v27, %s2339_s26  ;;  %v2771_v12 = vcombine.low %v553_v53, %v563_v49  ;;  %v1485_v11 = vsel %vm1481_vm12, %v1452_v22, %v2723_v1  ;;  %v577_v1 = vsel %vm2447_vm5, %v572_v28, %v576_v60  ;;  %v602_v53 = vshrl.u32 %v2819_v44, 16 }
  0xa1   : > { %v1232_v58 = vpop.permute.xlu0 %1231  ;;  %v591_v49 = vrot.slane %v589_v21, 4  ;;  %v600_v61 = vrot.slane %v598_v10, 5  ;;  %v622_v28 = vshll.u32 %v2855_v6, 16 }
  0xa2   : > { %v1234_v2 = vpop.permute.xlu1 %1233  ;;  %v1516_v24 = vsel %vm1514_vm13, %v1483_v20, %v1232_v58  ;;  %v818_v58 = vsel %vm2412_vm4, %v816_v48, %v817_v46  ;;  %v821_v20 = vrot.slane %v2819_v44, 5 }
  0xa3   : > { %1142 = vrot.lane.b32.xlu0 %v2684_v57, %s2337_s24  ;;  %v1518_v34 = vsel %vm1514_vm13, %v1485_v11, %v1234_v2  ;;  %v604_v2 = vrot.slane %v602_v53, 4  ;;  %v2847_v8 = vcombine.low %v815_v32, %v818_v58  ;;  %v595_v5 = vor.u32 %v594_v59, %v591_v49 }
  0xa4   : > { %1144 = vrot.lane.b32.xlu1 %v2750_v18, %s2337_s24 }
  0xa5   : > { %v1267_v16 = vpop.permute.xlu0 %1266  ;;  %v605_v51 = vor.u32 %v604_v2, %v600_v61  ;;  %v596_v17 = vrot.slane %v595_v5, 4 }
  0xa6   : > { %v1269_v19 = vpop.permute.xlu1 %1268  ;;  %v1549_v25 = vsel %vm1547_vm14, %v1516_v24, %v1267_v16  ;;  %v2852_v16 = vld [vmem:[%s2390_s23 + $0x9c] sm:$0xf] }
  0xa7   : > { %1177 = vrot.lane.b32.xlu0 %v2704_v9, %s2341_s28  ;;  %v1551_v37 = vsel %vm1547_vm14, %v1518_v34, %v1269_v19  ;;  %v610_v19 = vrot.slane %v608_v14, 5  ;;  %v606_v24 = vrot.slane %v605_v51, 4  ;;  %v601_v11 = vsel %vm2447_vm5, %v596_v17, %v600_v61 }
  0xa8   : > { %1179 = vrot.lane.b32.xlu1 %v2771_v12, %s2341_s28  ;;  %v823_v34 = vrot.slane %v821_v20, 4 }
  0xa9   : > { %v1302_v26 = vpop.permute.xlu0 %1301 }
  0xaa   : > { %v2791_v31 = vpop.permute.xlu1 %1015  ;;  %v1582_v9 = vsel %vm1580_vm15, %v1549_v25, %v1302_v26  ;;  %v616_v25 = vshll.u32 %v2852_v16, 16  ;;  %v626_v26 = vshrl.u32 %v2855_v6, 16 }
  0xab   : > { %1212 = vrot.lane.b32.xlu0 %v2720_v27, %s2338_s25  ;;  %2258 = vmatprep.mubr.msk.bf16.mxu0 %vm1627_vm0, %v1582_v9  ;;  %v587_v27 = vsel %vm2447_vm5, %v582_v63, %v586_v3  ;;  %v2870_v3 = vcombine.low %v2813_v39, %v2819_v44  ;;  %v2158_v9 = vrot.slane %v2813_v39, 9  ;;  %v1342_v39 = vsel %vm1333_vm8, %v2402_v4, %v2791_v31 }
  0xac   : > { %1214 = vrot.lane.b32.xlu1 %v2788_v56, %s2338_s25  ;;  %v2828_v47 = vcombine.low %v577_v1, %v587_v27  ;;  %v611_v1 = vsel %vm2447_vm5, %v606_v24, %v610_v19  ;;  %v618_v27 = vrot.slane %v616_v25, 5  ;;  %v628_v44 = vrot.slane %v626_v26, 4  ;;  %v2936_v24 = vld [vmem:[%s2390_s23 + $0xa8] sm:$0xf] }
  0xad   : > { %v1304_v38 = vpop.permute.xlu0 %1303  ;;  %v2890_v48 = vcombine.low %v601_v11, %v611_v1  ;;  %v822_v21 = vsel %vm2412_vm4, %v2158_v9, %v821_v20  ;;  %v825_v4 = vsel %vm2412_vm4, %v823_v34, %v824_v36  ;;  %v828_v19 = vrot.slane %v2855_v6, 5 }
  0xae   : > { %v2815_v40 = vpop.permute.xlu1 %1017  ;;  %v1584_v42 = vsel %vm1580_vm15, %v1551_v37, %v1304_v38  ;;  %v2910_v61 = vcombine.low %v822_v21, %v825_v4  ;;  %v637_v34 = vshrl.u32 %v2936_v24, 16  ;;  %v640_v36 = vshll.u32 %v2936_v24, 16 }
  0xaf   : > { %1247 = vrot.lane.b32.xlu0 %v2750_v18, %s2342_s29  ;;  %2259 = vmatmul.mubr.msk.bf16.vlgmr.msra.gmra.mrb[0].mxu0 %vm1627_vm0, %v1584_v42  ;;  %v624_v42 = vrot.slane %v622_v28, 5  ;;  %v1345_v49 = vsel %vm1333_vm8, %v2492_v43, %v2815_v40  ;;  %v2942_v28 = vld [vmem:[%s2390_s23 + $0xac] sm:$0xf]  ;;  %v830_v11 = vrot.slane %v828_v19, 4 }
  0xb0   : > { %1249 = vrot.lane.b32.xlu1 %v2804_v35, %s2342_s29  ;;  %v646_v1 = vshll.u32 %v2942_v28, 16 }
  0xb1   : > { %v1096_v54 = vpop.permute.xlu0 %1095  ;;  %v629_v32 = vor.u32 %v628_v44, %v624_v42  ;;  %v642_v44 = vrot.slane %v640_v36, 5 }
  0xb2   : > { %v2834_v55 = vpop.permute.xlu1 %1097  ;;  %v1388_v46 = vsel %vm1382_vm9, %v1342_v39, %v1096_v54  ;;  %v287_v39 = vld [vmem:[%s2390_s23 + $0xb0] sm:$0x1] }
  0xb3   : > { %1282 = vrot.lane.b32.xlu0 %v2771_v12, %s2343_s30  ;;  %v656_v4 = vshll.u32 %v287_v39, 16 }
  0xb4   : > { %1284 = vrot.lane.b32.xlu1 %v2828_v47, %s2343_s30 }
  0xb5   : > { %v1131_v60 = vpop.permute.xlu0 %1130 }
  0xb6   : > { %v1133_v7 = vpop.permute.xlu1 %1132  ;;  %v1421_v53 = vsel %vm1415_vm10, %v1388_v46, %v1131_v60  ;;  %v1390_v60 = vsel %vm1382_vm9, %v1345_v49, %v2834_v55  ;;  %v648_v46 = vrot.slane %v646_v1, 5  ;;  %v2978_v49 = vld [vmem:[%s2390_s23 + $0xb8] sm:$0xf] }
  0xb7   : > { %1317 = vrot.lane.b32.xlu0 %v2788_v56, %s2344_s6  ;;  %v1423_v5 = vsel %vm1415_vm10, %v1390_v60, %v1133_v7  ;;  %v658_v60 = vrot.slane %v656_v4, 5 }
  0xb8   : > { %1031 = vrot.lane.b32.xlu1 %v2771_v12, %s2340_s27  ;;  %v613_v12 = vshrl.u32 %v2852_v16, 16 }
  0xb9   : > { %v1166_v15 = vpop.permute.xlu0 %1165 }
  0xba   : > { %v1168_v0 = vpop.permute.xlu1 %1167  ;;  %v615_v37 = vrot.slane %v613_v12, 4  ;;  %v1454_v54 = vsel %vm1448_vm11, %v1421_v53, %v1166_v15  ;;  %v630_v15 = vrot.slane %v629_v32, 4 }
  0xbb   : > { %1319 = vrot.lane.b32.xlu0 %v2847_v8, %s2344_s6 }
  0xbc   : > { %1033 = vrot.lane.b32.xlu1 %v2828_v47, %s2340_s27  ;;  %v619_v31 = vor.u32 %v618_v27, %v615_v37 }
  0xbd   : > { %v1201_v22 = vpop.permute.xlu0 %1200 }
  0xbe   : > { %v1203_v63 = vpop.permute.xlu1 %1202  ;;  %v1487_v59 = vsel %vm1481_vm12, %v1454_v54, %v1201_v22  ;;  %v620_v14 = vrot.slane %v619_v31, 4  ;;  %v2975_v54 = vld [vmem:[%s2390_s23 + $0xb4] sm:$0xf] }
  0xbf   : > { %1111 = vrot.lane.b32.xlu0 %v2788_v56, %s2339_s26  ;;  %v2880_v56 = vld [vmem:[%s2390_s23 + $0xa4] sm:$0x1] }
  0xc0   : > { %1113 = vrot.lane.b32.xlu1 %v2847_v8, %s2339_s26  ;;  %v632_v45 = vshll.u32 %v2880_v56, 16  ;;  %v625_v22 = vsel %vm2447_vm5, %v620_v14, %v624_v42  ;;  %v639_v42 = vrot.slane %v637_v34, 4  ;;  %v670_v14 = vshll.u32 %v2978_v49, 16 }
  0xc1   : > { %v1236_v38 = vpop.permute.xlu0 %1235 }
  0xc2   : > { %v1238_v33 = vpop.permute.xlu1 %1237  ;;  %v1520_v62 = vsel %vm1514_vm13, %v1487_v59, %v1236_v38  ;;  %v634_v2 = vrot.slane %v632_v45, 5  ;;  %v650_v38 = vshrl.u32 %v2942_v28, 16 }
  0xc3   : > { %1146 = vrot.lane.b32.xlu0 %v2804_v35, %s2337_s24 }
  0xc4   : > { %1148 = vrot.lane.b32.xlu1 %v2870_v3, %s2337_s24  ;;  %v652_v21 = vrot.slane %v650_v38, 4 }
  0xc5   : > { %v1271_v10 = vpop.permute.xlu0 %1270 }
  0xc6   : > { %v1273_v58 = vpop.permute.xlu1 %1272  ;;  %v1553_v43 = vsel %vm1547_vm14, %v1520_v62, %v1271_v10  ;;  %v643_v10 = vor.u32 %v642_v44, %v639_v42  ;;  %v653_v32 = vor.u32 %v652_v21, %v648_v46  ;;  %v835_v62 = vrot.slane %v2942_v28, 5 }
  0xc7   : > { %1181 = vrot.lane.b32.xlu0 %v2828_v47, %s2341_s28  ;;  %v1456_v47 = vsel %vm1448_vm11, %v1423_v5, %v1168_v0  ;;  %v2927_v0 = vcombine.low %v2852_v16, %v2855_v6  ;;  %v2159_v6 = vrot.slane %v2852_v16, 9 }
  0xc8   : > { %1183 = vrot.lane.b32.xlu1 %v2890_v48, %s2341_s28  ;;  %v1489_v17 = vsel %vm1481_vm12, %v1456_v47, %v1203_v63  ;;  %v831_v63 = vrot.slane %v2880_v56, 5  ;;  %v644_v59 = vrot.slane %v643_v10, 4  ;;  %v654_v5 = vrot.slane %v653_v32, 4 }
  0xc9   : > { %v1306_v40 = vpop.permute.xlu0 %1305  ;;  %v1522_v7 = vsel %vm1514_vm13, %v1489_v17, %v1238_v33  ;;  %v829_v16 = vsel %vm2412_vm4, %v2159_v6, %v828_v19  ;;  %v2993_v47 = vcombine.low %v2936_v24, %v2942_v28  ;;  %v838_v19 = vrot.slane %v287_v39, 5 }
  0xca   : > { %v2915_v51 = vpop.permute.xlu1 %1019  ;;  %v1586_v55 = vsel %vm1580_vm15, %v1553_v43, %v1306_v40  ;;  %v1555_v20 = vsel %vm1547_vm14, %v1522_v7, %v1273_v58  ;;  %v832_v56 = vsel %vm2412_vm4, %v830_v11, %v831_v63  ;;  %v664_v43 = vshll.u32 %v2975_v54, 16 }
  0xcb   : > { %1216 = vrot.lane.b32.xlu0 %v2847_v8, %s2338_s25  ;;  %2262 = vmatprep.mubr.msk.bf16.mxu0 %vm1627_vm0, %v1586_v55  ;;  %v635_v8 = vsel %vm2447_vm5, %v630_v15, %v634_v2  ;;  %v2970_v53 = vcombine.low %v829_v16, %v832_v56  ;;  %v674_v40 = vshrl.u32 %v2978_v49, 16  ;;  %v2160_v55 = vrot.slane %v2936_v24, 9 }
  0xcc   : > { %1218 = vrot.lane.b32.xlu1 %v2910_v61, %s2338_s25  ;;  %v2951_v9 = vcombine.low %v625_v22, %v635_v8  ;;  %v649_v17 = vsel %vm2447_vm5, %v644_v59, %v648_v46  ;;  %v837_v7 = vrot.slane %v835_v62, 4  ;;  %v659_v22 = vsel %vm2447_vm5, %v654_v5, %v658_v60 }
  0xcd   : > { %v1308_v12 = vpop.permute.xlu0 %1307  ;;  %v666_v8 = vrot.slane %v664_v43, 5  ;;  %v676_v28 = vrot.slane %v674_v40, 4  ;;  %v1348_v24 = vsel %vm1333_vm8, %v2521_v23, %v2915_v51  ;;  %v3013_v11 = vcombine.low %v649_v17, %v659_v22 }
  0xce   : > { %v2938_v25 = vpop.permute.xlu1 %1021  ;;  %v1588_v26 = vsel %vm1580_vm15, %v1555_v20, %v1308_v12  ;;  %v836_v34 = vsel %vm2412_vm4, %v2160_v55, %v835_v62  ;;  %v839_v23 = vsel %vm2412_vm4, %v837_v7, %v838_v19  ;;  %v842_v62 = vrot.slane %v2978_v49, 5 }
  0xcf   : > { %1251 = vrot.lane.b32.xlu0 %v2870_v3, %s2342_s29  ;;  %2263 = vmatmul.mubr.msk.bf16.gmra.mrb[4].mxu0 %vm1627_vm0, %v1588_v26  ;;  %v672_v26 = vrot.slane %v670_v14, 5  ;;  %v1351_v42 = vsel %vm1333_vm8, %v2541_v41, %v2938_v25  ;;  %v3033_v46 = vcombine.low %v836_v34, %v839_v23  ;;  %v2161_v19 = vrot.slane %v2975_v54, 9 }
  0xd0   : > { %1253 = vrot.lane.b32.xlu1 %v2927_v0, %s2342_s29 }
  0xd1   : > { %v1100_v37 = vpop.permute.xlu0 %1099  ;;  %v677_v16 = vor.u32 %v676_v28, %v672_v26 }
  0xd2   : > { %v2957_v27 = vpop.permute.xlu1 %1101  ;;  %v1392_v63 = vsel %vm1382_vm9, %v1348_v24, %v1100_v37 }
  0xd3   : > { %1286 = vrot.lane.b32.xlu0 %v2890_v48, %s2343_s30 }
  0xd4   : > { %1288 = vrot.lane.b32.xlu1 %v2951_v9, %s2343_s30 }
  0xd5   : > { %v1135_v33 = vpop.permute.xlu0 %1134 }
  0xd6   : > { %v1137_v45 = vpop.permute.xlu1 %1136  ;;  %v1425_v38 = vsel %vm1415_vm10, %v1392_v63, %v1135_v33  ;;  %v1394_v33 = vsel %vm1382_vm9, %v1351_v42, %v2957_v27  ;;  %v293_v63 = vld [vmem:[%s2390_s23 + $0xc8] sm:$0x1] }
  0xd7   : > { %1321 = vrot.lane.b32.xlu0 %v2910_v61, %s2344_s6  ;;  %v1427_v10 = vsel %vm1415_vm10, %v1394_v33, %v1137_v45  ;;  %v3046_v45 = vld [vmem:[%s2390_s23 + $0xc0] sm:$0xf] }
  0xd8   : > { %1035 = vrot.lane.b32.xlu1 %v2890_v48, %s2340_s27  ;;  %v661_v48 = vshrl.u32 %v2975_v54, 16  ;;  %v851_v55 = vshll.u32 %v3046_v45, 16 }
  0xd9   : > { %v1170_v31 = vpop.permute.xlu0 %1169 }
  0xda   : > { %v1172_v58 = vpop.permute.xlu1 %1171  ;;  %v663_v20 = vrot.slane %v661_v48, 4  ;;  %v1458_v37 = vsel %vm1448_vm11, %v1425_v38, %v1170_v31  ;;  %v3057_v48 = vld [vmem:[%s2390_s23 + $0xc4] sm:$0xf]  ;;  %v853_v28 = vrot.slane %v851_v55, 5 }
  0xdb   : > { %1323 = vrot.lane.b32.xlu0 %v2970_v53, %s2344_s6  ;;  %v1460_v31 = vsel %vm1448_vm11, %v1427_v10, %v1172_v58  ;;  %v3053_v58 = vcombine.low %v2975_v54, %v2978_v49  ;;  %v861_v49 = vshrl.u32 %v3057_v48, 16  ;;  %v857_v17 = vshll.u32 %v3057_v48, 16 }
  0xdc   : > { %1037 = vrot.lane.b32.xlu1 %v2951_v9, %s2340_s27  ;;  %v667_v51 = vor.u32 %v666_v8, %v663_v20  ;;  %v844_v20 = vrot.slane %v842_v62, 4  ;;  %v843_v54 = vsel %vm2412_vm4, %v2161_v19, %v842_v62 }
  0xdd   : > { %v1205_v2 = vpop.permute.xlu0 %1204  ;;  %v863_v24 = vrot.slane %v861_v49, 4 }
  0xde   : > { %v1207_v15 = vpop.permute.xlu1 %1206  ;;  %v1491_v44 = vsel %vm1481_vm12, %v1458_v37, %v1205_v2  ;;  %v668_v4 = vrot.slane %v667_v51, 4  ;;  %v867_v51 = vshll.u32 %v293_v63, 16 }
  0xdf   : > { %1115 = vrot.lane.b32.xlu0 %v2910_v61, %s2339_s26  ;;  %v3003_v61 = vld [vmem:[%s2390_s23 + $0xbc] sm:$0x1]  ;;  %v1493_v59 = vsel %vm1481_vm12, %v1460_v31, %v1207_v15  ;;  %v848_v15 = vshrl.u32 %v3046_v45, 16  ;;  %v2212_v31 = vcombine.low %v3046_v45, %v3057_v48 }
  0xe0   : > { %1117 = vrot.lane.b32.xlu1 %v2970_v53, %s2339_s26  ;;  %v680_v36 = vshll.u32 %v3003_v61, 16  ;;  %v673_v5 = vsel %vm2447_vm5, %v668_v4, %v672_v26 }
  0xe1   : > { %v1240_v12 = vpop.permute.xlu0 %1239  ;;  %v850_v26 = vrot.slane %v848_v15, 4  ;;  %v296_v15 = vld [vmem:[%s2390_s23 + $0xd4] sm:$0x1] }
  0xe2   : > { %v1242_v6 = vpop.permute.xlu1 %1241  ;;  %v1524_v39 = vsel %vm1514_vm13, %v1491_v44, %v1240_v12  ;;  %v682_v21 = vrot.slane %v680_v36, 5  ;;  %v845_v12 = vrot.slane %v3003_v61, 5 }
  0xe3   : > { %1150 = vrot.lane.b32.xlu0 %v2927_v0, %s2337_s24  ;;  %v1526_v60 = vsel %vm1514_vm13, %v1493_v59, %v1242_v6  ;;  %v859_v6 = vrot.slane %v857_v17, 5  ;;  %v854_v38 = vor.u32 %v853_v28, %v850_v26  ;;  %v901_v26 = vshll.u32 %v296_v15, 16 }
  0xe4   : > { %1152 = vrot.lane.b32.xlu1 %v2993_v47, %s2337_s24  ;;  %v846_v61 = vsel %vm2412_vm4, %v844_v20, %v845_v12 }
  0xe5   : > { %v1275_v1 = vpop.permute.xlu0 %1274  ;;  %v864_v23 = vor.u32 %v863_v24, %v859_v6  ;;  %v855_v44 = vrot.slane %v854_v38, 4 }
  0xe6   : > { %v1277_v56 = vpop.permute.xlu1 %1276  ;;  %v1557_v41 = vsel %vm1547_vm14, %v1524_v39, %v1275_v1  ;;  %v3095_v1 = vcombine.low %v843_v54, %v846_v61  ;;  %v869_v39 = vrot.slane %v867_v51, 5 }
  0xe7   : > { %1185 = vrot.lane.b32.xlu0 %v2951_v9, %s2341_s28  ;;  %v678_v9 = vrot.slane %v677_v16, 4  ;;  %v1559_v2 = vsel %vm1547_vm14, %v1526_v60, %v1277_v56  ;;  %v3100_v16 = vld [vmem:[%s2390_s23 + $0xcc] sm:$0xf]  ;;  %v3103_v56 = vld [vmem:[%s2390_s23 + $0xd0] sm:$0xf]  ;;  %v865_v33 = vrot.slane %v864_v23, 4 }
  0xe8   : > { %1187 = vrot.lane.b32.xlu1 %v3013_v11, %s2341_s28  ;;  %v885_v10 = vshll.u32 %v3100_v16, 16  ;;  %v2162_v60 = vrot.slane %v3046_v45, 9  ;;  %v903_v23 = vrot.slane %v901_v26, 5 }
  0xe9   : > { %v1310_v25 = vpop.permute.xlu0 %1309  ;;  %v683_v43 = vsel %vm2447_vm5, %v678_v9, %v682_v21  ;;  %v882_v21 = vshrl.u32 %v3100_v16, 16  ;;  %v870_v59 = vsel %vm2447_vm5, %v865_v33, %v869_v39 }
  0xea   : > { %v3038_v27 = vpop.permute.xlu1 %1023  ;;  %v1590_v32 = vsel %vm1580_vm15, %v1557_v41, %v1310_v25  ;;  %v3076_v7 = vcombine.low %v673_v5, %v683_v43  ;;  %v895_v41 = vshrl.u32 %v3103_v56, 16  ;;  %v891_v25 = vshll.u32 %v3103_v56, 16 }
  0xeb   : > { %1220 = vrot.lane.b32.xlu0 %v2970_v53, %s2338_s25  ;;  %2266 = vmatprep.mubr.msk.bf16.mxu0 %vm1627_vm0, %v1590_v32  ;;  %v860_v32 = vsel %vm2447_vm5, %v855_v44, %v859_v6  ;;  %v884_v62 = vrot.slane %v882_v21, 4  ;;  %v879_v5 = vrot.slane %v293_v63, 5 }
  0xec   : > { %1222 = vrot.lane.b32.xlu1 %v3033_v46, %s2338_s25  ;;  %v893_v43 = vrot.slane %v891_v25, 5  ;;  %v2213_v45 = vcombine.low %v860_v32, %v870_v59  ;;  %v913_v25 = vrot.slane %v296_v15, 5 }
  0xed   : > { %v1312_v53 = vpop.permute.xlu0 %1311 }
  0xee   : > { %v3064_v40 = vpop.permute.xlu1 %1025  ;;  %v1592_v14 = vsel %vm1580_vm15, %v1559_v2, %v1312_v53  ;;  %v887_v2 = vrot.slane %v885_v10, 5 }
  0xef   : > { %1255 = vrot.lane.b32.xlu0 %v2993_v47, %s2342_s29  ;;  %2267 = vmatmul.mubr.msk.bf16.gmra.mrb[8].mxu0 %vm1627_vm0, %v1592_v14  ;;  %v1357_v24 = vsel %vm1333_vm8, %v2619_v50, %v3064_v40 }
  0xf0   : > { %1257 = vrot.lane.b32.xlu1 %v3053_v58, %s2342_s29  ;;  %v888_v17 = vor.u32 %v887_v2, %v884_v62 }
  0xf1   : > { %v1104_v22 = vpop.permute.xlu0 %1103 }
  0xf2   : > { %v3080_v8 = vpop.permute.xlu1 %1105  ;;  %v889_v61 = vrot.slane %v888_v17, 4 }
  0xf3   : > { %1290 = vrot.lane.b32.xlu0 %v3013_v11, %s2343_s30  ;;  %v1398_v63 = vsel %vm1382_vm9, %v1357_v24, %v3080_v8 }
  0xf4   : > { %1292 = vrot.lane.b32.xlu1 %v3076_v7, %s2343_s30 }
  0xf5   : > { %v1139_v34 = vpop.permute.xlu0 %1138 }
  0xf6   : > { %v3091_v36 = vpop.permute.xlu1 %1140 }
  0xf7   : > { %1325 = vrot.lane.b32.xlu0 %v3033_v46, %s2344_s6  ;;  %v1431_v51 = vsel %vm1415_vm10, %v1398_v63, %v3091_v36  ;;  %v2215_v36 = vcombine.low %v3100_v16, %v3103_v56 }
  0xf8   : > { %1039 = vrot.lane.b32.xlu1 %v3013_v11, %s2340_s27  ;;  %v876_v11 = vrot.slane %v3057_v48, 5  ;;  %v897_v48 = vrot.slane %v895_v41, 4 }
  0xf9   : > { %v1174_v37 = vpop.permute.xlu0 %1173 }
  0xfa   : > { %v1176_v42 = vpop.permute.xlu1 %1175  ;;  %v878_v53 = vrot.slane %v876_v11, 4  ;;  %v877_v49 = vsel %vm2412_vm4, %v2162_v60, %v876_v11  ;;  %v898_v12 = vor.u32 %v897_v48, %v893_v43 }
  0xfb   : > { %1327 = vrot.lane.b32.xlu0 %v3095_v1, %s2344_s6 }
  0xfc   : > { %1041 = vrot.lane.b32.xlu1 %v3076_v7, %s2340_s27  ;;  %v880_v20 = vsel %vm2412_vm4, %v878_v53, %v879_v5  ;;  %v899_v38 = vrot.slane %v898_v12, 4 }
  0xfd   : > { %v1209_v4 = vpop.permute.xlu0 %1208 }
  0xfe   : > { %v1211_v9 = vpop.permute.xlu1 %1210  ;;  %v904_v21 = vsel %vm2447_vm5, %v899_v38, %v903_v23 }
  0xff   : > { %1119 = vrot.lane.b32.xlu0 %v3033_v46, %s2339_s26  ;;  %v1354_v46 = vsel %vm1333_vm8, %v2595_v29, %v3038_v27 }
 0x100   : > { %1121 = vrot.lane.b32.xlu1 %v3095_v1, %s2339_s26  ;;  %v1396_v19 = vsel %vm1382_vm9, %v1354_v46, %v1104_v22  ;;  %v2214_v22 = vcombine.low %v877_v49, %v880_v20 }
 0x101   : > { %v1244_v14 = vpop.permute.xlu0 %1243  ;;  %v1429_v28 = vsel %vm1415_vm10, %v1396_v19, %v1139_v34 }
 0x102   : > { %v1246_v55 = vpop.permute.xlu1 %1245  ;;  %v1462_v27 = vsel %vm1448_vm11, %v1429_v28, %v1174_v37  ;;  %v910_v37 = vrot.slane %v3103_v56, 5 }
 0x103   : > { %1154 = vrot.lane.b32.xlu0 %v3053_v58, %s2337_s24  ;;  %v1495_v54 = vsel %vm1481_vm12, %v1462_v27, %v1209_v4 }
 0x104   : > { %1156 = vrot.lane.b32.xlu1 %v2212_v31, %s2337_s24  ;;  %v1528_v34 = vsel %vm1514_vm13, %v1495_v54, %v1244_v14  ;;  %v912_v41 = vrot.slane %v910_v37, 4 }
 0x105   : > { %v1279_v29 = vpop.permute.xlu0 %1278 }
 0x106   : > { %v1281_v6 = vpop.permute.xlu1 %1280  ;;  %v1561_v50 = vsel %vm1547_vm14, %v1528_v34, %v1279_v29  ;;  %v914_v59 = vsel %vm2412_vm4, %v912_v41, %v913_v25 }
 0x107   : > { %1189 = vrot.lane.b32.xlu0 %v3076_v7, %s2341_s28  ;;  %v1464_v7 = vsel %vm1448_vm11, %v1431_v51, %v1176_v42  ;;  %v894_v42 = vsel %vm2447_vm5, %v889_v61, %v893_v43 }
 0x108   : > { %1191 = vrot.lane.b32.xlu1 %v2213_v45, %s2341_s28  ;;  %v1497_v8 = vsel %vm1481_vm12, %v1464_v7, %v1211_v9  ;;  %v2216_v56 = vcombine.low %v894_v42, %v904_v21 }
 0x109   : > { %v1314_v40 = vpop.permute.xlu0 %1313  ;;  %v1530_v39 = vsel %vm1514_vm13, %v1497_v8, %v1246_v55 }
 0x10a   : > { %v1028_v44 = vpop.permute.xlu1 %1027  ;;  %v1594_v33 = vsel %vm1580_vm15, %v1561_v50, %v1314_v40  ;;  %v1563_v10 = vsel %vm1547_vm14, %v1530_v39, %v1281_v6 }
 0x10b   : > { %1224 = vrot.lane.b32.xlu0 %v3095_v1, %s2338_s25  ;;  %2270 = vmatprep.mubr.msk.bf16.mxu0 %vm1627_vm0, %v1594_v33  ;;  %v2163_v1 = vrot.slane %v3100_v16, 9  ;;  %v1360_v13 = vsel %vm1333_vm8, %v2655_v30, %v1028_v44 }
 0x10c   : > { %1226 = vrot.lane.b32.xlu1 %v2214_v22, %s2338_s25 }
 0x10d   : > { %v1316_v11 = vpop.permute.xlu0 %1315  ;;  %v911_v52 = vsel %vm2412_vm4, %v2163_v1, %v910_v37 }
 0x10e   : > { %v1030_v4 = vpop.permute.xlu1 %1029  ;;  %v1596_v9 = vsel %vm1580_vm15, %v1563_v10, %v1316_v11  ;;  %v2217_v60 = vcombine.low %v911_v52, %v914_v59 }
 0x10f   : > { %1259 = vrot.lane.b32.xlu0 %v2212_v31, %s2342_s29  ;;  %2271 = vmatmul.mubr.msk.bf16.gmra.mrb[12].mxu0 %vm1627_vm0, %v1596_v9  ;;  %v1363_v17 = vsel %vm1333_vm8, %v2684_v57, %v1030_v4 }
 0x110   : > { %1261 = vrot.lane.b32.xlu1 %v2215_v36, %s2342_s29 }
 0x111   : > { %v1108_v32 = vpop.permute.xlu0 %1107 }
 0x112   : > { %v1110_v16 = vpop.permute.xlu1 %1109  ;;  %v1400_v15 = vsel %vm1382_vm9, %v1360_v13, %v1108_v32 }
 0x113   : > { %1294 = vrot.lane.b32.xlu0 %v2213_v45, %s2343_s30  ;;  %v1402_v20 = vsel %vm1382_vm9, %v1363_v17, %v1110_v16 }
 0x114   : > { %1296 = vrot.lane.b32.xlu1 %v2216_v56, %s2343_s30 }
 0x115   : > { %v1143_v62 = vpop.permute.xlu0 %1142 }
 0x116   : > { %v1145_v31 = vpop.permute.xlu1 %1144  ;;  %v1433_v55 = vsel %vm1415_vm10, %v1400_v15, %v1143_v62 }
 0x117   : > { %1329 = vrot.lane.b32.xlu0 %v2214_v22, %s2344_s6  ;;  %v1435_v26 = vsel %vm1415_vm10, %v1402_v20, %v1145_v31 }
 0x118   : > { %1331 = vrot.lane.b32.xlu1 %v2217_v60, %s2344_s6 }
 0x119   : > { %v1178_v2 = vpop.permute.xlu0 %1177 }
 0x11a   : > { %v1180_v53 = vpop.permute.xlu1 %1179  ;;  %v1466_v45 = vsel %vm1448_vm11, %v1433_v55, %v1178_v2 }
 0x11b   : > { %v1468_v29 = vsel %vm1448_vm11, %v1435_v26, %v1180_v53 }
 0x11d   : > { %v1213_v5 = vpop.permute.xlu0 %1212 }
 0x11e   : > { %v1215_v43 = vpop.permute.xlu1 %1214  ;;  %v1499_v19 = vsel %vm1481_vm12, %v1466_v45, %v1213_v5 }
 0x11f   : > { %v1501_v24 = vsel %vm1481_vm12, %v1468_v29, %v1215_v43 }
 0x121   : > { %v1248_v48 = vpop.permute.xlu0 %1247 }
 0x122   : > { %v1250_v14 = vpop.permute.xlu1 %1249  ;;  %v1532_v12 = vsel %vm1514_vm13, %v1499_v19, %v1248_v48 }
 0x123   : > { %v1534_v57 = vsel %vm1514_vm13, %v1501_v24, %v1250_v14 }
 0x125   : > { %v1283_v46 = vpop.permute.xlu0 %1282 }
 0x126   : > { %v1285_v49 = vpop.permute.xlu1 %1284  ;;  %v1565_v30 = vsel %vm1547_vm14, %v1532_v12, %v1283_v46 }
 0x127   : > { %v1567_v54 = vsel %vm1547_vm14, %v1534_v57, %v1285_v49 }
 0x129   : > { %v1318_v28 = vpop.permute.xlu0 %1317 }
 0x12a   : > { %v1032_v27 = vpop.permute.xlu1 %1031  ;;  %v1598_v6 = vsel %vm1580_vm15, %v1565_v30, %v1318_v28 }
 0x12b   : > { %2274 = vmatprep.mubr.msk.bf16.mxu1 %vm1627_vm0, %v1598_v6  ;;  %v1366_v8 = vsel %vm1333_vm8, %v2750_v18, %v1032_v27 }
 0x12d   : > { %v1320_v22 = vpop.permute.xlu0 %1319 }
 0x12e   : > { %v1034_v61 = vpop.permute.xlu1 %1033  ;;  %v1600_v63 = vsel %vm1580_vm15, %v1567_v54, %v1320_v22 }
 0x12f   : > { %2275 = vmatmul.mubr.msk.bf16.vlgmr.msra.gmra.mrb[0].mxu1 %vm1627_vm0, %v1600_v63  ;;  %v1369_v11 = vsel %vm1333_vm8, %v2804_v35, %v1034_v61 }
 0x131   : > { %v1112_v34 = vpop.permute.xlu0 %1111 }
 0x132   : > { %v1114_v38 = vpop.permute.xlu1 %1113  ;;  %v1404_v39 = vsel %vm1382_vm9, %v1366_v8, %v1112_v34  ;;  %v3245_v8 = vld [vmem:[%s3445_s2] ss:$0 sm:$0xff] }
 0x133   : > { %v1406_v41 = vsel %vm1382_vm9, %v1369_v11, %v1114_v38 }
 0x135   : > { %v1147_v23 = vpop.permute.xlu0 %1146 }
 0x136   : > { %v1149_v51 = vpop.permute.xlu1 %1148  ;;  %v1437_v36 = vsel %vm1415_vm10, %v1404_v39, %v1147_v23 }
 0x137   : > { %v1439_v4 = vsel %vm1415_vm10, %v1406_v41, %v1149_v51 }
 0x139   : > { %v1182_v50 = vpop.permute.xlu0 %1181 }
 0x13a   : > { %v1184_v40 = vpop.permute.xlu1 %1183  ;;  %v1470_v21 = vsel %vm1448_vm11, %v1437_v36, %v1182_v50 }
 0x13b   : > { %v1472_v56 = vsel %vm1448_vm11, %v1439_v4, %v1184_v40 }
 0x13d   : > { %v1217_v37 = vpop.permute.xlu0 %1216 }
 0x13e   : > { %v1219_v7 = vpop.permute.xlu1 %1218  ;;  %v1503_v1 = vsel %vm1481_vm12, %v1470_v21, %v1217_v37 }
 0x13f   : > { %v1505_v59 = vsel %vm1481_vm12, %v1472_v56, %v1219_v7 }
 0x141   : > { %v1252_v44 = vpop.permute.xlu0 %1251 }
 0x142   : > { %v1254_v33 = vpop.permute.xlu1 %1253  ;;  %v1536_v25 = vsel %vm1514_vm13, %v1503_v1, %v1252_v44 }
 0x143   : > { %v1538_v35 = vsel %vm1514_vm13, %v1505_v59, %v1254_v33 }
 0x145   : > { %v1287_v42 = vpop.permute.xlu0 %1286 }
 0x146   : > { %v1289_v10 = vpop.permute.xlu1 %1288  ;;  %v1569_v18 = vsel %vm1547_vm14, %v1536_v25, %v1287_v42 }
 0x147   : > { %v1571_v16 = vsel %vm1547_vm14, %v1538_v35, %v1289_v10 }
 0x149   : > { %v1322_v9 = vpop.permute.xlu0 %1321 }
 0x14a   : > { %v1036_v32 = vpop.permute.xlu1 %1035  ;;  %v1602_v52 = vsel %vm1580_vm15, %v1569_v18, %v1322_v9 }
 0x14b   : > { %2278 = vmatprep.mubr.msk.bf16.mxu1 %vm1627_vm0, %v1602_v52  ;;  %v1372_v45 = vsel %vm1333_vm8, %v2870_v3, %v1036_v32 }
 0x14d   : > { %v1324_v60 = vpop.permute.xlu0 %1323 }
 0x14e   : > { %v1038_v62 = vpop.permute.xlu1 %1037  ;;  %v1604_v31 = vsel %vm1580_vm15, %v1571_v16, %v1324_v60 }
 0x14f   : > { %2279 = vmatmul.mubr.msk.bf16.gmra.mrb[4].mxu1 %vm1627_vm0, %v1604_v31  ;;  %v1375_v26 = vsel %vm1333_vm8, %v2927_v0, %v1038_v62 }
 0x151   : > { %v1116_v2 = vpop.permute.xlu0 %1115 }
 0x152   : > { %v1118_v53 = vpop.permute.xlu1 %1117  ;;  %v1408_v49 = vsel %vm1382_vm9, %v1372_v45, %v1116_v2 }
 0x153   : > { %v1410_v28 = vsel %vm1382_vm9, %v1375_v26, %v1118_v53 }
 0x155   : > { %v1151_v5 = vpop.permute.xlu0 %1150 }
 0x156   : > { %v1153_v43 = vpop.permute.xlu1 %1152  ;;  %v1441_v17 = vsel %vm1415_vm10, %v1408_v49, %v1151_v5 }
 0x157   : > { %v1443_v27 = vsel %vm1415_vm10, %v1410_v28, %v1153_v43 }
 0x159   : > { %v1186_v48 = vpop.permute.xlu0 %1185 }
 0x15a   : > { %v1188_v14 = vpop.permute.xlu1 %1187  ;;  %v1474_v20 = vsel %vm1448_vm11, %v1441_v17, %v1186_v48 }
 0x15b   : > { %v1476_v24 = vsel %vm1448_vm11, %v1443_v27, %v1188_v14 }
 0x15d   : > { %v1221_v13 = vpop.permute.xlu0 %1220 }
 0x15e   : > { %v1223_v15 = vpop.permute.xlu1 %1222  ;;  %v1507_v30 = vsel %vm1481_vm12, %v1474_v20, %v1221_v13 }
 0x15f   : > { %v1509_v22 = vsel %vm1481_vm12, %v1476_v24, %v1223_v15 }
 0x161   : > { %v1256_v55 = vpop.permute.xlu0 %1255 }
 0x162   : > { %v1258_v46 = vpop.permute.xlu1 %1257  ;;  %v1540_v29 = vsel %vm1514_vm13, %v1507_v30, %v1256_v55 }
 0x163   : > { %v1542_v0 = vsel %vm1514_vm13, %v1509_v22, %v1258_v46 }
 0x165   : > { %v1291_v19 = vpop.permute.xlu0 %1290 }
 0x166   : > { %v1293_v12 = vpop.permute.xlu1 %1292  ;;  %v1573_v3 = vsel %vm1547_vm14, %v1540_v29, %v1291_v19 }
 0x167   : > { %v1575_v61 = vsel %vm1547_vm14, %v1542_v0, %v1293_v12 }
 0x169   : > { %v1326_v6 = vpop.permute.xlu0 %1325 }
 0x16a   : > { %v1040_v57 = vpop.permute.xlu1 %1039  ;;  %v1606_v54 = vsel %vm1580_vm15, %v1573_v3, %v1326_v6 }
 0x16b   : > { %2282 = vmatprep.mubr.msk.bf16.mxu1 %vm1627_vm0, %v1606_v54  ;;  %v1378_v36 = vsel %vm1333_vm8, %v2993_v47, %v1040_v57 }
 0x16d   : > { %v1328_v63 = vpop.permute.xlu0 %1327 }
 0x16e   : > { %v1042_v34 = vpop.permute.xlu1 %1041  ;;  %v1608_v38 = vsel %vm1580_vm15, %v1575_v61, %v1328_v63 }
 0x16f   : > { %2283 = vmatmul.mubr.msk.bf16.gmra.mrb[8].mxu1 %vm1627_vm0, %v1608_v38  ;;  %v1381_v42 = vsel %vm1333_vm8, %v3053_v58, %v1042_v34 }
 0x171   : > { %v1120_v23 = vpop.permute.xlu0 %1119 }
 0x172   : > { %v1122_v51 = vpop.permute.xlu1 %1121  ;;  %v1412_v1 = vsel %vm1382_vm9, %v1378_v36, %v1120_v23 }
 0x173   : > { %v1414_v11 = vsel %vm1382_vm9, %v1381_v42, %v1122_v51 }
 0x175   : > { %v1155_v50 = vpop.permute.xlu0 %1154 }
 0x176   : > { %v1157_v40 = vpop.permute.xlu1 %1156  ;;  %v1445_v58 = vsel %vm1415_vm10, %v1412_v1, %v1155_v50 }
 0x177   : > { %v1447_v47 = vsel %vm1415_vm10, %v1414_v11, %v1157_v40 }
 0x179   : > { %v1190_v37 = vpop.permute.xlu0 %1189 }
 0x17a   : > { %v1192_v7 = vpop.permute.xlu1 %1191  ;;  %v1478_v56 = vsel %vm1448_vm11, %v1445_v58, %v1190_v37 }
 0x17b   : > { %v1480_v9 = vsel %vm1448_vm11, %v1447_v47, %v1192_v7 }
 0x17d   : > { %v1225_v44 = vpop.permute.xlu0 %1224 }
 0x17e   : > { %v1227_v33 = vpop.permute.xlu1 %1226  ;;  %v1511_v16 = vsel %vm1481_vm12, %v1478_v56, %v1225_v44 }
 0x17f   : > { %v1513_v35 = vsel %vm1481_vm12, %v1480_v9, %v1227_v33 }
 0x181   : > { %v1260_v39 = vpop.permute.xlu0 %1259 }
 0x182   : > { %v1262_v21 = vpop.permute.xlu1 %1261  ;;  %v2260_v10 = vpop.f32.mrb[0].mxu0  ;;  %v1544_v53 = vsel %vm1514_vm13, %v1511_v16, %v1260_v39 }
 0x183   : > { %v1710_v41 = vadd.f32 %v2260_v10, %v3245_v8  ;;  %v1701_v25 = vpop.f32.mrb[1].mxu0  ;;  %v1546_v2 = vsel %vm1514_vm13, %v1513_v35, %v1262_v21 }
 0x184   : > { %v1702_v4 = vadd.f32 %v3245_v8, %v1701_v25  ;;  %v2261_v18 = vpop.f32.mrb[2].mxu0 }
 0x185   : > { %1830 = vst.msk [vmem:[%s3254_s14 + $0x10] sm:$0xff] %vm1580_vm15, %v1710_v41  ;;  %v1713_v32 = vadd.f32 %v2261_v18, %v3245_v8  ;;  %v1704_v52 = vpop.f32.mrb[3].mxu0  ;;  %v1295_v59 = vpop.permute.xlu0 %1294  ;;  %v1933_v5 = vmul.f32 %v1710_v41, %v1710_v41  ;;  %v1863_v13 = vsel %vm1580_vm15, %v1710_v41, 0.0 }
 0x186   : > { %1828 = vst.msk [vmem:[%s3254_s14] sm:$0xff] %vm1580_vm15, %v1702_v4  ;;  %v1931_v60 = vmul.f32 %v1702_v4, %v1702_v4  ;;  %v1297_v62 = vpop.permute.xlu1 %1296  ;;  %v1705_v31 = vadd.f32 %v3245_v8, %v1704_v52  ;;  %v1860_v43 = vsel %vm1580_vm15, %v1702_v4, 0.0  ;;  %v1577_v46 = vsel %vm1547_vm14, %v1544_v53, %v1295_v59 }
 0x187   : > { %1831 = vst.msk [vmem:[%s3254_s14 + $0x18] sm:$0xff] %vm1580_vm15, %v1713_v32  ;;  %v1934_v15 = vmul.f32 %v1713_v32, %v1713_v32  ;;  %v1579_v17 = vsel %vm1547_vm14, %v1546_v2, %v1297_v62  ;;  %v1966_v29 = vsel %vm1580_vm15, %v1933_v5, 0.0  ;;  %v1865_v27 = vsel %vm1580_vm15, %v1713_v32, 0.0 }
 0x188   : > { %1829 = vst.msk [vmem:[%s3254_s14 + $0x8] sm:$0xff] %vm1580_vm15, %v1705_v31  ;;  %v1861_v48 = vsel %vm1580_vm15, %v1705_v31, 0.0  ;;  %v1932_v14 = vmul.f32 %v1705_v31, %v1705_v31  ;;  %v1963_v49 = vsel %vm1580_vm15, %v1931_v60, 0.0 }
 0x189   : > { %v1862_v55 = vadd.f32 %v1861_v48, %v1860_v43  ;;  %v1330_v45 = vpop.permute.xlu0 %1329  ;;  %v1968_v24 = vsel %vm1580_vm15, %v1934_v15, 0.0 }
 0x18a   : > { %v1964_v19 = vsel %vm1580_vm15, %v1932_v14, 0.0  ;;  %v1332_v20 = vpop.permute.xlu1 %1331  ;;  %v1610_v12 = vsel %vm1580_vm15, %v1577_v46, %v1330_v45 }
 0x18b   : > { %v1864_v26 = vadd.f32 %v1863_v13, %v1862_v55  ;;  %v1965_v30 = vadd.f32 %v1964_v19, %v1963_v49  ;;  %v1612_v28 = vsel %vm1580_vm15, %v1579_v17, %v1332_v20  ;;  %2286 = vmatprep.mubr.msk.bf16.mxu1 %vm1627_vm0, %v1610_v12 }
 0x18c   : > { %2287 = vmatmul.mubr.msk.bf16.gmra.mrb[12].mxu1 %vm1627_vm0, %v1612_v28 }
 0x18d   : > { %v1967_v3 = vadd.f32 %v1966_v29, %v1965_v30  ;;  %v1866_v6 = vadd.f32 %v1865_v27, %v1864_v26 }
 0x18f   : > { %v1969_v57 = vadd.f32 %v1968_v24, %v1967_v3 }
 0x1a2   : > { %v2264_v54 = vpop.f32.mrb[4].mxu0 }
 0x1a3   : > { %v1726_v22 = vadd.f32 %v2264_v54, %v3245_v8  ;;  %v1717_v0 = vpop.f32.mrb[5].mxu0 }
 0x1a4   : > { %v1718_v61 = vadd.f32 %v3245_v8, %v1717_v0  ;;  %v2265_v63 = vpop.f32.mrb[6].mxu0 }
 0x1a5   : > { %1834 = vst.msk [vmem:[%s3254_s14 + $0x30] sm:$0xff] %vm1580_vm15, %v1726_v22  ;;  %v1729_v34 = vadd.f32 %v2265_v63, %v3245_v8  ;;  %v1720_v38 = vpop.f32.mrb[7].mxu0  ;;  %v1937_v37 = vmul.f32 %v1726_v22, %v1726_v22  ;;  %v1871_v42 = vsel %vm1580_vm15, %v1726_v22, 0.0 }
 0x1a6   : > { %1832 = vst.msk [vmem:[%s3254_s14 + $0x20] sm:$0xff] %vm1580_vm15, %v1718_v61  ;;  %v1867_v23 = vsel %vm1580_vm15, %v1718_v61, 0.0  ;;  %v1935_v51 = vmul.f32 %v1718_v61, %v1718_v61  ;;  %v1721_v50 = vadd.f32 %v3245_v8, %v1720_v38 }
 0x1a7   : > { %v1868_v40 = vadd.f32 %v1867_v23, %v1866_v6  ;;  %1835 = vst.msk [vmem:[%s3254_s14 + $0x38] sm:$0xff] %vm1580_vm15, %v1729_v34  ;;  %v1938_v21 = vmul.f32 %v1729_v34, %v1729_v34  ;;  %v1974_v41 = vsel %vm1580_vm15, %v1937_v37, 0.0  ;;  %v1873_v25 = vsel %vm1580_vm15, %v1729_v34, 0.0 }
 0x1a8   : > { %v1970_v7 = vsel %vm1580_vm15, %v1935_v51, 0.0  ;;  %1833 = vst.msk [vmem:[%s3254_s14 + $0x28] sm:$0xff] %vm1580_vm15, %v1721_v50  ;;  %v1869_v44 = vsel %vm1580_vm15, %v1721_v50, 0.0  ;;  %v1936_v33 = vmul.f32 %v1721_v50, %v1721_v50 }
 0x1a9   : > { %v1971_v39 = vadd.f32 %v1970_v7, %v1969_v57  ;;  %v1870_v36 = vadd.f32 %v1869_v44, %v1868_v40  ;;  %v1976_v4 = vsel %vm1580_vm15, %v1938_v21, 0.0 }
 0x1aa   : > { %v1972_v10 = vsel %vm1580_vm15, %v1936_v33, 0.0 }
 0x1ab   : > { %v1872_v11 = vadd.f32 %v1871_v42, %v1870_v36  ;;  %v1973_v1 = vadd.f32 %v1972_v10, %v1971_v39 }
 0x1ad   : > { %v1975_v47 = vadd.f32 %v1974_v41, %v1973_v1  ;;  %v1874_v58 = vadd.f32 %v1873_v25, %v1872_v11 }
 0x1af   : > { %v1977_v18 = vadd.f32 %v1976_v4, %v1975_v47 }
 0x1c2   : > { %v2268_v9 = vpop.f32.mrb[8].mxu0 }
 0x1c3   : > { %v1742_v56 = vadd.f32 %v2268_v9, %v3245_v8  ;;  %v1733_v32 = vpop.f32.mrb[9].mxu0 }
 0x1c4   : > { %v1734_v52 = vadd.f32 %v3245_v8, %v1733_v32  ;;  %v2269_v59 = vpop.f32.mrb[10].mxu0 }
 0x1c5   : > { %1838 = vst.msk [vmem:[%s3254_s14 + $0x50] sm:$0xff] %vm1580_vm15, %v1742_v56  ;;  %v1745_v35 = vadd.f32 %v2269_v59, %v3245_v8  ;;  %v1736_v16 = vpop.f32.mrb[11].mxu0  ;;  %v1941_v53 = vmul.f32 %v1742_v56, %v1742_v56  ;;  %v1879_v15 = vsel %vm1580_vm15, %v1742_v56, 0.0 }
 0x1c6   : > { %1836 = vst.msk [vmem:[%s3254_s14 + $0x40] sm:$0xff] %vm1580_vm15, %v1734_v52  ;;  %v1875_v60 = vsel %vm1580_vm15, %v1734_v52, 0.0  ;;  %v1939_v62 = vmul.f32 %v1734_v52, %v1734_v52  ;;  %v1737_v31 = vadd.f32 %v3245_v8, %v1736_v16 }
 0x1c7   : > { %v1876_v2 = vadd.f32 %v1875_v60, %v1874_v58  ;;  %1839 = vst.msk [vmem:[%s3254_s14 + $0x58] sm:$0xff] %vm1580_vm15, %v1745_v35  ;;  %v1942_v55 = vmul.f32 %v1745_v35, %v1745_v35  ;;  %v1982_v17 = vsel %vm1580_vm15, %v1941_v53, 0.0  ;;  %v1881_v19 = vsel %vm1580_vm15, %v1745_v35, 0.0 }
 0x1c8   : > { %v1978_v5 = vsel %vm1580_vm15, %v1939_v62, 0.0  ;;  %1837 = vst.msk [vmem:[%s3254_s14 + $0x48] sm:$0xff] %vm1580_vm15, %v1737_v31  ;;  %v1877_v43 = vsel %vm1580_vm15, %v1737_v31, 0.0  ;;  %v1940_v48 = vmul.f32 %v1737_v31, %v1737_v31 }
 0x1c9   : > { %v1979_v14 = vadd.f32 %v1978_v5, %v1977_v18  ;;  %v1878_v13 = vadd.f32 %v1877_v43, %v1876_v2  ;;  %v1984_v26 = vsel %vm1580_vm15, %v1942_v55, 0.0 }
 0x1ca   : > { %v1980_v46 = vsel %vm1580_vm15, %v1940_v48, 0.0 }
 0x1cb   : > { %v1880_v45 = vadd.f32 %v1879_v15, %v1878_v13  ;;  %v1981_v49 = vadd.f32 %v1980_v46, %v1979_v14 }
 0x1cd   : > { %v1983_v20 = vadd.f32 %v1982_v17, %v1981_v49  ;;  %v1882_v12 = vadd.f32 %v1881_v19, %v1880_v45 }
 0x1cf   : > { %v1985_v30 = vadd.f32 %v1984_v26, %v1983_v20 }
 0x1e2   : > { %v2272_v28 = vpop.f32.mrb[12].mxu0 }
 0x1e3   : > { %v1758_v29 = vadd.f32 %v2272_v28, %v3245_v8  ;;  %v1749_v27 = vpop.f32.mrb[13].mxu0 }
 0x1e4   : > { %v1750_v3 = vadd.f32 %v3245_v8, %v1749_v27  ;;  %v2273_v6 = vpop.f32.mrb[14].mxu0 }
 0x1e5   : > { %1842 = vst.msk [vmem:[%s3254_s14 + $0x70] sm:$0xff] %vm1580_vm15, %v1758_v29  ;;  %v1761_v24 = vadd.f32 %v2273_v6, %v3245_v8  ;;  %v1752_v57 = vpop.f32.mrb[15].mxu0  ;;  %v1945_v63 = vmul.f32 %v1758_v29, %v1758_v29  ;;  %v1887_v40 = vsel %vm1580_vm15, %v1758_v29, 0.0 }
 0x1e6   : > { %1840 = vst.msk [vmem:[%s3254_s14 + $0x60] sm:$0xff] %vm1580_vm15, %v1750_v3  ;;  %v1883_v54 = vsel %vm1580_vm15, %v1750_v3, 0.0  ;;  %v1943_v22 = vmul.f32 %v1750_v3, %v1750_v3  ;;  %v1753_v0 = vadd.f32 %v3245_v8, %v1752_v57 }
 0x1e7   : > { %v1884_v61 = vadd.f32 %v1883_v54, %v1882_v12  ;;  %1843 = vst.msk [vmem:[%s3254_s14 + $0x78] sm:$0xff] %vm1580_vm15, %v1761_v24  ;;  %v1946_v37 = vmul.f32 %v1761_v24, %v1761_v24  ;;  %v1990_v39 = vsel %vm1580_vm15, %v1945_v63, 0.0  ;;  %v1889_v36 = vsel %vm1580_vm15, %v1761_v24, 0.0 }
 0x1e8   : > { %v1986_v34 = vsel %vm1580_vm15, %v1943_v22, 0.0  ;;  %1841 = vst.msk [vmem:[%s3254_s14 + $0x68] sm:$0xff] %vm1580_vm15, %v1753_v0  ;;  %v1885_v38 = vsel %vm1580_vm15, %v1753_v0, 0.0  ;;  %v1944_v23 = vmul.f32 %v1753_v0, %v1753_v0 }
 0x1e9   : > { %v1987_v51 = vadd.f32 %v1986_v34, %v1985_v30  ;;  %v1886_v50 = vadd.f32 %v1885_v38, %v1884_v61  ;;  %v1992_v10 = vsel %vm1580_vm15, %v1946_v37, 0.0 }
 0x1ea   : > { %v1988_v7 = vsel %vm1580_vm15, %v1944_v23, 0.0 }
 0x1eb   : > { %v1888_v44 = vadd.f32 %v1887_v40, %v1886_v50  ;;  %v1989_v33 = vadd.f32 %v1988_v7, %v1987_v51 }
 0x1ed   : > { %v1991_v42 = vadd.f32 %v1990_v39, %v1989_v33  ;;  %v1890_v21 = vadd.f32 %v1889_v36, %v1888_v44 }
 0x1ef   : > { %v1993_v11 = vadd.f32 %v1992_v10, %v1991_v42 }
 0x202   : > { %v2276_v1 = vpop.f32.mrb[0].mxu1 }
 0x203   : > { %v1774_v41 = vadd.f32 %v2276_v1, %v3245_v8  ;;  %v1765_v25 = vpop.f32.mrb[1].mxu1 }
 0x204   : > { %v1766_v47 = vadd.f32 %v3245_v8, %v1765_v25  ;;  %v2277_v58 = vpop.f32.mrb[2].mxu1 }
 0x205   : > { %1846 = vst.msk [vmem:[%s3254_s14 + $0x90] sm:$0xff] %vm1580_vm15, %v1774_v41  ;;  %v1777_v4 = vadd.f32 %v2277_v58, %v3245_v8  ;;  %v1768_v18 = vpop.f32.mrb[3].mxu1  ;;  %v1949_v59 = vmul.f32 %v1774_v41, %v1774_v41  ;;  %v1895_v2 = vsel %vm1580_vm15, %v1774_v41, 0.0 }
 0x206   : > { %1844 = vst.msk [vmem:[%s3254_s14 + $0x80] sm:$0xff] %vm1580_vm15, %v1766_v47  ;;  %v1891_v9 = vsel %vm1580_vm15, %v1766_v47, 0.0  ;;  %v1947_v56 = vmul.f32 %v1766_v47, %v1766_v47  ;;  %v1769_v32 = vadd.f32 %v3245_v8, %v1768_v18 }
 0x207   : > { %v1892_v52 = vadd.f32 %v1891_v9, %v1890_v21  ;;  %1847 = vst.msk [vmem:[%s3254_s14 + $0x98] sm:$0xff] %vm1580_vm15, %v1777_v4  ;;  %v1950_v53 = vmul.f32 %v1777_v4, %v1777_v4  ;;  %v1998_v14 = vsel %vm1580_vm15, %v1949_v59, 0.0  ;;  %v1897_v13 = vsel %vm1580_vm15, %v1777_v4, 0.0 }
 0x208   : > { %v1994_v35 = vsel %vm1580_vm15, %v1947_v56, 0.0  ;;  %1845 = vst.msk [vmem:[%s3254_s14 + $0x88] sm:$0xff] %vm1580_vm15, %v1769_v32  ;;  %v1893_v16 = vsel %vm1580_vm15, %v1769_v32, 0.0  ;;  %v1948_v60 = vmul.f32 %v1769_v32, %v1769_v32 }
 0x209   : > { %v1995_v62 = vadd.f32 %v1994_v35, %v1993_v11  ;;  %v1894_v31 = vadd.f32 %v1893_v16, %v1892_v52  ;;  %v2000_v46 = vsel %vm1580_vm15, %v1950_v53, 0.0 }
 0x20a   : > { %v1996_v5 = vsel %vm1580_vm15, %v1948_v60, 0.0 }
 0x20b   : > { %v1896_v43 = vadd.f32 %v1895_v2, %v1894_v31  ;;  %v1997_v48 = vadd.f32 %v1996_v5, %v1995_v62 }
 0x20d   : > { %v1999_v15 = vadd.f32 %v1998_v14, %v1997_v48  ;;  %v1898_v55 = vadd.f32 %v1897_v13, %v1896_v43 }
 0x20f   : > { %v2001_v45 = vadd.f32 %v2000_v46, %v1999_v15 }
 0x222   : > { %v2280_v49 = vpop.f32.mrb[4].mxu1 }
 0x223   : > { %v1790_v17 = vadd.f32 %v2280_v49, %v3245_v8  ;;  %v1781_v19 = vpop.f32.mrb[5].mxu1 }
 0x224   : > { %v1782_v20 = vadd.f32 %v3245_v8, %v1781_v19  ;;  %v2281_v12 = vpop.f32.mrb[6].mxu1 }
 0x225   : > { %1850 = vst.msk [vmem:[%s3254_s14 + $0xb0] sm:$0xff] %vm1580_vm15, %v1790_v17  ;;  %v1793_v26 = vadd.f32 %v2281_v12, %v3245_v8  ;;  %v1784_v30 = vpop.f32.mrb[7].mxu1  ;;  %v1953_v6 = vmul.f32 %v1790_v17, %v1790_v17  ;;  %v1903_v61 = vsel %vm1580_vm15, %v1790_v17, 0.0 }
 0x226   : > { %1848 = vst.msk [vmem:[%s3254_s14 + $0xa0] sm:$0xff] %vm1580_vm15, %v1782_v20  ;;  %v1899_v28 = vsel %vm1580_vm15, %v1782_v20, 0.0  ;;  %v1951_v29 = vmul.f32 %v1782_v20, %v1782_v20  ;;  %v1785_v27 = vadd.f32 %v3245_v8, %v1784_v30 }
 0x227   : > { %v1900_v3 = vadd.f32 %v1899_v28, %v1898_v55  ;;  %1851 = vst.msk [vmem:[%s3254_s14 + $0xb8] sm:$0xff] %vm1580_vm15, %v1793_v26  ;;  %v1954_v63 = vmul.f32 %v1793_v26, %v1793_v26  ;;  %v2006_v51 = vsel %vm1580_vm15, %v1953_v6, 0.0  ;;  %v1905_v50 = vsel %vm1580_vm15, %v1793_v26, 0.0 }
 0x228   : > { %v2002_v24 = vsel %vm1580_vm15, %v1951_v29, 0.0  ;;  %1849 = vst.msk [vmem:[%s3254_s14 + $0xa8] sm:$0xff] %vm1580_vm15, %v1785_v27  ;;  %v1901_v57 = vsel %vm1580_vm15, %v1785_v27, 0.0  ;;  %v1952_v54 = vmul.f32 %v1785_v27, %v1785_v27 }
 0x229   : > { %v2003_v22 = vadd.f32 %v2002_v24, %v2001_v45  ;;  %v1902_v0 = vadd.f32 %v1901_v57, %v1900_v3  ;;  %v2008_v7 = vsel %vm1580_vm15, %v1954_v63, 0.0 }
 0x22a   : > { %v2004_v34 = vsel %vm1580_vm15, %v1952_v54, 0.0 }
 0x22b   : > { %v1904_v38 = vadd.f32 %v1903_v61, %v1902_v0  ;;  %v2005_v23 = vadd.f32 %v2004_v34, %v2003_v22 }
 0x22d   : > { %v2007_v40 = vadd.f32 %v2006_v51, %v2005_v23  ;;  %v1906_v37 = vadd.f32 %v1905_v50, %v1904_v38 }
 0x22f   : > { %v2009_v44 = vadd.f32 %v2008_v7, %v2007_v40 }
 0x242   : > { %v2284_v33 = vpop.f32.mrb[8].mxu1 }
 0x243   : > { %v1806_v39 = vadd.f32 %v2284_v33, %v3245_v8  ;;  %v1797_v36 = vpop.f32.mrb[9].mxu1 }
 0x244   : > { %v1798_v42 = vadd.f32 %v3245_v8, %v1797_v36  ;;  %v2285_v21 = vpop.f32.mrb[10].mxu1 }
 0x245   : > { %1854 = vst.msk [vmem:[%s3254_s14 + $0xd0] sm:$0xff] %vm1580_vm15, %v1806_v39  ;;  %v1809_v10 = vadd.f32 %v2285_v21, %v3245_v8  ;;  %v1800_v11 = vpop.f32.mrb[11].mxu1  ;;  %v1957_v58 = vmul.f32 %v1806_v39, %v1806_v39  ;;  %v1911_v52 = vsel %vm1580_vm15, %v1806_v39, 0.0 }
 0x246   : > { %1852 = vst.msk [vmem:[%s3254_s14 + $0xc0] sm:$0xff] %vm1580_vm15, %v1798_v42  ;;  %v1907_v1 = vsel %vm1580_vm15, %v1798_v42, 0.0  ;;  %v1955_v41 = vmul.f32 %v1798_v42, %v1798_v42  ;;  %v1801_v25 = vadd.f32 %v3245_v8, %v1800_v11 }
 0x247   : > { %v1908_v47 = vadd.f32 %v1907_v1, %v1906_v37  ;;  %1855 = vst.msk [vmem:[%s3254_s14 + $0xd8] sm:$0xff] %vm1580_vm15, %v1809_v10  ;;  %v1958_v59 = vmul.f32 %v1809_v10, %v1809_v10  ;;  %v2014_v62 = vsel %vm1580_vm15, %v1957_v58, 0.0  ;;  %v1913_v31 = vsel %vm1580_vm15, %v1809_v10, 0.0 }
 0x248   : > { %v2010_v4 = vsel %vm1580_vm15, %v1955_v41, 0.0  ;;  %1853 = vst.msk [vmem:[%s3254_s14 + $0xc8] sm:$0xff] %vm1580_vm15, %v1801_v25  ;;  %v1909_v18 = vsel %vm1580_vm15, %v1801_v25, 0.0  ;;  %v1956_v9 = vmul.f32 %v1801_v25, %v1801_v25 }
 0x249   : > { %v2011_v56 = vadd.f32 %v2010_v4, %v2009_v44  ;;  %v1910_v32 = vadd.f32 %v1909_v18, %v1908_v47  ;;  %v2016_v5 = vsel %vm1580_vm15, %v1958_v59, 0.0 }
 0x24a   : > { %v2012_v35 = vsel %vm1580_vm15, %v1956_v9, 0.0 }
 0x24b   : > { %v1912_v16 = vadd.f32 %v1911_v52, %v1910_v32  ;;  %v2013_v60 = vadd.f32 %v2012_v35, %v2011_v56 }
 0x24d   : > { %v2015_v2 = vadd.f32 %v2014_v62, %v2013_v60  ;;  %v1914_v53 = vadd.f32 %v1913_v31, %v1912_v16 }
 0x24f   : > { %v2017_v43 = vadd.f32 %v2016_v5, %v2015_v2 }
 0x25f   : > { %v2288_v48 = vpop.f32.mrb[12].mxu1 }
 0x260   : > { %v1822_v14 = vadd.f32 %v2288_v48, %v3245_v8  ;;  %v1813_v13 = vpop.f32.mrb[13].mxu1 }
 0x261   : > { %v1814_v15 = vadd.f32 %v3245_v8, %v1813_v13  ;;  %v2289_v55 = vpop.f32.mrb[14].mxu1 }
 0x262   : > { %1858 = vst.msk [vmem:[%s3254_s14 + $0xf0] sm:$0xff] %vm1580_vm15, %v1822_v14  ;;  %v1825_v46 = vadd.f32 %v2289_v55, %v3245_v8  ;;  %v1816_v45 = vpop.f32.mrb[15].mxu1  ;;  %v1961_v12 = vmul.f32 %v1822_v14, %v1822_v14  ;;  %v1919_v3 = vsel %vm1580_vm15, %v1822_v14, 0.0 }
 0x263   : > { %1856 = vst.msk [vmem:[%s3254_s14 + $0xe0] sm:$0xff] %vm1580_vm15, %v1814_v15  ;;  %v1915_v49 = vsel %vm1580_vm15, %v1814_v15, 0.0  ;;  %v1959_v17 = vmul.f32 %v1814_v15, %v1814_v15  ;;  %v1817_v19 = vadd.f32 %v3245_v8, %v1816_v45 }
 0x264   : > { %v1916_v20 = vadd.f32 %v1915_v49, %v1914_v53  ;;  %1859 = vst.msk [vmem:[%s3254_s14 + $0xf8] sm:$0xff] %vm1580_vm15, %v1825_v46  ;;  %v1962_v6 = vmul.f32 %v1825_v46, %v1825_v46  ;;  %v2022_v54 = vsel %vm1580_vm15, %v1961_v12, 0.0  ;;  %v1921_v22 = vsel %vm1580_vm15, %v1825_v46, 0.0 }
 0x265   : > { %v2018_v26 = vsel %vm1580_vm15, %v1959_v17, 0.0  ;;  %1857 = vst.msk [vmem:[%s3254_s14 + $0xe8] sm:$0xff] %vm1580_vm15, %v1817_v19  ;;  %v1917_v30 = vsel %vm1580_vm15, %v1817_v19, 0.0  ;;  %v1960_v28 = vmul.f32 %v1817_v19, %v1817_v19 }
 0x266   : > { %v2019_v29 = vadd.f32 %v2018_v26, %v2017_v43  ;;  %v1918_v27 = vadd.f32 %v1917_v30, %v1916_v20  ;;  %v2024_v63 = vsel %vm1580_vm15, %v1962_v6, 0.0 }
 0x267   : > { %v2020_v24 = vsel %vm1580_vm15, %v1960_v28, 0.0 }
 0x268   : > { %v1920_v57 = vadd.f32 %v1919_v3, %v1918_v27  ;;  %v2021_v8 = vadd.f32 %v2020_v24, %v2019_v29 }
 0x26a   : > { %v1922_v0 = vadd.f32 %v1921_v22, %v1920_v57  ;;  %v2023_v61 = vadd.f32 %v2022_v54, %v2021_v8 }
 0x26c   : > { %v1923_v34 = vrot.slane %v1922_v0, 4  ;;  %v2025_v38 = vadd.f32 %v2024_v63, %v2023_v61 }
 0x26e   : > { %v1924_v23 = vadd.f32 %v1923_v34, %v1922_v0  ;;  %v2026_v51 = vrot.slane %v2025_v38, 4 }
 0x270   : > { %v1925_v50 = vrot.slane %v1924_v23, 2  ;;  %v2027_v40 = vadd.f32 %v2026_v51, %v2025_v38 }
 0x272   : > { %v1926_v37 = vadd.f32 %v1925_v50, %v1924_v23  ;;  %v2028_v7 = vrot.slane %v2027_v40, 2 }
 0x274   : > { %v1927_v44 = vrot.slane %v1926_v37, 1  ;;  %v2029_v33 = vadd.f32 %v2028_v7, %v2027_v40 }
 0x276   : > { %v1928_v39 = vadd.f32 %v1927_v44, %v1926_v37  ;;  %v2030_v36 = vrot.slane %v2029_v33, 1 }
 0x278   : > { %1930 = vst.msk [vmem:[%s238_s17] sm:$0x1] %vm1929_vm1, %v1928_v39  ;;  %v2031_v42 = vadd.f32 %v2030_v36, %v2029_v33 }
 0x27a   : > { %2032 = vst.msk [vmem:[%s241_s22] sm:$0x1] %vm1929_vm1, %v2031_v42 }
 0x27b PF: > { %s16_s18 = sadd.s32 1, %s2335_s18  }
 0x27c   : > { %p13_p4 = scmp.ge.s32.totalorder %s16_s18, 8  }
 0x27e   :  { %15 = sbr.rel (!%p13_p4) target bundleno = 1 (0x1), region = 86 }

// kernel: tile.33
= control target key start
LH: loop header
LB: loop body
LE: loop exit
PB: predicated region body
PF: predicated region fallthrough
CT: control target
= control target key end

     0   :  { %s22_s0 = inlined_call_operand.vmem [shape: f32[16], index: 0, kind: input, shape index: {}]   ;;  %s23_s1 = inlined_call_operand.vmem [shape: f32[8,16], index: 1, kind: output, shape index: {}]  }
   0x1   :  { %v4_v0 = vld [vmem:[%s22_s0] ss:$0 sm:$0xff] }
   0x2   :  { %5 = vst [vmem:[%s23_s1] sm:$0xff] %v4_v0 }

// kernel: tile.34
= control target key start
LH: loop header
LB: loop body
LE: loop exit
PB: predicated region body
PF: predicated region fallthrough
CT: control target
= control target key end

     0   :  { %s67_s10 = smov 112   ;;  %s68_s11 = smov 80   ;;  %vm3_vm0 = vcmask 130048   ;;  %vm9_vm1 = vcmask 1048448   ;;  %vm15_vm2 = vcmask 917248   ;;  %vm21_vm3 = vcmask 786048   ;;  %s111_s0 = inlined_call_operand.vmem [shape: f32[8,16], index: 0, kind: input, shape index: {}]   ;;  %s112_s1 = inlined_call_operand.vmem [shape: f32[1,128], index: 1, kind: output, shape index: {}]  }
   0x1   :  { %v53_v0 = vld [vmem:[%s111_s0 + $0x7] sm:$0x1]   ;;  %v55_v1 = vld [vmem:[%s111_s0 + $0x5] sm:$0x1]   ;;  %v54_v2 = vld [vmem:[%s111_s0 + $0x6] sm:$0x1]  }
   0x2   :  { %7 = vrot.lane.b32.xlu0 %v53_v0, %s67_s10  ;;  %19 = vrot.lane.b32.xlu1 %v55_v1, %s68_s11  ;;  %v56_v3 = vld [vmem:[%s111_s0 + $0x4] sm:$0x1]   ;;  %v2_v4 = vld [vmem:[%s111_s0] sm:$0x1]   ;;  %s69_s18 = smov 96   ;;  %s70_s19 = smov 64  }
   0x3   :  { %4 = vst.msk [vmem:[#allocation0] sm:$0x1] %vm3_vm0, %v2_v4   ;;  %v57_v5 = vld [vmem:[%s111_s0 + $0x3] sm:$0x1]   ;;  %v58_v6 = vld [vmem:[%s111_s0 + $0x2] sm:$0x1]  }
   0x4   :  { %s71_s24 = smov 48   ;;  %s72_s25 = smov 32   ;;  %v59_v7 = vld [vmem:[%s111_s0 + $0x1] sm:$0x1]   ;;  %vm27_vm4 = vcmask 654848   ;;  %vm33_vm5 = vcmask 523648  }
   0x5   :  { %s73_s0 = smov 16   ;;  %vm39_vm6 = vcmask 392448   ;;  %vm45_vm7 = vcmask 261248  }
   0x6   :  { %13 = vrot.lane.b32.xlu0 %v54_v2, %s69_s18  ;;  %25 = vrot.lane.b32.xlu1 %v56_v3, %s70_s19 }
   0xa   :  { %31 = vrot.lane.b32.xlu0 %v57_v5, %s71_s24  ;;  %37 = vrot.lane.b32.xlu1 %v58_v6, %s72_s25 }
   0xe   :  { %43 = vrot.lane.b32.xlu0 %v59_v7, %s73_s0 }
  0x74   :  { %v8_v8 = vpop.permute.xlu0 %7   ;;  %v20_v9 = vpop.permute.xlu1 %19  }
  0x75   :  { %10 = vst.msk [vmem:[#allocation0] sm:$0x1] %vm9_vm1, %v8_v8  }
  0x78   :  { %v14_v10 = vpop.permute.xlu0 %13   ;;  %v26_v11 = vpop.permute.xlu1 %25  }
  0x79   :  { %16 = vst.msk [vmem:[#allocation0] sm:$0x1] %vm15_vm2, %v14_v10  }
  0x7a   :  { %22 = vst.msk [vmem:[#allocation0] sm:$0x1] %vm21_vm3, %v20_v9  }
  0x7b   :  { %28 = vst.msk [vmem:[#allocation0] sm:$0x1] %vm27_vm4, %v26_v11  }
  0x7c   :  { %v32_v12 = vpop.permute.xlu0 %31   ;;  %v38_v13 = vpop.permute.xlu1 %37  }
  0x7d   :  { %34 = vst.msk [vmem:[#allocation0] sm:$0x1] %vm33_vm5, %v32_v12  }
  0x7e   :  { %40 = vst.msk [vmem:[#allocation0] sm:$0x1] %vm39_vm6, %v38_v13  }
  0x80   :  { %v44_v14 = vpop.permute.xlu0 %43  }
  0x81   :  { %46 = vst.msk [vmem:[#allocation0] sm:$0x1] %vm45_vm7, %v44_v14  }
  0x88   :  { %v50_v15 = vld [vmem:[#allocation0] sm:$0x1] }
  0x89   :  { %52 = vst [vmem:[%s112_s1] sm:$0x1] %v50_v15 }

// kernel: cnn_rnn_forward.9
= control target key start
LH: loop header
LB: loop body
LE: loop exit
PB: predicated region body
PF: predicated region fallthrough
CT: control target
= control target key end

     0   :  { %s1127_s18 = smov 0   ;;  %s1449_s0 = inlined_call_operand.vmem [shape: bf16[6,10,10,8], index: 0, kind: input, shape index: {}]   ;;  %s1450_s1 = inlined_call_operand.vmem [shape: bf16[72,16], index: 1, kind: input, shape index: {}]   ;;  %s1451_s2 = inlined_call_operand.vmem [shape: f32[1,16], index: 2, kind: input, shape index: {}]   ;;  %s1452_s3 = inlined_call_operand.vmem [shape: f32[6,64,16], index: 3, kind: output, shape index: {0}]   ;;  %s1453_s4 = inlined_call_operand.vmem [shape: f32[6,1,16], index: 4, kind: output, shape index: {1}]   ;;  %s1454_s5 = inlined_call_operand.vmem [shape: f32[6,1,16], index: 5, kind: output, shape index: {2}]  }
   0x1 LB: > { %s953_s19 = sadd.s32 4294967295, %s1087_s18   ;;  %p957_p0 = scmp.ge.s32.totalorder %s1087_s18, 1  ;;  %s1087_s18 = sphi %s1127_s18, %s16_s18  }
   0x2   : > { %p192_p1 = scmp.lt.s32.totalorder %s1087_s18, 7 }
   0x4   : > { %p193_p2 = pnand %p957_p0, %p192_p1 }
   0x5   : > { %p226_p3 = scmp.lt.s32.totalorder (!%p193_p2), %s953_s19, 5  ;;  %vm394_vm0 = vcmask (!%p193_p2), 1042432   ;;  %vm395_vm1 = vcmask (!%p193_p2), 1046532   ;;  %vm263_vm3 = vsmask.f32 (!%p193_p2), 3328  ;;  %s1089_s24 = smov (!%p193_p2), 24  }
   0x6   : > { %196 = sbr.rel (%p193_p2) target bundleno = 445 (0x1bd), region = 32  ;;  %vm1143_vm2 = vmor (!%p193_p2), %vm394_vm0, %vm395_vm1  ;;  %vm264_vm4 = vsmask.f32 (!%p193_p2), 7440  ;;  %s1090_s25 = smov (!%p193_p2), 16   ;;  %v1076_v51 = vld [vmem:[%s1450_s1] sm:$0xff] (!%p193_p2)   ;;  %vm718_vm6 = vcmask (!%p193_p2), 1043456  }
   0x7   : > { %s1091_s26 = smov (!%p193_p2), 40   ;;  %vm1202_vm5 = vmor (!%p193_p2), %vm263_vm3, %vm264_vm4  ;;  %1020 = vmatprep.subr.bf16.mxu0 (!%p193_p2), %v1076_v51  ;;  %1038 = vmatprep.subr.bf16.mxu1 (!%p193_p2), %v1076_v51  ;;  %s1092_s8 = smov (!%p193_p2), 8   ;;  %vm590_vm7 = vcmask (!%p193_p2), 64512   ;;  %vm603_vm8 = vcmask (!%p193_p2), 130048   ;;  %vm612_vm9 = vcmask (!%p193_p2), 195584   ;;  %vm621_vm10 = vcmask (!%p193_p2), 261120  }
   0x8   : > { %1021 = vmatpush3.bf16.msra.mxu0 (!%p193_p2), %v1076_v51  ;;  %1043 = vmatpush3.bf16.msra.mxu1 (!%p193_p2), %v1076_v51  ;;  %s1093_s11 = smov (!%p193_p2), 32   ;;  %s1094_s12 = smov (!%p193_p2), 48   ;;  %vm630_vm11 = vcmask (!%p193_p2), 326656   ;;  %vm639_vm12 = vcmask (!%p193_p2), 392192   ;;  %vm648_vm13 = vcmask (!%p193_p2), 457728   ;;  %vm657_vm14 = vcmask (!%p193_p2), 523264  }
   0x9   : > { %s1095_s13 = smov (!%p193_p2), 56   ;;  %s1096_s16 = smov (!%p193_p2), 64   ;;  %vm709_vm15 = vcmask (!%p193_p2), 588800   ;;  %vm816_vm0 = vcmask (!%p193_p2), 122880  }
   0xd   : > { %s1460_s19 = smov (!%p226_p3, %s953_s19), 5 }
   0xe   : > { %s1050_s20 = smul.u32 80, %s1460_s19  ;;  %s1010_s17 = sshll.u32 %s1460_s19, 6 }
   0xf   : > { %s238_s27 = scalar_lea.vmem %s1453_s4, %s1460_s19  ;;  %s241_s30 = scalar_lea.vmem %s1454_s5, %s1460_s19 }
  0x10   : > { %s1141_s23 = scalar_lea.vmem %s1449_s0, %s1050_s20 }
  0x11   : > { %v1148_v1 = vld [vmem:[%s1141_s23 + $0x18] sm:$0xf]  ;;  %v1151_v2 = vld [vmem:[%s1141_s23 + $0x20] sm:$0xf]  ;;  %v1154_v3 = vld [vmem:[%s1141_s23 + $0x8] sm:$0xf] }
  0x12   : > { %v984_v4 = vcombine.low %v1148_v1, %v1151_v2  ;;  %v1159_v5 = vld [vmem:[%s1141_s23 + $0x10] sm:$0xf]  ;;  %v1162_v6 = vld [vmem:[%s1141_s23] sm:$0xf]  ;;  %v244_v7 = vld [vmem:[%s1141_s23 + $0x4] sm:$0x1] }
  0x13   : > { %v983_v8 = vcombine.low %v1154_v3, %v1159_v5  ;;  %v246_v9 = vld [vmem:[%s1141_s23 + $0xc] sm:$0x1]  ;;  %v961_v10 = vrot.slane %v1162_v6, 9  ;;  %v399_v11 = vrot.slane %v244_v7, 5  ;;  %v962_v12 = vrot.slane %v1154_v3, 9 }
  0x14   : > { %528 = vrot.lane.b32.xlu1 %v984_v4, %s1089_s24  ;;  %v403_v13 = vrot.slane %v246_v9, 5  ;;  %v248_v14 = vld [vmem:[%s1141_s23 + $0x14] sm:$0x1]  ;;  %v963_v15 = vrot.slane %v1159_v5, 9  ;;  %v1174_v16 = vld [vmem:[%s1141_s23 + $0x1c] sm:$0x1]  ;;  %v971_v17 = vcombine.low %v1162_v6, %v1154_v3 }
  0x15   : > { %526 = vrot.lane.b32.xlu0 %v983_v8, %s1089_s24  ;;  %v400_v18 = vsel %vm1143_vm2, %v961_v10, %v399_v11  ;;  %v407_v19 = vrot.slane %v248_v14, 5  ;;  %v964_v20 = vrot.slane %v1148_v1, 9  ;;  %v411_v21 = vrot.slane %v1174_v16, 5  ;;  %v252_v30 = vld [vmem:[%s1141_s23 + $0x24] sm:$0x1] }
  0x16   : > { %v404_v22 = vsel %vm1143_vm2, %v962_v12, %v403_v13  ;;  %v267_v23 = vshrl.u32 %v1162_v6, 16  ;;  %v270_v24 = vshll.u32 %v1162_v6, 16  ;;  %v276_v25 = vshll.u32 %v244_v7, 16  ;;  %v1225_v4 = vld [vmem:[%s1141_s23 + $0x28] sm:$0xf] }
  0x17   : > { %v979_v26 = vcombine.low %v400_v18, %v404_v22  ;;  %v408_v27 = vsel %vm1143_vm2, %v963_v15, %v407_v19  ;;  %v412_v28 = vsel %vm1143_vm2, %v964_v20, %v411_v21  ;;  %v281_v29 = vshrl.u32 %v1154_v3, 16  ;;  %v1077_v7 = vld [vmem:[%s1450_s1 + $0x8] sm:$0xff]  }
  0x18   : > { %v991_v31 = vcombine.low %v404_v22, %v408_v27  ;;  %v1193_v32 = vcombine.low %v408_v27, %v412_v28  ;;  %v269_v33 = vrot.slane %v267_v23, 4  ;;  %v272_v34 = vrot.slane %v270_v24, 5  ;;  %v1231_v11 = vld [vmem:[%s1141_s23 + $0x2c] sm:$0x1]  ;;  %1022 = vmatprep.subr.bf16.mxu0 %v1077_v7  ;;  %1039 = vmatprep.subr.bf16.mxu1 %v1077_v7  ;;  %v1078_v27 = vld [vmem:[%s1450_s1 + $0x10] sm:$0xff]  }
  0x19   : > { %513 = vrot.lane.b32.xlu1 %v979_v26, %s1090_s25  ;;  %v278_v35 = vrot.slane %v276_v25, 5  ;;  %v283_v36 = vrot.slane %v281_v29, 4  ;;  %v284_v37 = vshll.u32 %v1154_v3, 16  ;;  %v290_v38 = vshll.u32 %v246_v9, 16  ;;  %v1246_v26 = vld [vmem:[%s1141_s23 + $0x38] sm:$0xf]  ;;  %1023 = vmatpush3.bf16.msra.mxu0 %v1077_v7 }
  0x1a   : > { %552 = vrot.lane.b32.xlu0 %v991_v31, %s1091_s26  ;;  %v273_v39 = vor.u32 %v272_v34, %v269_v33  ;;  %v965_v40 = vrot.slane %v1151_v2, 9  ;;  %v415_v41 = vrot.slane %v252_v30, 5  ;;  %v295_v42 = vshrl.u32 %v1159_v5, 16  ;;  %1044 = vmatpush3.bf16.msra.mxu1 %v1077_v7 }
  0x1b   : > { %v286_v44 = vrot.slane %v284_v37, 5  ;;  %v298_v45 = vshll.u32 %v1159_v5, 16  ;;  %v304_v46 = vshll.u32 %v248_v14, 16  ;;  %v309_v50 = vshrl.u32 %v1148_v1, 16  ;;  %1024 = vmatprep.subr.bf16.mxu0 %v1078_v27  ;;  %1040 = vmatprep.subr.bf16.mxu1 %v1078_v27 }
  0x1c   : > { %v274_v47 = vrot.slane %v273_v39, 4  ;;  %v1209_v48 = vsel %vm1143_vm2, %v965_v40, %v415_v41  ;;  %v297_v49 = vrot.slane %v295_v42, 4  ;;  %v292_v53 = vrot.slane %v290_v38, 5 }
  0x1d   : > { %515 = vrot.lane.b32.xlu1 %v1193_v32, %s1090_s25  ;;  %v287_v52 = vor.u32 %v286_v44, %v283_v36  ;;  %v992_v54 = vcombine.low %v412_v28, %v1209_v48  ;;  %v300_v55 = vrot.slane %v298_v45, 5  ;;  %v311_v57 = vrot.slane %v309_v50, 4  ;;  %v256_v44 = vld [vmem:[%s1141_s23 + $0x34] sm:$0x1]  ;;  %1025 = vmatpush3.bf16.msra.mxu0 %v1078_v27 }
  0x1e   : > { %v279_v56 = vsel %vm1202_vm5, %v274_v47, %v278_v35  ;;  %v312_v58 = vshll.u32 %v1148_v1, 16  ;;  %v318_v59 = vshll.u32 %v1174_v16, 16  ;;  %v323_v62 = vshrl.u32 %v1151_v2, 16  ;;  %v1239_v16 = vld [vmem:[%s1141_s23 + $0x30] sm:$0xf]  ;;  %1045 = vmatpush3.bf16.msra.mxu1 %v1078_v27 }
  0x1f   : > { %v288_v60 = vrot.slane %v287_v52, 4  ;;  %v301_v61 = vor.u32 %v300_v55, %v297_v49  ;;  %v326_v63 = vshll.u32 %v1151_v2, 16  ;;  %v306_v8 = vrot.slane %v304_v46, 5  ;;  %v1079_v46 = vld [vmem:[%s1450_s1 + $0x18] sm:$0xff]  }
  0x20   : > { %v314_v9 = vrot.slane %v312_v58, 5  ;;  %v332_v10 = vshll.u32 %v252_v30, 16  ;;  %v325_v14 = vrot.slane %v323_v62, 4  ;;  %v320_v20 = vrot.slane %v318_v59, 5  ;;  %v258_v49 = vld [vmem:[%s1141_s23 + $0x3c] sm:$0x1]  ;;  %1026 = vmatprep.subr.bf16.mxu0 %v1079_v46  ;;  %1041 = vmatprep.subr.bf16.mxu1 %v1079_v46 }
  0x21   : > { %v1235_v12 = vsel %vm1202_vm5, %v288_v60, %v292_v53  ;;  %554 = vrot.lane.b32.xlu1 %v992_v54, %s1091_s26  ;;  %v302_v13 = vrot.slane %v301_v61, 4  ;;  %v328_v15 = vrot.slane %v326_v63, 5  ;;  %v337_v21 = vshrl.u32 %v1225_v4, 16  ;;  %1027 = vmatpush3.bf16.msra.mxu0 %v1079_v46  ;;  %v1279_v61 = vld [vmem:[%s1141_s23 + $0x40] sm:$0xf] }
  0x22   : > { %v975_v18 = vcombine.low %v279_v56, %v1235_v12  ;;  %v315_v19 = vor.u32 %v314_v9, %v311_v57  ;;  %v334_v23 = vrot.slane %v332_v10, 5  ;;  %v340_v24 = vshll.u32 %v1225_v4, 16  ;;  %1046 = vmatpush3.bf16.msra.mxu1 %v1079_v46 }
  0x23   : > { %v329_v22 = vor.u32 %v328_v15, %v325_v14  ;;  %v346_v25 = vshll.u32 %v1231_v11, 16  ;;  %v307_v28 = vsel %vm1202_vm5, %v302_v13, %v306_v8  ;;  %v339_v30 = vrot.slane %v337_v21, 4 }
  0x24   : > { %493 = vrot.lane.b32.xlu0 %v975_v18, %s1092_s8  ;;  %v316_v29 = vrot.slane %v315_v19, 4  ;;  %v351_v31 = vshrl.u32 %v1239_v16, 16  ;;  %v342_v34 = vrot.slane %v340_v24, 5  ;;  %v354_v35 = vshll.u32 %v1239_v16, 16 }
  0x25   : > { %v330_v33 = vrot.slane %v329_v22, 4  ;;  %v348_v37 = vrot.slane %v346_v25, 5  ;;  %v365_v39 = vshrl.u32 %v1246_v26, 16  ;;  %v368_v51 = vshll.u32 %v1246_v26, 16 }
  0x26   : > { %v321_v36 = vsel %vm1202_vm5, %v316_v29, %v320_v20  ;;  %v353_v38 = vrot.slane %v351_v31, 4  ;;  %v343_v42 = vor.u32 %v342_v34, %v339_v30  ;;  %v356_v45 = vrot.slane %v354_v35, 5  ;;  %v261_v31 = vld [vmem:[%s1141_s23 + $0x48] sm:$0xf] }
  0x27   : > { %v976_v40 = vcombine.low %v307_v28, %v321_v36  ;;  %v335_v41 = vsel %vm1202_vm5, %v330_v33, %v334_v23  ;;  %v367_v50 = vrot.slane %v365_v39, 4  ;;  %v987_v52 = vcombine.low %v1235_v12, %v307_v28  ;;  %v260_v23 = vld [vmem:[%s1141_s23 + $0x44] sm:$0x1] }
  0x28   : > { %v988_v47 = vcombine.low %v321_v36, %v335_v41  ;;  %v344_v53 = vrot.slane %v343_v42, 4  ;;  %v1272_v54 = vcombine.low %v1151_v2, %v1225_v4  ;;  %v357_v55 = vor.u32 %v356_v45, %v353_v38  ;;  %v262_v45 = vld [vmem:[%s1141_s23 + $0x4c] sm:$0x1] }
  0x29   : > { %495 = vrot.lane.b32.xlu0 %v976_v40, %s1092_s8  ;;  %v360_v56 = vshll.u32 %v256_v44, 16  ;;  %v370_v57 = vrot.slane %v368_v51, 5  ;;  %v374_v59 = vshll.u32 %v258_v49, 16  ;;  %v1284_v2 = vcombine.low %v1159_v5, %v1148_v1 }
  0x2a   : > { %541 = vrot.lane.b32.xlu1 %v988_v47, %s1093_s11  ;;  %v1276_v58 = vsel %vm1202_vm5, %v344_v53, %v348_v37  ;;  %v358_v63 = vrot.slane %v357_v55, 4  ;;  %v430_v10 = vshrl.u32 %v1279_v61, 16  ;;  %v433_v12 = vshll.u32 %v1279_v61, 16 }
  0x2b   : > { %v371_v60 = vor.u32 %v370_v57, %v367_v50  ;;  %v977_v62 = vcombine.low %v335_v41, %v1276_v58  ;;  %v362_v7 = vrot.slane %v360_v56, 5  ;;  %v376_v9 = vrot.slane %v374_v59, 5 }
  0x2c   : > { %v966_v1 = vrot.slane %v1225_v4, 9  ;;  %v419_v5 = vrot.slane %v1231_v11, 5  ;;  %v967_v14 = vrot.slane %v1239_v16, 9  ;;  %v423_v15 = vrot.slane %v256_v44, 5  ;;  %v1080_v11 = vld [vmem:[%s1450_s1 + $0x20] ss:$0 sps:$4 sm:$0xff]  }
  0x2d   : > { %539 = vrot.lane.b32.xlu0 %v987_v52, %s1093_s11  ;;  %v372_v8 = vrot.slane %v371_v60, 4  ;;  %v363_v13 = vsel %vm1202_vm5, %v358_v63, %v362_v7  ;;  %v968_v18 = vrot.slane %v1246_v26, 9  ;;  %v427_v20 = vrot.slane %v258_v49, 5  ;;  %1048 = vmatprep.subr.msk.bf16.mxu0 %vm718_vm6, %v1080_v11 }
  0x2e   : > { %564 = vrot.lane.b32.xlu1 %v1272_v54, %s1094_s12  ;;  %v432_v21 = vrot.slane %v430_v10, 4  ;;  %v435_v22 = vrot.slane %v433_v12, 5  ;;  %v420_v25 = vsel %vm1143_vm2, %v966_v1, %v419_v5  ;;  %v424_v27 = vsel %vm1143_vm2, %v967_v14, %v423_v15  ;;  %1049 = vmatprep.subr.msk.bf16.mxu1 %vm718_vm6, %v1080_v11 }
  0x2f   : > { %v377_v19 = vsel %vm1202_vm5, %v372_v8, %v376_v9  ;;  %v428_v28 = vsel %vm1143_vm2, %v968_v18, %v427_v20  ;;  %v439_v30 = vshll.u32 %v260_v23, 16  ;;  %v981_v33 = vcombine.low %v1209_v48, %v420_v25 }
  0x30   : > { %v978_v24 = vcombine.low %v363_v13, %v377_v19  ;;  %v436_v29 = vor.u32 %v435_v22, %v432_v21  ;;  %v720_v34 = vsel %vm718_vm6, %v1080_v11, 0  ;;  %v982_v35 = vcombine.low %v424_v27, %v428_v28 }
  0x31   : > { %562 = vrot.lane.b32.xlu0 %v1284_v2, %s1094_s12  ;;  %1029 = vmatpush3.bf16.msra.mxu0 %v720_v34  ;;  %v441_v37 = vrot.slane %v439_v30, 5  ;;  %v450_v38 = vshrl.u32 %v261_v31, 16  ;;  %v453_v39 = vshll.u32 %v261_v31, 16  ;;  %v969_v48 = vrot.slane %v1279_v61, 9 }
  0x32   : > { %574 = vrot.lane.b32.xlu1 %v977_v62, %s1095_s13  ;;  %v437_v36 = vrot.slane %v436_v29, 4  ;;  %1047 = vmatpush3.bf16.msra.mxu1 %v720_v34  ;;  %v447_v41 = vrot.slane %v260_v23, 5  ;;  %v985_v46 = vcombine.low %v1225_v4, %v1239_v16  ;;  %v459_v51 = vshll.u32 %v262_v45, 16 }
  0x33   : > { %v452_v42 = vrot.slane %v450_v38, 4  ;;  %v455_v44 = vrot.slane %v453_v39, 5  ;;  %v989_v52 = vcombine.low %v1276_v58, %v363_v13  ;;  %v993_v4 = vcombine.low %v420_v25, %v424_v27 }
  0x34   : > { %v448_v49 = vsel %vm1143_vm2, %v969_v48, %v447_v41  ;;  %v461_v56 = vrot.slane %v459_v51, 5  ;;  %v995_v57 = vcombine.low %v1279_v61, %v261_v31  ;;  %v970_v60 = vrot.slane %v261_v31, 9 }
  0x35   : > { %572 = vrot.lane.b32.xlu0 %v976_v40, %s1095_s13  ;;  %v442_v40 = vsel %vm1202_vm5, %v437_v36, %v441_v37  ;;  %v456_v50 = vor.u32 %v455_v44, %v452_v42  ;;  %v994_v53 = vcombine.low %v428_v28, %v448_v49  ;;  %v1344_v58 = vcombine.low %v1239_v16, %v1246_v26 }
  0x36   : > { %497 = vrot.lane.b32.xlu1 %v977_v62, %s1092_s8  ;;  %v990_v47 = vcombine.low %v377_v19, %v442_v40  ;;  %v467_v62 = vrot.slane %v262_v45, 5 }
  0x37   : > { %v457_v55 = vrot.slane %v456_v50, 4 }
  0x38   : > { %v468_v7 = vsel %vm1143_vm2, %v970_v60, %v467_v62 }
  0x39   : > { %582 = vrot.lane.b32.xlu0 %v1193_v32, %s1096_s16  ;;  %v986_v32 = vcombine.low %v1246_v26, %v1279_v61  ;;  %v462_v59 = vsel %vm1202_vm5, %v457_v55, %v461_v56  ;;  %v997_v43 = vcombine.low %v448_v49, %v468_v7 }
  0x3a   : > { %499 = vrot.lane.b32.xlu1 %v978_v24, %s1092_s8  ;;  %v996_v63 = vcombine.low %v442_v40, %v462_v59 }
  0x3d   : > { %584 = vrot.lane.b32.xlu0 %v981_v33, %s1096_s16 }
  0x3e   : > { %519 = vrot.lane.b32.xlu1 %v982_v35, %s1090_s25 }
  0x41   : > { %517 = vrot.lane.b32.xlu0 %v981_v33, %s1090_s25 }
  0x42   : > { %532 = vrot.lane.b32.xlu1 %v986_v32, %s1089_s24 }
  0x45   : > { %530 = vrot.lane.b32.xlu0 %v985_v46, %s1089_s24  ;;  %s1404_s24 = scalar_lea.vmem %s1452_s3, %s1010_s17 }
  0x46   : > { %545 = vrot.lane.b32.xlu1 %v990_v47, %s1093_s11 }
  0x49   : > { %543 = vrot.lane.b32.xlu0 %v989_v52, %s1093_s11 }
  0x4a   : > { %558 = vrot.lane.b32.xlu1 %v994_v53, %s1091_s26 }
  0x4d   : > { %556 = vrot.lane.b32.xlu0 %v993_v4, %s1091_s26 }
  0x4e   : > { %568 = vrot.lane.b32.xlu1 %v995_v57, %s1094_s12 }
  0x51   : > { %566 = vrot.lane.b32.xlu0 %v1344_v58, %s1094_s12 }
  0x52   : > { %578 = vrot.lane.b32.xlu1 %v996_v63, %s1095_s13 }
  0x55   : > { %576 = vrot.lane.b32.xlu0 %v978_v24, %s1095_s13 }
  0x56   : > { %588 = vrot.lane.b32.xlu1 %v997_v43, %s1096_s16 }
  0x59   : > { %586 = vrot.lane.b32.xlu0 %v982_v35, %s1096_s16 }
  0x86   : > { %v529_v16 = vpop.permute.xlu1 %528 }
  0x87   : > { %v527_v26 = vpop.permute.xlu0 %526 }
  0x8b   : > { %v514_v61 = vpop.permute.xlu1 %513 }
  0x8c   : > { %v553_v8 = vpop.permute.xlu0 %552 }
  0x8f   : > { %v516_v9 = vpop.permute.xlu1 %515 }
  0x93   : > { %v555_v0 = vpop.permute.xlu1 %554 }
  0x96   : > { %v494_v10 = vpop.permute.xlu0 %493 }
  0x97   : > { %v593_v5 = vsel %vm590_vm7, %v971_v17, %v494_v10 }
  0x98   : > { %v605_v18 = vsel %vm603_vm8, %v593_v5, %v514_v61 }
  0x99   : > { %v614_v22 = vsel %vm612_vm9, %v605_v18, %v527_v26 }
  0x9b   : > { %v496_v12 = vpop.permute.xlu0 %495 }
  0x9c   : > { %v542_v1 = vpop.permute.xlu1 %541  ;;  %v596_v15 = vsel %vm590_vm7, %v1284_v2, %v496_v12 }
  0x9d   : > { %v607_v20 = vsel %vm603_vm8, %v596_v15, %v516_v9 }
  0x9e   : > { %v616_v3 = vsel %vm612_vm9, %v607_v20, %v529_v16  ;;  %v998_v16 = vld [vmem:[%s1451_s2] ss:$0 sm:$0xff] }
  0x9f   : > { %v540_v13 = vpop.permute.xlu0 %539  ;;  %v625_v11 = vsel %vm621_vm10, %v616_v3, %v542_v1 }
  0xa0   : > { %v565_v14 = vpop.permute.xlu1 %564  ;;  %v623_v23 = vsel %vm621_vm10, %v614_v22, %v540_v13  ;;  %v634_v30 = vsel %vm630_vm11, %v625_v11, %v555_v0 }
  0xa1   : > { %v632_v2 = vsel %vm630_vm11, %v623_v23, %v553_v8  ;;  %v643_v31 = vsel %vm639_vm12, %v634_v30, %v565_v14 }
  0xa3   : > { %v563_v19 = vpop.permute.xlu0 %562 }
  0xa4   : > { %v575_v21 = vpop.permute.xlu1 %574  ;;  %v641_v24 = vsel %vm639_vm12, %v632_v2, %v563_v19 }
  0xa5   : > { %v652_v33 = vsel %vm648_vm13, %v643_v31, %v575_v21 }
  0xa7   : > { %v573_v6 = vpop.permute.xlu0 %572 }
  0xa8   : > { %v498_v17 = vpop.permute.xlu1 %497  ;;  %v650_v25 = vsel %vm648_vm13, %v641_v24, %v573_v6 }
  0xa9   : > { %v599_v47 = vsel %vm590_vm7, %v1272_v54, %v498_v17 }
  0xab   : > { %v583_v27 = vpop.permute.xlu0 %582 }
  0xac   : > { %v659_v28 = vsel %vm657_vm14, %v650_v25, %v583_v27  ;;  %v500_v29 = vpop.permute.xlu1 %499 }
  0xad   : > { %1030 = vmatprep.mubr.msk.bf16.mxu0 %vm709_vm15, %v659_v28  ;;  %v602_v45 = vsel %vm590_vm7, %v1344_v58, %v500_v29 }
  0xaf   : > { %v585_v34 = vpop.permute.xlu0 %584 }
  0xb0   : > { %v661_v35 = vsel %vm657_vm14, %v652_v33, %v585_v34  ;;  %v520_v36 = vpop.permute.xlu1 %519 }
  0xb1   : > { %1031 = vmatmul.mubr.msk.bf16.vlgmr.msra.gmra.mrb[0].mxu0 %vm709_vm15, %v661_v35  ;;  %v611_v50 = vsel %vm603_vm8, %v602_v45, %v520_v36 }
  0xb3   : > { %v518_v37 = vpop.permute.xlu0 %517 }
  0xb4   : > { %v533_v38 = vpop.permute.xlu1 %532  ;;  %v609_v49 = vsel %vm603_vm8, %v599_v47, %v518_v37 }
  0xb5   : > { %v620_v53 = vsel %vm612_vm9, %v611_v50, %v533_v38 }
  0xb7   : > { %v531_v39 = vpop.permute.xlu0 %530 }
  0xb8   : > { %v546_v32 = vpop.permute.xlu1 %545  ;;  %v618_v51 = vsel %vm612_vm9, %v609_v49, %v531_v39 }
  0xb9   : > { %v629_v56 = vsel %vm621_vm10, %v620_v53, %v546_v32 }
  0xbb   : > { %v544_v48 = vpop.permute.xlu0 %543 }
  0xbc   : > { %v559_v40 = vpop.permute.xlu1 %558  ;;  %v627_v55 = vsel %vm621_vm10, %v618_v51, %v544_v48 }
  0xbd   : > { %v638_v57 = vsel %vm630_vm11, %v629_v56, %v559_v40 }
  0xbf   : > { %v557_v41 = vpop.permute.xlu0 %556 }
  0xc0   : > { %v569_v42 = vpop.permute.xlu1 %568  ;;  %v636_v4 = vsel %vm630_vm11, %v627_v55, %v557_v41 }
  0xc1   : > { %v647_v60 = vsel %vm639_vm12, %v638_v57, %v569_v42 }
  0xc3   : > { %v567_v44 = vpop.permute.xlu0 %566 }
  0xc4   : > { %v579_v46 = vpop.permute.xlu1 %578  ;;  %v645_v54 = vsel %vm639_vm12, %v636_v4, %v567_v44 }
  0xc5   : > { %v656_v63 = vsel %vm648_vm13, %v647_v60, %v579_v46 }
  0xc7   : > { %v577_v52 = vpop.permute.xlu0 %576 }
  0xc8   : > { %v589_v59 = vpop.permute.xlu1 %588  ;;  %v654_v62 = vsel %vm648_vm13, %v645_v54, %v577_v52 }
  0xc9   : > { %v665_v43 = vsel %vm657_vm14, %v656_v63, %v589_v59 }
  0xcb   : > { %v587_v58 = vpop.permute.xlu0 %586 }
  0xcc   : > { %v663_v7 = vsel %vm657_vm14, %v654_v62, %v587_v58 }
  0xcd   : > { %1034 = vmatprep.mubr.msk.bf16.mxu1 %vm709_vm15, %v663_v7 }
  0xce   : > { %1035 = vmatmul.mubr.msk.bf16.vlgmr.msra.gmra.mrb[0].mxu1 %vm709_vm15, %v665_v43 }
 0x184   : > { %v1032_v26 = vpop.f32.mrb[0].mxu0 }
 0x185   : > { %v765_v61 = vadd.f32 %v1032_v26, %v998_v16  ;;  %v756_v8 = vpop.f32.mrb[1].mxu0 }
 0x186   : > { %v757_v9 = vadd.f32 %v998_v16, %v756_v8  ;;  %v1033_v10 = vpop.f32.mrb[2].mxu0 }
 0x187   : > { %789 = vst.msk [vmem:[%s1404_s24 + $0x10] sm:$0xff] %vm603_vm8, %v765_v61  ;;  %v768_v0 = vadd.f32 %v1033_v10, %v998_v16  ;;  %v759_v12 = vpop.f32.mrb[3].mxu0  ;;  %v820_v13 = vmul.f32 %v765_v61, %v765_v61  ;;  %v798_v20 = vsel %vm603_vm8, %v765_v61, 0.0 }
 0x188   : > { %787 = vst.msk [vmem:[%s1404_s24] sm:$0xff] %vm603_vm8, %v757_v9  ;;  %v818_v1 = vmul.f32 %v757_v9, %v757_v9  ;;  %v760_v5 = vadd.f32 %v998_v16, %v759_v12  ;;  %v795_v14 = vsel %vm603_vm8, %v757_v9, 0.0 }
 0x189   : > { %790 = vst.msk [vmem:[%s1404_s24 + $0x18] sm:$0xff] %vm603_vm8, %v768_v0  ;;  %v821_v22 = vmul.f32 %v768_v0, %v768_v0  ;;  %v829_v17 = vsel %vm603_vm8, %v820_v13, 0.0  ;;  %v800_v2 = vsel %vm603_vm8, %v768_v0, 0.0 }
 0x18a   : > { %788 = vst.msk [vmem:[%s1404_s24 + $0x8] sm:$0xff] %vm603_vm8, %v760_v5  ;;  %v796_v15 = vsel %vm603_vm8, %v760_v5, 0.0  ;;  %v819_v18 = vmul.f32 %v760_v5, %v760_v5  ;;  %v826_v21 = vsel %vm603_vm8, %v818_v1, 0.0 }
 0x18b   : > { %v797_v19 = vadd.f32 %v796_v15, %v795_v14  ;;  %v831_v25 = vsel %vm603_vm8, %v821_v22, 0.0 }
 0x18c   : > { %v827_v23 = vsel %vm603_vm8, %v819_v18, 0.0 }
 0x18d   : > { %v799_v3 = vadd.f32 %v798_v20, %v797_v19  ;;  %v828_v6 = vadd.f32 %v827_v23, %v826_v21 }
 0x18f   : > { %v830_v11 = vadd.f32 %v829_v17, %v828_v6  ;;  %v801_v24 = vadd.f32 %v800_v2, %v799_v3 }
 0x191   : > { %v832_v27 = vadd.f32 %v831_v25, %v830_v11 }
 0x1a1   : > { %v1036_v28 = vpop.f32.mrb[0].mxu1 }
 0x1a2   : > { %v781_v29 = vadd.f32 %v1036_v28, %v998_v16  ;;  %v772_v30 = vpop.f32.mrb[1].mxu1 }
 0x1a3   : > { %v773_v31 = vadd.f32 %v998_v16, %v772_v30  ;;  %v1037_v33 = vpop.f32.mrb[2].mxu1 }
 0x1a4   : > { %793 = vst.msk [vmem:[%s1404_s24 + $0x30] sm:$0xff] %vm603_vm8, %v781_v29  ;;  %v784_v34 = vadd.f32 %v1037_v33, %v998_v16  ;;  %v775_v35 = vpop.f32.mrb[3].mxu1  ;;  %v824_v32 = vmul.f32 %v781_v29, %v781_v29  ;;  %v806_v45 = vsel %vm603_vm8, %v781_v29, 0.0 }
 0x1a5   : > { %791 = vst.msk [vmem:[%s1404_s24 + $0x20] sm:$0xff] %vm603_vm8, %v773_v31  ;;  %v802_v36 = vsel %vm603_vm8, %v773_v31, 0.0  ;;  %v822_v37 = vmul.f32 %v773_v31, %v773_v31  ;;  %v776_v38 = vadd.f32 %v998_v16, %v775_v35 }
 0x1a6   : > { %v803_v39 = vadd.f32 %v802_v36, %v801_v24  ;;  %794 = vst.msk [vmem:[%s1404_s24 + $0x38] sm:$0xff] %vm603_vm8, %v784_v34  ;;  %v825_v46 = vmul.f32 %v784_v34, %v784_v34  ;;  %v837_v51 = vsel %vm603_vm8, %v824_v32, 0.0  ;;  %v808_v52 = vsel %vm603_vm8, %v784_v34, 0.0 }
 0x1a7   : > { %v833_v48 = vsel %vm603_vm8, %v822_v37, 0.0  ;;  %792 = vst.msk [vmem:[%s1404_s24 + $0x28] sm:$0xff] %vm603_vm8, %v776_v38  ;;  %v804_v40 = vsel %vm603_vm8, %v776_v38, 0.0  ;;  %v823_v41 = vmul.f32 %v776_v38, %v776_v38 }
 0x1a8   : > { %v834_v42 = vadd.f32 %v833_v48, %v832_v27  ;;  %v805_v44 = vadd.f32 %v804_v40, %v803_v39  ;;  %v839_v56 = vsel %vm603_vm8, %v825_v46, 0.0 }
 0x1a9   : > { %v835_v47 = vsel %vm603_vm8, %v823_v41, 0.0 }
 0x1aa   : > { %v807_v49 = vadd.f32 %v806_v45, %v805_v44  ;;  %v836_v50 = vadd.f32 %v835_v47, %v834_v42 }
 0x1ac   : > { %v809_v53 = vadd.f32 %v808_v52, %v807_v49  ;;  %v838_v55 = vadd.f32 %v837_v51, %v836_v50 }
 0x1ae   : > { %v810_v4 = vrot.slane %v809_v53, 4  ;;  %v840_v57 = vadd.f32 %v839_v56, %v838_v55 }
 0x1b0   : > { %v811_v54 = vadd.f32 %v810_v4, %v809_v53  ;;  %v841_v59 = vrot.slane %v840_v57, 4 }
 0x1b2   : > { %v812_v60 = vrot.slane %v811_v54, 2  ;;  %v842_v62 = vadd.f32 %v841_v59, %v840_v57 }
 0x1b4   : > { %v813_v58 = vadd.f32 %v812_v60, %v811_v54  ;;  %v843_v63 = vrot.slane %v842_v62, 2 }
 0x1b6   : > { %v814_v7 = vrot.slane %v813_v58, 1  ;;  %v844_v43 = vadd.f32 %v843_v63, %v842_v62 }
 0x1b8   : > { %v815_v16 = vadd.f32 %v814_v7, %v813_v58  ;;  %v845_v26 = vrot.slane %v844_v43, 1 }
 0x1ba   : > { %817 = vst.msk [vmem:[%s238_s27] sm:$0x1] %vm816_vm0, %v815_v16  ;;  %v846_v61 = vadd.f32 %v845_v26, %v844_v43 }
 0x1bc   : > { %847 = vst.msk [vmem:[%s241_s30] sm:$0x1] %vm816_vm0, %v846_v61 }
 0x1bd PF: > { %s16_s18 = sadd.s32 1, %s1087_s18  }
 0x1be   : > { %p13_p4 = scmp.ge.s32.totalorder %s16_s18, 8  }
 0x1c0   :  { %15 = sbr.rel (!%p13_p4) target bundleno = 1 (0x1), region = 86 }

// kernel: cnn_rnn_forward.10
= control target key start
LH: loop header
LB: loop body
LE: loop exit
PB: predicated region body
PF: predicated region fallthrough
CT: control target
= control target key end

     0   :  { %s170_s0 = inlined_call_operand.vmem [shape: f32[48,128], index: 0, kind: input, shape index: {}]   ;;  %s171_s1 = inlined_call_operand.vmem [shape: f32[1,128], index: 1, kind: input, shape index: {}]   ;;  %s172_s2 = inlined_call_operand.vmem [shape: f32[1,128], index: 2, kind: input, shape index: {}]   ;;  %s173_s3 = inlined_call_operand.vmem [shape: bf16[48,128], index: 3, kind: output, shape index: {}]  }
   0x1   :  { %v14_v0 = vld [vmem:[%s170_s0] sm:$0xff]  ;;  %v15_v1 = vld [vmem:[%s170_s0 + $0x8] sm:$0xff]  ;;  %v16_v6 = vld [vmem:[%s170_s0 + $0x10] sm:$0xff] }
   0x2   :  { %v86_v2 = vld [vmem:[%s171_s1] ss:$0 sm:$0xff]  ;;  %v17_v7 = vld [vmem:[%s170_s0 + $0x18] sm:$0xff]  ;;  %v19_v11 = vld [vmem:[%s170_s0 + $0x28] sm:$0xff] }
   0x3   :  { %v27_v3 = vmul.f32 %v86_v2, %v14_v0  ;;  %v28_v4 = vmul.f32 %v86_v2, %v15_v1  ;;  %v87_v5 = vld [vmem:[%s172_s2] ss:$0 sm:$0xff]  ;;  %v29_v8 = vmul.f32 %v86_v2, %v16_v6  ;;  %v30_v9 = vmul.f32 %v86_v2, %v17_v7 }
   0x4   :  { %v18_v10 = vld [vmem:[%s170_s0 + $0x20] sm:$0xff]  ;;  %v32_v15 = vmul.f32 %v86_v2, %v19_v11 }
   0x5   :  { %v40_v12 = vadd.f32 %v87_v5, %v27_v3  ;;  %v41_v13 = vadd.f32 %v87_v5, %v28_v4  ;;  %v31_v14 = vmul.f32 %v86_v2, %v18_v10  ;;  %v42_v16 = vadd.f32 %v87_v5, %v29_v8 }
   0x6   :  { %v43_v17 = vadd.f32 %v87_v5, %v30_v9  ;;  %v45_v21 = vadd.f32 %v87_v5, %v32_v15 }
   0x7   :  { %v46_v18 = vmax.f32 %v40_v12, 0.0  ;;  %v47_v19 = vmax.f32 %v41_v13, 0.0  ;;  %v44_v20 = vadd.f32 %v87_v5, %v31_v14  ;;  %v48_v22 = vmax.f32 %v42_v16, 0.0 }
   0x8   :  { %v49_v23 = vmax.f32 %v43_v17, 0.0  ;;  %v51_v26 = vmax.f32 %v45_v21, 0.0 }
   0x9   :  { %v103_v24 = vpack.c.bf16 %v47_v19, %v46_v18  ;;  %v50_v25 = vmax.f32 %v44_v20, 0.0 }
   0xa   :  { %v108_v27 = vpack.c.bf16 %v49_v23, %v48_v22 }
   0xb   :  { %104 = vst [vmem:[%s173_s3] sm:$0xff] %v103_v24   ;;  %v113_v28 = vpack.c.bf16 %v51_v26, %v50_v25 }
   0xc   :  { %115 = vst [vmem:[%s173_s3 + $0x8] sm:$0xff] %v108_v27  }
   0xd   :  { %116 = vst [vmem:[%s173_s3 + $0x10] sm:$0xff] %v113_v28  }

// kernel: cnn_rnn_forward.12
= control target key start
LH: loop header
LB: loop body
LE: loop exit
PB: predicated region body
PF: predicated region fallthrough
CT: control target
= control target key end

     0   :  { %v228_v1 = vmov 0   ;;  %vm87_vm0 = vcmask 261120   ;;  %v27_v11 = vlaneseq  ;;  %v229_v18 = vmov 1983009808   ;;  %s283_s1 = inlined_call_operand.vmem [shape: bf16[32,512], index: 1, kind: input, shape index: {}]   ;;  %s284_s0 = inlined_call_operand.vmem [shape: f32[2,32], index: 0, kind: input, shape index: {}]   ;;  %s285_s2 = inlined_call_operand.vmem [shape: f32[1,512], index: 2, kind: input, shape index: {}]   ;;  %s286_s3 = inlined_call_operand.vmem [shape: f32[2,512], index: 3, kind: output, shape index: {}]  }
   0x1   :  { %v216_v0 = vld [vmem:[%s283_s1 + $0x4] ss:$16 sps:$4 sm:$0xff]   ;;  %123 = vmatprep.mubr.bf16.mxu0 %v228_v1  ;;  %164 = vmatprep.mubr.bf16.mxu1 %v228_v1  ;;  %v218_v2 = vld [vmem:[%s283_s1 + $0xc] ss:$16 sps:$4 sm:$0xff]   ;;  %v220_v3 = vld [vmem:[%s283_s1] ss:$16 sps:$4 sm:$0xff]   ;;  %v184_v19 = vunpack.c.l.s4 %v229_v18 }
   0x2   :  { %91 = vmatprep.subr.bf16.mxu0 %v216_v0  ;;  %v221_v4 = vld [vmem:[%s283_s1 + $0x8] ss:$16 sps:$4 sm:$0xff]   ;;  %132 = vmatprep.subr.bf16.mxu1 %v218_v2  ;;  %v222_v5 = vld [vmem:[%s283_s1 + $0x24] ss:$16 sps:$4 sm:$0xff]   ;;  %v224_v6 = vld [vmem:[%s283_s1 + $0x2c] ss:$16 sps:$4 sm:$0xff]  }
   0x3   :  { %92 = vmatpush1.bf16.msra.mxu0 %v220_v3  ;;  %133 = vmatpush1.bf16.msra.mxu1 %v221_v4  ;;  %v226_v7 = vld [vmem:[%s283_s1 + $0x20] ss:$16 sps:$4 sm:$0xff]   ;;  %v227_v8 = vld [vmem:[%s283_s1 + $0x28] ss:$16 sps:$4 sm:$0xff]   ;;  %v28_v12 = vshrl.u32 %v27_v11, 7  ;;  %v185_v26 = vunpack.c.0.s8 %v184_v19 }
   0x4   :  { %93 = vmatprep.subr.bf16.mxu0 %v222_v5  ;;  %v15_v9 = vld [vmem:[%s284_s0] sm:$0x3]  ;;  %134 = vmatprep.subr.bf16.mxu1 %v224_v6 }
   0x5   :  { %v16_v10 = vpack.c.bf16 %v15_v9, %v15_v9  ;;  %v29_v13 = vsub.s32 0, %v28_v12  ;;  %v37_v14 = vsub.s32 2, %v28_v12  ;;  %v25_v15 = vld [vmem:[%s285_s2] sm:$0xf]  ;;  %v33_v16 = vsub.s32 1, %v28_v12 }
   0x6   :  { %v41_v17 = vsub.s32 3, %v28_v12  ;;  %v188_v40 = vsub.s32 %v185_v26, %v28_v12 }
   0x7   :  { %94 = vmatpush1.bf16.msra.mxu0 %v226_v7  ;;  %135 = vmatpush1.bf16.msra.mxu1 %v227_v8  ;;  %v30_v20 = vrot.slane %v25_v15, %v29_v13  ;;  %v38_v21 = vrot.slane %v25_v15, %v37_v14  ;;  %v34_v22 = vrot.slane %v25_v15, %v33_v16 }
   0x8   :  { %v42_v23 = vrot.slane %v25_v15, %v41_v17 }
   0xa   :  { %212 = vmatmul.mubr.msk.bf16.vlgmr.msra.gmra.mrb[0].mxu0 %vm87_vm0, %v16_v10  ;;  %213 = vmatmul.mubr.msk.bf16.vlgmr.msra.gmra.mrb[0].mxu1 %vm87_vm0, %v16_v10 }
  0xdd   :  { %v125_v24 = vpop.f32.mrb[0].mxu0  ;;  %v166_v25 = vpop.f32.mrb[0].mxu1 }
  0xde   :  { %v126_v27 = vadd.f32 %v125_v24, %v30_v20  ;;  %v167_v28 = vadd.f32 %v166_v25, %v38_v21  ;;  %v127_v29 = vpop.f32.mrb[1].mxu0  ;;  %v168_v30 = vpop.f32.mrb[1].mxu1 }
  0xdf   :  { %v128_v31 = vadd.f32 %v127_v29, %v34_v22  ;;  %v169_v32 = vadd.f32 %v168_v30, %v42_v23  ;;  %v129_v33 = vpop.f32.mrb[2].mxu0  ;;  %v170_v34 = vpop.f32.mrb[2].mxu1 }
  0xe0   :  { %v173_v35 = vmax.f32 %v126_v27, 0.0  ;;  %v175_v36 = vmax.f32 %v167_v28, 0.0  ;;  %v130_v37 = vpop.f32.mrb[3].mxu0  ;;  %v171_v38 = vpop.f32.mrb[3].mxu1 }
  0xe1   :  { %v174_v39 = vmax.f32 %v128_v31, 0.0  ;;  %v176_v41 = vmax.f32 %v169_v32, 0.0 }
  0xe3   :  { %v181_v42 = vcombine.low %v173_v35, %v174_v39  ;;  %v182_v43 = vcombine.low %v175_v36, %v176_v41 }
  0xe5   :  { %v189_v44 = vrot.slane %v181_v42, %v188_v40  ;;  %v196_v45 = vrot.slane %v182_v43, %v188_v40 }
  0xe7   :  { %v197_v46 = vcombine.low %v189_v44, %v196_v45 }
  0xe9   :  { %199 = vst [vmem:[%s286_s3] sm:$0xff] %v197_v46 }

// kernel: cnn_rnn_forward.11
= control target key start
LH: loop header
LB: loop body
LE: loop exit
PB: predicated region body
PF: predicated region fallthrough
CT: control target
= control target key end

     0   :  { %v607_v17 = vmov 0.0   ;;  %s660_s0 = inlined_call_operand.vmem [shape: f32[3,2,32], index: 0, kind: input, shape index: {}]   ;;  %s661_s3 = inlined_call_operand.vmem [shape: f32[80,33], index: 3, kind: input, shape index: {}]   ;;  %s662_s7 = inlined_call_operand.vmem [shape: f32[2,32], index: 7, kind: output, shape index: {}]   ;;  %s663_s4 = inlined_call_operand.vmem [shape: f32[16,16], index: 4, kind: input, shape index: {}]   ;;  %s664_s5 = inlined_call_operand.vmem [shape: f32[1,16], index: 5, kind: input, shape index: {}]   ;;  %s665_s6 = inlined_call_operand.vmem [shape: f32[16,32], index: 6, kind: input, shape index: {}]   ;;  %s666_s1 = inlined_call_operand.vmem [shape: f32[2,32], index: 1, kind: input, shape index: {}]   ;;  %s667_s2 = inlined_call_operand.vmem [shape: f32[2,16], index: 2, kind: input, shape index: {}]  }
   0x1   :  { %v529_v0 = vld [vmem:[%s661_s3] sm:$0xff]  ;;  %v534_v1 = vld [vmem:[%s661_s3 + $0x8] sm:$0xff]  ;;  %v539_v2 = vld [vmem:[%s661_s3 + $0x10] sm:$0xff] }
   0x2   :  { %v544_v3 = vld [vmem:[%s661_s3 + $0x18] sm:$0xff]  ;;  %v549_v4 = vld [vmem:[%s661_s3 + $0x20] sm:$0xff]  ;;  %v554_v5 = vld [vmem:[%s661_s3 + $0x28] sm:$0xff] }
   0x3   :  { %v559_v6 = vld [vmem:[%s661_s3 + $0x30] sm:$0xff]  ;;  %v564_v7 = vld [vmem:[%s661_s3 + $0x38] sm:$0xff]  ;;  %v569_v8 = vld [vmem:[%s661_s3 + $0x40] sm:$0xff] }
   0x4   :  { %v574_v9 = vld [vmem:[%s661_s3 + $0x48] sm:$0xff]  ;;  %v579_v10 = vld [vmem:[%s663_s4] sm:$0xff] }
   0x5   :  { %v584_v11 = vld [vmem:[%s663_s4 + $0x8] sm:$0xff]  ;;  %v589_v12 = vld [vmem:[%s664_s5] ss:$0 sm:$0xff]  ;;  %s613_s5 = smov 0  }
   0x6   :  { %v594_v13 = vld [vmem:[%s665_s6] sm:$0xff]  ;;  %v599_v14 = vld [vmem:[%s665_s6 + $0x8] sm:$0xff] }
   0x7   :  { %v41_v15 = vld [vmem:[%s666_s1] sm:$0x3]  }
   0x8   :  { %v42_v16 = vld [vmem:[%s667_s2] sm:$0x3]  }
   0x9 LB: > { %v386_v18 = vpack.c.bf16 %v534_v1, %v529_v0  ;;  %v480_v19 = vmov 0.0|0.0   ;;  %s481_s1 = smov 32   ;;  %v389_v20 = vpack.c.bf16 %v544_v3, %v539_v2  ;;  %v401_v21 = vpack.c.bf16 %v584_v11, %v579_v10  ;;  %s485_s2 = smov 64   ;;  %s478_s5 = sphi %s613_s5, %s48_s5   ;;  %v474_v15 = vphi %v41_v15, %v447_v15   ;;  %v470_v16 = vphi %v42_v16, %v227_v16   ;;  %v466_v17 = vphi %v607_v17, %v668_v17  }
   0xa   : > { %385 = vmatprep.subr.bf16.mxu0 %v480_v19  ;;  %400 = vmatprep.subr.bf16.mxu1 %v480_v19  ;;  %vm482_vm0 = vmmov 0   ;;  %v483_v22 = vmov 0.0   ;;  %vm141_vm1 = vcmask 130048   ;;  %v484_v23 = vmov 32   ;;  %s326_s6 = sshll.u32 %s478_s5, 1  ;;  %s48_s5 = sadd.s32 1, %s478_s5  }
   0xb   : > { %56 = vrot.lane.b32.xlu0 %v474_v15, %s481_s1  ;;  %387 = vmatpush3.bf16.msra.mxu0 %v386_v18  ;;  %v392_v24 = vpack.c.bf16 %v554_v5, %v549_v4  ;;  %v395_v25 = vpack.c.bf16 %v564_v7, %v559_v6  ;;  %v398_v26 = vpack.c.bf16 %v574_v9, %v569_v8  ;;  %s53_s12 = scalar_lea.vmem %s660_s0, %s326_s6  ;;  %vm63_vm2 = vcmask 261120   ;;  %p45_p0 = scmp.ge.s32.totalorder %s48_s5, 3  }
   0xc   : > { %388 = vmatprep.subr.bf16.mxu0 %v480_v19  ;;  %368 = vmatprep.mubr.msk.f32.mxu0 %vm482_vm0, %v483_v22  ;;  %v54_v28 = vld [vmem:[%s53_s12] sm:$0x3]  ;;  %vm65_vm3 = vcmask 523264   ;;  %vm67_vm4 = vcmask 654336   ;;  %v404_v35 = vpack.c.bf16 %v599_v14, %v594_v13  ;;  %vm304_vm5 = vcmask (%p45_p0), 254976  }
   0xd   : > { %375 = vmatprep.mubr.msk.f32.mxu1 %vm482_vm0, %v483_v22  ;;  %402 = vmatpush3.bf16.msra.mxu1 %v401_v21 }
   0xe   : > { %444 = vset.pattern.permute.xlu1 %v484_v23  ;;  %403 = vmatprep.subr.bf16.mxu1 %v480_v19 }
   0xf   : > { %60 = vrot.lane.b32.xlu0 %v470_v16, %s485_s2  ;;  %390 = vmatpush3.bf16.msra.mxu0 %v389_v20 }
  0x10   : > { %391 = vmatprep.subr.bf16.mxu0 %v480_v19  ;;  %376 = vmatmul.mubr.msk.f32.vlgmr.msra.gmra.mrb[0].mxu1 %vm141_vm1, %v470_v16 }
  0x11   : > { %445 = vset.pattern.permute.xlu0 %v484_v23  ;;  %382 = vmatprep.mubr.msk.f32.mxu1 %vm482_vm0, %v483_v22 }
  0x12   : > { %405 = vmatpush3.bf16.msra.mxu1 %v404_v35 }
  0x13   : > { %393 = vmatpush3.bf16.msra.mxu0 %v392_v24 }
  0x14   : > { %394 = vmatprep.subr.bf16.mxu0 %v480_v19 }
  0x17   : > { %396 = vmatpush3.bf16.msra.mxu0 %v395_v25 }
  0x18   : > { %397 = vmatprep.subr.bf16.mxu0 %v480_v19 }
  0x1b   : > { %399 = vmatpush3.bf16.msra.mxu0 %v398_v26 }
  0x7d   : > { %v57_v27 = vpop.permute.xlu0 %56 }
  0x7e   : > { %v64_v29 = vsel %vm63_vm2, %v54_v28, %v57_v27 }
  0x81   : > { %v61_v30 = vpop.permute.xlu0 %60 }
  0x82   : > { %v66_v31 = vsel %vm65_vm3, %v64_v29, %v61_v30 }
  0x83   : > { %369 = vmatmul.mubr.msk.f32.vlgmr.msra.gmra.mrb[0].mxu0 %vm67_vm4, %v66_v31 }
  0xe3   : > { %v210_v32 = vpop.f32.mrb[0].mxu1 }
  0xe4   : > { %v377_v33 = vpop.f32.mrb[1].mxu1  ;;  %v214_v37 = vadd.f32 %v470_v16, %v210_v32 }
 0x156   : > { %v137_v34 = vpop.f32.mrb[0].mxu0 }
 0x157   : > { %217 = vperm.xlu1 %444, %v137_v34   ;;  %v370_v36 = vpop.f32.mrb[1].mxu0 }
 0x1d6   : > { %v218_v38 = vpop.permute.xlu1 %217 }
 0x1d7   : > { %v226_v39 = vmul.f32 %v589_v12, %v218_v38 }
 0x1d9   : > { %v227_v16 = vadd.f32 %v226_v39, %v214_v37  }
 0x1db   : > { %383 = vmatmul.mubr.msk.f32.vlgmr.msra.gmra.mrb[2].mxu1 %vm141_vm1, %v227_v16 }
 0x2ae   : > { %v297_v40 = vpop.f32.mrb[2].mxu1 }
 0x2af   : > { %v301_v41 = vadd.f32 %v297_v40, %v137_v34  ;;  %v384_v42 = vpop.f32.mrb[3].mxu1 }
 0x2b1   : > { %446 = vtanh.f32 %v301_v41 }
 0x2b8   :  { %47 = sbr.rel (!%p45_p0) target bundleno = 9 (0x9), region = 56 }
 0x2bb   : > { %v447_v15 = vpop.eup %446  }
 0x2bc   : > { %v303_v43 = vadd.f32 %v466_v17, %v447_v15  }
 0x2be   : > { %v668_v17 = vmov %v303_v43  ;;  %305 = vst.msk [vmem:[%s662_s7] sm:$0x3] (%p45_p0), %vm304_vm5, %v303_v43 }

// kernel: cnn_rnn_forward.13
= control target key start
LH: loop header
LB: loop body
LE: loop exit
PB: predicated region body
PF: predicated region fallthrough
CT: control target
= control target key end

     0   :  { %v22_v30 = vlaneseq  ;;  %s674_s0 = inlined_call_operand.vmem [shape: f32[2,512], index: 0, kind: input, shape index: {}]   ;;  %s675_s1 = inlined_call_operand.vmem [shape: bf16[512,10], index: 1, kind: input, shape index: {}]   ;;  %s676_s2 = inlined_call_operand.vmem [shape: f32[1,10], index: 2, kind: input, shape index: {}]   ;;  %s677_s3 = inlined_call_operand.hbm [shape: f32[2,10], index: 3, kind: output, shape index: {}]  }
   0x1   :  { %v481_v0 = vld [vmem:[%s675_s1 + $0x40] sm:$0xff]   ;;  %v485_v4 = vld [vmem:[%s675_s1 + $0x48] sm:$0xff]   ;;  %v489_v8 = vld [vmem:[%s675_s1 + $0x50] sm:$0xff]  }
   0x2   :  { %v482_v1 = vld [vmem:[%s675_s1 + $0xc0] sm:$0xff]   ;;  %435 = vmatprep.subr.bf16.mxu0 %v481_v0  ;;  %v486_v5 = vld [vmem:[%s675_s1 + $0xc8] sm:$0xff]   ;;  %v490_v9 = vld [vmem:[%s675_s1 + $0xd0] sm:$0xff]  }
   0x3   :  { %v483_v2 = vld [vmem:[%s675_s1] sm:$0xff]   ;;  %457 = vmatprep.subr.bf16.mxu1 %v482_v1  ;;  %v487_v6 = vld [vmem:[%s675_s1 + $0x8] sm:$0xff]   ;;  %v491_v10 = vld [vmem:[%s675_s1 + $0x10] sm:$0xff]  }
   0x4   :  { %v484_v3 = vld [vmem:[%s675_s1 + $0x80] sm:$0xff]   ;;  %436 = vmatpush3.bf16.msra.mxu0 %v483_v2  ;;  %v488_v7 = vld [vmem:[%s675_s1 + $0x88] sm:$0xff]   ;;  %v492_v11 = vld [vmem:[%s675_s1 + $0x90] sm:$0xff]  }
   0x5   :  { %458 = vmatpush3.bf16.msra.mxu1 %v484_v3  ;;  %437 = vmatprep.subr.bf16.mxu0 %v485_v4  ;;  %v493_v12 = vld [vmem:[%s675_s1 + $0x58] sm:$0xff]   ;;  %v497_v16 = vld [vmem:[%s675_s1 + $0x60] sm:$0xff]   ;;  %v501_v20 = vld [vmem:[%s675_s1 + $0x68] sm:$0xff]  }
   0x6   :  { %459 = vmatprep.subr.bf16.mxu1 %v486_v5  ;;  %v494_v13 = vld [vmem:[%s675_s1 + $0xd8] sm:$0xff]   ;;  %v498_v17 = vld [vmem:[%s675_s1 + $0xe0] sm:$0xff]   ;;  %v502_v21 = vld [vmem:[%s675_s1 + $0xe8] sm:$0xff]  }
   0x7   :  { %v495_v14 = vld [vmem:[%s675_s1 + $0x18] sm:$0xff]   ;;  %v499_v18 = vld [vmem:[%s675_s1 + $0x20] sm:$0xff]   ;;  %v503_v22 = vld [vmem:[%s675_s1 + $0x28] sm:$0xff]  }
   0x8   :  { %438 = vmatpush3.bf16.msra.mxu0 %v487_v6  ;;  %v496_v15 = vld [vmem:[%s675_s1 + $0x98] sm:$0xff]   ;;  %v500_v19 = vld [vmem:[%s675_s1 + $0xa0] sm:$0xff]   ;;  %v504_v23 = vld [vmem:[%s675_s1 + $0xa8] sm:$0xff]  }
   0x9   :  { %460 = vmatpush3.bf16.msra.mxu1 %v488_v7  ;;  %439 = vmatprep.subr.bf16.mxu0 %v489_v8  ;;  %v505_v24 = vld [vmem:[%s675_s1 + $0x70] sm:$0xff]   ;;  %v509_v28 = vld [vmem:[%s675_s1 + $0x78] sm:$0xff]   ;;  %v16_v33 = vld [vmem:[%s674_s0] sm:$0xff] }
   0xa   :  { %461 = vmatprep.subr.bf16.mxu1 %v490_v9  ;;  %v506_v25 = vld [vmem:[%s675_s1 + $0xf0] sm:$0xff]   ;;  %v510_v29 = vld [vmem:[%s675_s1 + $0xf8] sm:$0xff]  }
   0xb   :  { %v507_v26 = vld [vmem:[%s675_s1 + $0x30] sm:$0xff]   ;;  %v511_v31 = vld [vmem:[%s675_s1 + $0x38] sm:$0xff]  }
   0xc   :  { %440 = vmatpush3.bf16.msra.mxu0 %v491_v10  ;;  %v508_v27 = vld [vmem:[%s675_s1 + $0xb0] sm:$0xff]   ;;  %v512_v32 = vld [vmem:[%s675_s1 + $0xb8] sm:$0xff]  }
   0xd   :  { %462 = vmatpush3.bf16.msra.mxu1 %v492_v11  ;;  %441 = vmatprep.subr.bf16.mxu0 %v493_v12 }
   0xe   :  { %463 = vmatprep.subr.bf16.mxu1 %v494_v13 }
  0x10   :  { %442 = vmatpush3.bf16.msra.mxu0 %v495_v14 }
  0x11   :  { %464 = vmatpush3.bf16.msra.mxu1 %v496_v15  ;;  %443 = vmatprep.subr.bf16.mxu0 %v497_v16 }
  0x12   :  { %465 = vmatprep.subr.bf16.mxu1 %v498_v17 }
  0x14   :  { %444 = vmatpush3.bf16.msra.mxu0 %v499_v18 }
  0x15   :  { %466 = vmatpush3.bf16.msra.mxu1 %v500_v19  ;;  %445 = vmatprep.subr.bf16.mxu0 %v501_v20 }
  0x16   :  { %467 = vmatprep.subr.bf16.mxu1 %v502_v21 }
  0x18   :  { %446 = vmatpush3.bf16.msra.mxu0 %v503_v22 }
  0x19   :  { %468 = vmatpush3.bf16.msra.mxu1 %v504_v23  ;;  %447 = vmatprep.subr.bf16.mxu0 %v505_v24 }
  0x1a   :  { %469 = vmatprep.subr.bf16.mxu1 %v506_v25 }
  0x1c   :  { %448 = vmatpush3.bf16.msra.mxu0 %v507_v26 }
  0x1d   :  { %470 = vmatpush3.bf16.msra.mxu1 %v508_v27  ;;  %449 = vmatprep.subr.bf16.mxu0 %v509_v28 }
  0x1e   :  { %471 = vmatprep.subr.bf16.mxu1 %v510_v29 }
  0x20   :  { %450 = vmatpush3.bf16.msra.mxu0 %v511_v31 }
  0x21   :  { %8 = vsyncpa [#allocation3], 0  ;;  %472 = vmatpush3.bf16.msra.mxu1 %v512_v32  ;;  %v538_v34 = vmov 1983009808   ;;  %v23_v36 = vshrl.u32 %v22_v30, 7  ;;  %v18_v38 = vcombine.high %v16_v33, %v16_v33  ;;  %s539_s24 = smov [#allocation2]  }
  0x22   :  { %v20_v35 = vunpack.c.l.s4 %v538_v34  ;;  %v402_v50 = vld [vmem:[%s676_s2] ss:$0 sm:$0xff]  ;;  %s394_s25 = sshll.u32 %s539_s24, 4  ;;  %vm386_vm0 = vcmask 74752   ;;  %s395_s25 = int_to_ptr.vmem [resolvable:$true] %s394_s25 }
  0x23   :  { %s514_s26 = scalar_lea.vmem %s395_s25, 32  ;;  %p519_p1 = scmp.lt.s32.totalorder %s395_s25, %s395_s25 }
  0x24   :  { %v21_v37 = vunpack.c.0.s8 %v20_v35  ;;  %p515_p0 = scmp.ne.s32.totalorder %s395_s25, %s514_s26  ;;  %p520_p2 = scmp.lt.s32.totalorder %s514_s26, %s514_s26 }
  0x26   :  { %v24_v39 = vsub.s32 %v21_v37, %v23_v36  ;;  %p521_p3 = por %p520_p2, %p519_p1 }
  0x28   :  { %v25_v40 = vrot.slane %v16_v33, %v24_v39  ;;  %v32_v41 = vrot.slane %v18_v38, %v24_v39  ;;  %p522_p4 = pnand %p521_p3, %p515_p0 }
  0x2a   :  { %v33_v42 = vcombine.high %v25_v40, %v25_v40  ;;  %v34_v43 = vcombine.high %v32_v41, %v32_v41  ;;  %v39_v44 = vpack.c.bf16 %v25_v40, %v25_v40  ;;  %v41_v45 = vpack.c.bf16 %v32_v41, %v32_v41 }
  0x2c   :  { %v40_v46 = vpack.c.bf16 %v33_v42, %v33_v42  ;;  %v42_v47 = vpack.c.bf16 %v34_v43, %v34_v43 }
  0x2e   :  { %338 = vmatprep.mubr.bf16.mxu0 %v40_v46  ;;  %378 = vmatprep.mubr.bf16.mxu1 %v42_v47 }
  0x2f   :  { %339 = vmatmul.mubr.bf16.vlgmr.msra.gmra.mrb[0].mxu0 %v39_v44  ;;  %379 = vmatmul.mubr.bf16.vlgmr.msra.gmra.mrb[0].mxu1 %v41_v45 }
 0x102   :  { %v451_v48 = vpop.f32.mrb[0].mxu0  ;;  %v473_v49 = vpop.f32.mrb[0].mxu1 }
 0x103   :  { %v452_v51 = vpop.f32.mrb[1].mxu0  ;;  %v474_v52 = vpop.f32.mrb[1].mxu1 }
 0x104   :  { %v453_v53 = vadd.f32 %v452_v51, %v451_v48  ;;  %v475_v54 = vadd.f32 %v474_v52, %v473_v49  ;;  %v454_v55 = vpop.f32.mrb[2].mxu0  ;;  %v476_v56 = vpop.f32.mrb[2].mxu1 }
 0x105   :  { %v455_v57 = vpop.f32.mrb[3].mxu0  ;;  %v477_v58 = vpop.f32.mrb[3].mxu1 }
 0x106   :  { %v341_v59 = vadd.f32 %v453_v53, %v402_v50 }
 0x108   :  { %v381_v60 = vadd.f32 %v475_v54, %v341_v59 }
 0x10a   :  { %387 = vst.msk [vmem:[#allocation2] sm:$0x3] %vm386_vm0, %v381_v60 }
 0x10b   :  { %525 = shalt.err (!%p522_p4)
}
 0x10c   :  { %s526_s28 = scalar_lea.hbm %s677_s3, 32 }
 0x10d   :  { %p527_p5 = scmp.ne.s32.totalorder %s677_s3, %s526_s28  ;;  %p530_p6 = scmp.lt.u32.totalorder %s526_s28, %s677_s3 }
 0x10f   :  { %p532_p7 = pnand %p530_p6, %p527_p5 }
 0x111   :  { %535 = shalt.err (!%p532_p7)
}
 0x112   :  { %397 = dma.vmem_to_hbm [thread:$0]  %s395_s25, 32, %s677_s3, [#allocation3]  }
 0x113   :  { %536 = dma.done.wait [#allocation3], 32  }
 0x114   :  { %537 = vsyncadd [#allocation3], 4294967264 }
 0x115   :  { %401 = vsyncpa [#allocation3], 1 }

</bundles_post_ra>
